<compile_context>
chip_gen: v5e
topology: v5e:2x2
jax: 0.10.0
libtpu: 0.0.40
codegen_flags: <defaults>
</compile_context>

<pallas_src>
import functools

import jax
import jax.numpy as jnp
from jax import lax
from jax.experimental import pallas as pl
from jax.experimental.pallas import tpu as pltpu

INPUT_DIM = 3
LATENT_DIM = 5
HIDDEN_DIM_MULTIPLIER = 5
HIDDEN_DIM = LATENT_DIM * HIDDEN_DIM_MULTIPLIER  # 25
NUM_LAYERS = 2  # fixed at 2 (matches module default); layers unrolled explicitly

HP = 128          # lane-padded hidden / latent / output width (one full vreg row)
GP = 4 * HP       # lane-aligned gate vector: gates at offsets 0 / 128 / 256 / 384

_SQRT_HALF = 0.7071067811865476

PARAM_ORDER = [
    "wi1", "bi1", "wi2", "bi2", "wi3", "bi3",          # input MLP
    "ewih", "ewhh", "eb",                              # encoder LSTM (2 layers)
    "wh2l", "bh2l", "wl2h", "bl2h",                    # latent projections
    "dwih", "dwhh", "db",                              # decoder LSTM (2 layers)
    "wo1", "bo1", "wo2", "bo2", "wo3", "bo3",          # output MLP
]


def _gelu(x):
    # exact (erf-based) GELU, matching torch.nn.GELU() default
    return 0.5 * x * (1.0 + lax.erf(x * _SQRT_HALF))


# ----------------------------------------------------------------------------- kernel
def _gates(g, c):
    """PyTorch gate order i,f,g,o; each gate occupies a whole 128-lane block."""
    i = jax.nn.sigmoid(g[:, 0 * HP:1 * HP])
    f = jax.nn.sigmoid(g[:, 1 * HP:2 * HP])
    gg = jnp.tanh(g[:, 2 * HP:3 * HP])
    o = jax.nn.sigmoid(g[:, 3 * HP:4 * HP])
    c_new = f * c + i * gg
    h_new = o * jnp.tanh(c_new)
    return h_new, c_new


def _tokenizer_kernel(
    x_ref, len_ref,
    wi1, bi1, wi2, bi2, wi3, bi3,
    ewih, ewhh, eb,
    wh2l, bh2l, wl2h, bl2h,
    dwih, dwhh, db,
    wo1, bo1, wo2, bo2, wo3, bo3,
    out_ref,
    a_scr, h_scr,
    *, T, BP, DIN,
):
    f32 = jnp.float32

    # small loop-invariant loads hoisted out of both recurrences
    lengths = len_ref[...]            # (BP, 1) int32; padded rows have length 0
    eb0, eb1 = eb[0], eb[1]
    db1 = db[1]

    # -------- encoder input MLP, batched over the whole sequence (hoisted) ------
    x_all = x_ref[...].reshape(T * BP, DIN)
    a = _gelu(jnp.dot(x_all, wi1[...], preferred_element_type=f32) + bi1[...])
    a = _gelu(jnp.dot(a, wi2[...], preferred_element_type=f32) + bi2[...])
    a = _gelu(jnp.dot(a, wi3[...], preferred_element_type=f32) + bi3[...])
    a_scr[...] = a.reshape(T, BP, HP)

    zeros = jnp.zeros((BP, HP), f32)

    # -------- encoder: 2 stacked LSTM layers, packed-seq freeze via mask --------
    def enc_body(t, carry):
        h0, c0, h1, c1 = carry
        mask = t < lengths                                 # (BP, 1) -> broadcast
        a_t = a_scr[t]                                     # (BP, HP)
        g0 = (jnp.dot(a_t, ewih[0], preferred_element_type=f32)
              + jnp.dot(h0, ewhh[0], preferred_element_type=f32) + eb0)
        h0n, c0n = _gates(g0, c0)
        h0 = jnp.where(mask, h0n, h0)
        c0 = jnp.where(mask, c0n, c0)
        g1 = (jnp.dot(h0, ewih[1], preferred_element_type=f32)
              + jnp.dot(h1, ewhh[1], preferred_element_type=f32) + eb1)
        h1n, c1n = _gates(g1, c1)
        h1 = jnp.where(mask, h1n, h1)
        c1 = jnp.where(mask, c1n, c1)
        return (h0, c0, h1, c1)

    _, _, h_top, _ = lax.fori_loop(0, T, enc_body, (zeros, zeros, zeros, zeros))

    # h_n[-1] -> latent -> back to hidden (decoder input vector)
    z = jnp.dot(h_top, wh2l[...], preferred_element_type=f32) + bh2l[...]
    z_h = jnp.dot(z, wl2h[...], preferred_element_type=f32) + bl2h[...]

    # decoder layer-0 input-gate term is loop invariant (input is the repeated z_h)
    zg0 = jnp.dot(z_h, dwih[0], preferred_element_type=f32) + db[0]   # (BP, 4*HP)

    # -------- decoder: 2 stacked LSTM layers; store masked h1 per step ----------
    def dec_body(t, carry):
        h0, c0, h1, c1 = carry
        mask = t < lengths
        g0 = zg0 + jnp.dot(h0, dwhh[0], preferred_element_type=f32)
        h0n, c0n = _gates(g0, c0)
        h0 = jnp.where(mask, h0n, h0)
        c0 = jnp.where(mask, c0n, c0)
        g1 = (jnp.dot(h0, dwih[1], preferred_element_type=f32)
              + jnp.dot(h1, dwhh[1], preferred_element_type=f32) + db1)
        h1n, c1n = _gates(g1, c1)
        h1 = jnp.where(mask, h1n, h1)
        c1 = jnp.where(mask, c1n, c1)
        # pad_packed_sequence zero-fills padded steps BEFORE the output MLP
        h_scr[t] = jnp.where(mask, h1, 0.0)
        return (h0, c0, h1, c1)

    lax.fori_loop(0, T, dec_body, (zeros, zeros, zeros, zeros))

    # -------- output MLP batched over the whole sequence + one lane-dense store -
    h_all = h_scr[...].reshape(T * BP, HP)
    y = _gelu(jnp.dot(h_all, wo1[...], preferred_element_type=f32) + bo1[...])
    y = _gelu(jnp.dot(y, wo2[...], preferred_element_type=f32) + bo2[...])
    y = jnp.dot(y, wo3[...], preferred_element_type=f32) + bo3[...]
    out_ref[...] = y.reshape(T, BP, HP)


# ----------------------------------------------------------------------------- padding
def _pad2(w, rows, cols):
    return jnp.pad(w, ((0, rows - w.shape[0]), (0, cols - w.shape[1])))


def _pad_gates_w(w, H):
    """(L, in, 4H) -> (L, HP, 4*HP); each gate block lane-aligned at k*128."""
    in_dim = w.shape[1]
    blocks = []
    for k in range(4):
        g = w[:, :, k * H:(k + 1) * H]
        blocks.append(jnp.pad(g, ((0, 0), (0, HP - in_dim), (0, HP - H))))
    return jnp.concatenate(blocks, axis=-1)


def _pad_gates_b(b, H):
    """(L, 1, 4H) -> (L, 1, 4*HP)."""
    blocks = []
    for k in range(4):
        g = b[:, :, k * H:(k + 1) * H]
        blocks.append(jnp.pad(g, ((0, 0), (0, 0), (0, HP - H))))
    return jnp.concatenate(blocks, axis=-1)


def _pad_params(p, input_dim=INPUT_DIM, hidden_dim=HIDDEN_DIM):
    """Zero-pad logical (H=25, L=5) parameters to the lane-aligned kernel layout."""
    H = hidden_dim
    q = {}
    q["wi1"], q["bi1"] = _pad2(p["wi1"], input_dim, HP), _pad2(p["bi1"], 1, HP)
    q["wi2"], q["bi2"] = _pad2(p["wi2"], HP, HP), _pad2(p["bi2"], 1, HP)
    q["wi3"], q["bi3"] = _pad2(p["wi3"], HP, HP), _pad2(p["bi3"], 1, HP)
    q["ewih"] = _pad_gates_w(p["ewih"], H)
    q["ewhh"] = _pad_gates_w(p["ewhh"], H)
    q["eb"] = _pad_gates_b(p["eb"], H)
    q["wh2l"], q["bh2l"] = _pad2(p["wh2l"], HP, HP), _pad2(p["bh2l"], 1, HP)
    q["wl2h"], q["bl2h"] = _pad2(p["wl2h"], HP, HP), _pad2(p["bl2h"], 1, HP)
    q["dwih"] = _pad_gates_w(p["dwih"], H)
    q["dwhh"] = _pad_gates_w(p["dwhh"], H)
    q["db"] = _pad_gates_b(p["db"], H)
    q["wo1"], q["bo1"] = _pad2(p["wo1"], HP, HP), _pad2(p["bo1"], 1, HP)
    q["wo2"], q["bo2"] = _pad2(p["wo2"], HP, HP), _pad2(p["bo2"], 1, HP)
    q["wo3"], q["bo3"] = _pad2(p["wo3"], HP, HP), _pad2(p["bo3"], 1, HP)
    return q


# ----------------------------------------------------------------------------- wrapper
def node_tokenizer_forward(x, lengths, params):
    """x: (B, T, input_dim) f32, lengths: (B,) int with max(lengths) == T."""
    B, T, Din = x.shape
    BP = ((B + 7) // 8) * 8                                    # sublane-pad the batch

    x_tm = jnp.transpose(x, (1, 0, 2)).astype(jnp.float32)     # time-major (T, B, Din)
    x_tm = jnp.pad(x_tm, ((0, 0), (0, BP - B), (0, 0)))
    len_p = jnp.pad(jnp.asarray(lengths, jnp.int32), (0, BP - B)).reshape(BP, 1)

    pp = _pad_params(params)
    flat = [x_tm, len_p] + [pp[k] for k in PARAM_ORDER]

    kernel = functools.partial(_tokenizer_kernel, T=T, BP=BP, DIN=Din)
    out_tm = pl.pallas_call(
        kernel,
        out_shape=jax.ShapeDtypeStruct((T, BP, HP), jnp.float32),   # lane-dense output
        in_specs=[pl.BlockSpec(memory_space=pltpu.MemorySpace.VMEM)] * len(flat),
        out_specs=pl.BlockSpec(memory_space=pltpu.MemorySpace.VMEM),
        scratch_shapes=[
            pltpu.VMEM((T, BP, HP), jnp.float32),   # hoisted input-MLP activations
            pltpu.VMEM((T, BP, HP), jnp.float32),   # masked decoder h1 per step
        ],
    )(*flat)
    # strip padding: (T, BP, HP) -> (B, T, Din)
    return jnp.transpose(out_tm[:, :B, :Din], (1, 0, 2))


# ----------------------------------------------------------------------------- params
def init_params(key, input_dim=INPUT_DIM, latent_dim=LATENT_DIM):
    H = latent_dim * HIDDEN_DIM_MULTIPLIER
    keys = iter(jax.random.split(key, 64))
    scale = 0.2

    def lin(in_d, out_d):
        w = scale * jax.random.normal(next(keys), (in_d, out_d), jnp.float32)
        b = scale * jax.random.normal(next(keys), (1, out_d), jnp.float32)
        return w, b

    def lstm():
        # weights stored as (layer, in_dim, 4H); bias = b_ih + b_hh fused, (layer, 1, 4H)
        wih = scale * jax.random.normal(next(keys), (NUM_LAYERS, H, 4 * H), jnp.float32)
        whh = scale * jax.random.normal(next(keys), (NUM_LAYERS, H, 4 * H), jnp.float32)
        b = scale * jax.random.normal(next(keys), (NUM_LAYERS, 1, 4 * H), jnp.float32)
        return wih, whh, b

    p = {}
    p["wi1"], p["bi1"] = lin(input_dim, H)
    p["wi2"], p["bi2"] = lin(H, H)
    p["wi3"], p["bi3"] = lin(H, H)
    p["ewih"], p["ewhh"], p["eb"] = lstm()
    p["wh2l"], p["bh2l"] = lin(H, latent_dim)
    p["wl2h"], p["bl2h"] = lin(latent_dim, H)
    p["dwih"], p["dwhh"], p["db"] = lstm()
    p["wo1"], p["bo1"] = lin(H, H)
    p["wo2"], p["bo2"] = lin(H, H)
    p["wo3"], p["bo3"] = lin(H, input_dim)
    return p


# ----------------------------------------------------------------------------- reference
def _dot_hi(a, b):
    return jnp.dot(a, b, precision=jax.lax.Precision.HIGHEST,
                   preferred_element_type=jnp.float32)


def _lstm_cell_ref(x, h, c, wih, whh, b, H):
    g = _dot_hi(x, wih) + _dot_hi(h, whh) + b
    i = jax.nn.sigmoid(g[:, 0:H])
    f = jax.nn.sigmoid(g[:, H:2 * H])
    gg = jnp.tanh(g[:, 2 * H:3 * H])
    o = jax.nn.sigmoid(g[:, 3 * H:4 * H])
    c_new = f * c + i * gg
    h_new = o * jnp.tanh(c_new)
    return h_new, c_new


def reference_forward(x, lengths, p):
    """Pure-JAX reference (logical, unpadded shapes; full-f32 matmul precision)."""
    B, T, _ = x.shape
    H = HIDDEN_DIM
    lengths = lengths.reshape(B, 1)

    def dense(v, w, b):
        return _dot_hi(v, w) + b

    h0 = c0 = h1 = c1 = jnp.zeros((B, H), jnp.float32)
    for t in range(T):
        a = _gelu(dense(x[:, t, :], p["wi1"], p["bi1"]))
        a = _gelu(dense(a, p["wi2"], p["bi2"]))
        a = _gelu(dense(a, p["wi3"], p["bi3"]))
        mask = t < lengths
        h0n, c0n = _lstm_cell_ref(a, h0, c0, p["ewih"][0], p["ewhh"][0], p["eb"][0], H)
        h0 = jnp.where(mask, h0n, h0); c0 = jnp.where(mask, c0n, c0)
        h1n, c1n = _lstm_cell_ref(h0, h1, c1, p["ewih"][1], p["ewhh"][1], p["eb"][1], H)
        h1 = jnp.where(mask, h1n, h1); c1 = jnp.where(mask, c1n, c1)

    z = dense(h1, p["wh2l"], p["bh2l"])
    z_h = dense(z, p["wl2h"], p["bl2h"])

    h0 = c0 = h1 = c1 = jnp.zeros((B, H), jnp.float32)
    outs = []
    for t in range(T):
        mask = t < lengths
        h0n, c0n = _lstm_cell_ref(z_h, h0, c0, p["dwih"][0], p["dwhh"][0], p["db"][0], H)
        h0 = jnp.where(mask, h0n, h0); c0 = jnp.where(mask, c0n, c0)
        h1n, c1n = _lstm_cell_ref(h0, h1, c1, p["dwih"][1], p["dwhh"][1], p["db"][1], H)
        h1 = jnp.where(mask, h1n, h1); c1 = jnp.where(mask, c1n, c1)
        h_out = jnp.where(mask, h1, 0.0)
        y = _gelu(dense(h_out, p["wo1"], p["bo1"]))
        y = _gelu(dense(y, p["wo2"], p["bo2"]))
        y = dense(y, p["wo3"], p["bo3"])
        outs.append(y)
    return jnp.stack(outs, axis=1)


if __name__ == "__main__":
    key = jax.random.PRNGKey(0)
    kx, kp = jax.random.split(key)

    B, T = 2, 8
    x = jax.random.normal(kx, (B, T, INPUT_DIM), jnp.float32)
    lengths = jnp.array([T, 5], dtype=jnp.int32)   # max(lengths) == T (decode total_length)
    params = init_params(kp)

    out = node_tokenizer_forward(x, lengths, params)
    out = jax.block_until_ready(out)

    ref = reference_forward(x, lengths, params)
    assert out.shape == (B, T, INPUT_DIM), out.shape
    # Tolerance tightened from 2e-2; the residual bound covers differences between
    # the Mosaic MXU f32 path and XLA's HIGHEST-precision f32 dot emulation.
    err = float(jnp.max(jnp.abs(out - ref)))
    assert jnp.allclose(out, ref, atol=2e-3, rtol=2e-3), err

    print("KERNEL_OK")
</pallas_src>

<mosaic_0001>
module attributes {stable_mosaic.version = 11 : i64} {
  func.func @_tokenizer_kernel(%arg0: memref<8x8x3xf32, #tpu.memory_space<vmem>>, %arg1: memref<8x1xi32, #tpu.memory_space<vmem>>, %arg2: memref<3x128xf32, #tpu.memory_space<vmem>>, %arg3: memref<1x128xf32, #tpu.memory_space<vmem>>, %arg4: memref<128x128xf32, #tpu.memory_space<vmem>>, %arg5: memref<1x128xf32, #tpu.memory_space<vmem>>, %arg6: memref<128x128xf32, #tpu.memory_space<vmem>>, %arg7: memref<1x128xf32, #tpu.memory_space<vmem>>, %arg8: memref<2x128x512xf32, #tpu.memory_space<vmem>>, %arg9: memref<2x128x512xf32, #tpu.memory_space<vmem>>, %arg10: memref<2x1x512xf32, #tpu.memory_space<vmem>>, %arg11: memref<128x128xf32, #tpu.memory_space<vmem>>, %arg12: memref<1x128xf32, #tpu.memory_space<vmem>>, %arg13: memref<128x128xf32, #tpu.memory_space<vmem>>, %arg14: memref<1x128xf32, #tpu.memory_space<vmem>>, %arg15: memref<2x128x512xf32, #tpu.memory_space<vmem>>, %arg16: memref<2x128x512xf32, #tpu.memory_space<vmem>>, %arg17: memref<2x1x512xf32, #tpu.memory_space<vmem>>, %arg18: memref<128x128xf32, #tpu.memory_space<vmem>>, %arg19: memref<1x128xf32, #tpu.memory_space<vmem>>, %arg20: memref<128x128xf32, #tpu.memory_space<vmem>>, %arg21: memref<1x128xf32, #tpu.memory_space<vmem>>, %arg22: memref<128x128xf32, #tpu.memory_space<vmem>>, %arg23: memref<1x128xf32, #tpu.memory_space<vmem>>, %arg24: memref<8x8x128xf32, #tpu.memory_space<vmem>>, %arg25: memref<8x8x128xf32, #tpu.memory_space<vmem>>, %arg26: memref<8x8x128xf32, #tpu.memory_space<vmem>>) attributes {dimension_semantics = [], scalar_prefetch = 0 : i64, scratch_operands = 2 : i64, tpu.core_type = #tpu.core_type<tc>} {
    %c0 = arith.constant 0 : index
    %c0_0 = arith.constant 0 : index
    %0 = vector.load %arg1[%c0, %c0_0] : memref<8x1xi32, #tpu.memory_space<vmem>>, vector<8x1xi32>
    %c0_1 = arith.constant 0 : index
    %c0_2 = arith.constant 0 : index
    %c0_3 = arith.constant 0 : index
    %1 = vector.load %arg10[%c0_1, %c0_2, %c0_3] : memref<2x1x512xf32, #tpu.memory_space<vmem>>, vector<1x1x512xf32>
    %2 = vector.shape_cast %1 : vector<1x1x512xf32> to vector<1x512xf32>
    %c1 = arith.constant 1 : index
    %c0_4 = arith.constant 0 : index
    %c0_5 = arith.constant 0 : index
    %3 = vector.load %arg10[%c1, %c0_4, %c0_5] : memref<2x1x512xf32, #tpu.memory_space<vmem>>, vector<1x1x512xf32>
    %4 = vector.shape_cast %3 : vector<1x1x512xf32> to vector<1x512xf32>
    %c1_6 = arith.constant 1 : index
    %c0_7 = arith.constant 0 : index
    %c0_8 = arith.constant 0 : index
    %5 = vector.load %arg17[%c1_6, %c0_7, %c0_8] : memref<2x1x512xf32, #tpu.memory_space<vmem>>, vector<1x1x512xf32>
    %6 = vector.shape_cast %5 : vector<1x1x512xf32> to vector<1x512xf32>
    %c0_9 = arith.constant 0 : index
    %c0_10 = arith.constant 0 : index
    %c0_11 = arith.constant 0 : index
    %7 = vector.load %arg0[%c0_9, %c0_10, %c0_11] : memref<8x8x3xf32, #tpu.memory_space<vmem>>, vector<8x8x3xf32>
    %8 = vector.shape_cast %7 : vector<8x8x3xf32> to vector<64x3xf32>
    %c0_12 = arith.constant 0 : index
    %c0_13 = arith.constant 0 : index
    %9 = vector.load %arg2[%c0_12, %c0_13] : memref<3x128xf32, #tpu.memory_space<vmem>>, vector<3x128xf32>
    %cst = arith.constant dense<0.000000e+00> : vector<64x128xf32>
    %10 = tpu.matmul %8, %9, %cst {dimension_numbers = #tpu.dot_dimension_numbers<[1], [0], [0], [1], [0, 0, 1, 1], [], []>} : vector<64x3xf32>, vector<3x128xf32>, vector<64x128xf32> -> vector<64x128xf32>
    %c0_14 = arith.constant 0 : index
    %c0_15 = arith.constant 0 : index
    %11 = vector.load %arg3[%c0_14, %c0_15] : memref<1x128xf32, #tpu.memory_space<vmem>>, vector<1x128xf32>
    %12 = vector.broadcast %11 : vector<1x128xf32> to vector<64x128xf32>
    %13 = arith.addf %10, %12 : vector<64x128xf32>
    %cst_16 = arith.constant 5.000000e-01 : f32
    %14 = vector.broadcast %cst_16 : f32 to vector<64x128xf32>
    %15 = arith.mulf %14, %13 : vector<64x128xf32>
    %cst_17 = arith.constant 0.707106769 : f32
    %16 = vector.broadcast %cst_17 : f32 to vector<64x128xf32>
    %17 = arith.mulf %13, %16 : vector<64x128xf32>
    %18 = math.erf %17 : vector<64x128xf32>
    %cst_18 = arith.constant 1.000000e+00 : f32
    %19 = vector.broadcast %cst_18 : f32 to vector<64x128xf32>
    %20 = arith.addf %19, %18 : vector<64x128xf32>
    %21 = arith.mulf %15, %20 : vector<64x128xf32>
    %c0_19 = arith.constant 0 : index
    %c0_20 = arith.constant 0 : index
    %22 = vector.load %arg4[%c0_19, %c0_20] : memref<128x128xf32, #tpu.memory_space<vmem>>, vector<128x128xf32>
    %cst_21 = arith.constant dense<0.000000e+00> : vector<64x128xf32>
    %23 = tpu.matmul %21, %22, %cst_21 {dimension_numbers = #tpu.dot_dimension_numbers<[1], [0], [0], [1], [0, 0, 1, 1], [], []>} : vector<64x128xf32>, vector<128x128xf32>, vector<64x128xf32> -> vector<64x128xf32>
    %c0_22 = arith.constant 0 : index
    %c0_23 = arith.constant 0 : index
    %24 = vector.load %arg5[%c0_22, %c0_23] : memref<1x128xf32, #tpu.memory_space<vmem>>, vector<1x128xf32>
    %25 = vector.broadcast %24 : vector<1x128xf32> to vector<64x128xf32>
    %26 = arith.addf %23, %25 : vector<64x128xf32>
    %cst_24 = arith.constant 5.000000e-01 : f32
    %27 = vector.broadcast %cst_24 : f32 to vector<64x128xf32>
    %28 = arith.mulf %27, %26 : vector<64x128xf32>
    %cst_25 = arith.constant 0.707106769 : f32
    %29 = vector.broadcast %cst_25 : f32 to vector<64x128xf32>
    %30 = arith.mulf %26, %29 : vector<64x128xf32>
    %31 = math.erf %30 : vector<64x128xf32>
    %cst_26 = arith.constant 1.000000e+00 : f32
    %32 = vector.broadcast %cst_26 : f32 to vector<64x128xf32>
    %33 = arith.addf %32, %31 : vector<64x128xf32>
    %34 = arith.mulf %28, %33 : vector<64x128xf32>
    %c0_27 = arith.constant 0 : index
    %c0_28 = arith.constant 0 : index
    %35 = vector.load %arg6[%c0_27, %c0_28] : memref<128x128xf32, #tpu.memory_space<vmem>>, vector<128x128xf32>
    %cst_29 = arith.constant dense<0.000000e+00> : vector<64x128xf32>
    %36 = tpu.matmul %34, %35, %cst_29 {dimension_numbers = #tpu.dot_dimension_numbers<[1], [0], [0], [1], [0, 0, 1, 1], [], []>} : vector<64x128xf32>, vector<128x128xf32>, vector<64x128xf32> -> vector<64x128xf32>
    %c0_30 = arith.constant 0 : index
    %c0_31 = arith.constant 0 : index
    %37 = vector.load %arg7[%c0_30, %c0_31] : memref<1x128xf32, #tpu.memory_space<vmem>>, vector<1x128xf32>
    %38 = vector.broadcast %37 : vector<1x128xf32> to vector<64x128xf32>
    %39 = arith.addf %36, %38 : vector<64x128xf32>
    %cst_32 = arith.constant 5.000000e-01 : f32
    %40 = vector.broadcast %cst_32 : f32 to vector<64x128xf32>
    %41 = arith.mulf %40, %39 : vector<64x128xf32>
    %cst_33 = arith.constant 0.707106769 : f32
    %42 = vector.broadcast %cst_33 : f32 to vector<64x128xf32>
    %43 = arith.mulf %39, %42 : vector<64x128xf32>
    %44 = math.erf %43 : vector<64x128xf32>
    %cst_34 = arith.constant 1.000000e+00 : f32
    %45 = vector.broadcast %cst_34 : f32 to vector<64x128xf32>
    %46 = arith.addf %45, %44 : vector<64x128xf32>
    %47 = arith.mulf %41, %46 : vector<64x128xf32>
    %48 = vector.shape_cast %47 : vector<64x128xf32> to vector<8x8x128xf32>
    %c0_35 = arith.constant 0 : index
    %c0_36 = arith.constant 0 : index
    %c0_37 = arith.constant 0 : index
    %49 = vector.load %arg25[%c0_35, %c0_36, %c0_37] : memref<8x8x128xf32, #tpu.memory_space<vmem>>, vector<8x8x128xf32>
    tpu.vector_store %arg25[%c0_35, %c0_36, %c0_37], %48 {strides = array<i32>} : memref<8x8x128xf32, #tpu.memory_space<vmem>>, vector<8x8x128xf32>,
    %cst_38 = arith.constant 0.000000e+00 : f32
    %50 = vector.broadcast %cst_38 : f32 to vector<8x128xf32>
    %c0_i32 = arith.constant 0 : i32
    %c8_i32 = arith.constant 8 : i32
    %51 = arith.addi %c0_i32, %c8_i32 : i32
    %c1_i32 = arith.constant 1 : i32
    %52:4 = scf.for %arg27 = %c0_i32 to %51 step %c1_i32 iter_args(%arg28 = %50, %arg29 = %50, %arg30 = %50, %arg31 = %50) -> (vector<8x128xf32>, vector<8x128xf32>, vector<8x128xf32>, vector<8x128xf32>)  : i32 {
      %107 = vector.broadcast %arg27 : i32 to vector<8x1xi32>
      %108 = arith.cmpi slt, %107, %0 : vector<8x1xi32>
      %109 = arith.index_cast %arg27 : i32 to index
      %c0_88 = arith.constant 0 : index
      %c0_89 = arith.constant 0 : index
      %110 = vector.load %arg25[%109, %c0_88, %c0_89] : memref<8x8x128xf32, #tpu.memory_space<vmem>>, vector<1x8x128xf32>
      %111 = vector.shape_cast %110 : vector<1x8x128xf32> to vector<8x128xf32>
      %c0_90 = arith.constant 0 : index
      %c0_91 = arith.constant 0 : index
      %c0_92 = arith.constant 0 : index
      %112 = vector.load %arg8[%c0_90, %c0_91, %c0_92] : memref<2x128x512xf32, #tpu.memory_space<vmem>>, vector<1x128x512xf32>
      %113 = vector.shape_cast %112 : vector<1x128x512xf32> to vector<128x512xf32>
      %cst_93 = arith.constant dense<0.000000e+00> : vector<8x512xf32>
      %114 = tpu.matmul %111, %113, %cst_93 {dimension_numbers = #tpu.dot_dimension_numbers<[1], [0], [0], [1], [0, 0, 1, 1], [], []>} : vector<8x128xf32>, vector<128x512xf32>, vector<8x512xf32> -> vector<8x512xf32>
      %c0_94 = arith.constant 0 : index
      %c0_95 = arith.constant 0 : index
      %c0_96 = arith.constant 0 : index
      %115 = vector.load %arg9[%c0_94, %c0_95, %c0_96] : memref<2x128x512xf32, #tpu.memory_space<vmem>>, vector<1x128x512xf32>
      %116 = vector.shape_cast %115 : vector<1x128x512xf32> to vector<128x512xf32>
      %cst_97 = arith.constant dense<0.000000e+00> : vector<8x512xf32>
      %117 = tpu.matmul %arg28, %116, %cst_97 {dimension_numbers = #tpu.dot_dimension_numbers<[1], [0], [0], [1], [0, 0, 1, 1], [], []>} : vector<8x128xf32>, vector<128x512xf32>, vector<8x512xf32> -> vector<8x512xf32>
      %118 = arith.addf %114, %117 : vector<8x512xf32>
      %119 = vector.broadcast %2 : vector<1x512xf32> to vector<8x512xf32>
      %120 = arith.addf %118, %119 : vector<8x512xf32>
      %121 = vector.extract_strided_slice %120 {offsets = [0, 0], sizes = [8, 128], strides = [1, 1]} : vector<8x512xf32> to vector<8x128xf32>
      %122 = arith.negf %121 : vector<8x128xf32>
      %123 = math.exp %122 : vector<8x128xf32>
      %cst_98 = arith.constant 1.000000e+00 : f32
      %124 = vector.broadcast %cst_98 : f32 to vector<8x128xf32>
      %125 = arith.addf %124, %123 : vector<8x128xf32>
      %126 = arith.divf %124, %125 : vector<8x128xf32>
      %127 = vector.extract_strided_slice %120 {offsets = [0, 128], sizes = [8, 128], strides = [1, 1]} : vector<8x512xf32> to vector<8x128xf32>
      %128 = arith.negf %127 : vector<8x128xf32>
      %129 = math.exp %128 : vector<8x128xf32>
      %cst_99 = arith.constant 1.000000e+00 : f32
      %130 = vector.broadcast %cst_99 : f32 to vector<8x128xf32>
      %131 = arith.addf %130, %129 : vector<8x128xf32>
      %132 = arith.divf %130, %131 : vector<8x128xf32>
      %133 = vector.extract_strided_slice %120 {offsets = [0, 256], sizes = [8, 128], strides = [1, 1]} : vector<8x512xf32> to vector<8x128xf32>
      %134 = math.tanh %133 : vector<8x128xf32>
      %135 = vector.extract_strided_slice %120 {offsets = [0, 384], sizes = [8, 128], strides = [1, 1]} : vector<8x512xf32> to vector<8x128xf32>
      %136 = arith.negf %135 : vector<8x128xf32>
      %137 = math.exp %136 : vector<8x128xf32>
      %cst_100 = arith.constant 1.000000e+00 : f32
      %138 = vector.broadcast %cst_100 : f32 to vector<8x128xf32>
      %139 = arith.addf %138, %137 : vector<8x128xf32>
      %140 = arith.divf %138, %139 : vector<8x128xf32>
      %141 = arith.mulf %132, %arg29 : vector<8x128xf32>
      %142 = arith.mulf %126, %134 : vector<8x128xf32>
      %143 = arith.addf %141, %142 : vector<8x128xf32>
      %144 = math.tanh %143 : vector<8x128xf32>
      %145 = arith.mulf %140, %144 : vector<8x128xf32>
      %146 = vector.shape_cast %108 : vector<8x1xi1> to vector<8x1xi1>
      %147 = vector.broadcast %146 : vector<8x1xi1> to vector<8x128xi1>
      %148 = arith.select %147, %145, %arg28 : vector<8x128xi1>, vector<8x128xf32>
      %149 = vector.shape_cast %108 : vector<8x1xi1> to vector<8x1xi1>
      %150 = vector.broadcast %149 : vector<8x1xi1> to vector<8x128xi1>
      %151 = arith.select %150, %143, %arg29 : vector<8x128xi1>, vector<8x128xf32>
      %c1_101 = arith.constant 1 : index
      %c0_102 = arith.constant 0 : index
      %c0_103 = arith.constant 0 : index
      %152 = vector.load %arg8[%c1_101, %c0_102, %c0_103] : memref<2x128x512xf32, #tpu.memory_space<vmem>>, vector<1x128x512xf32>
      %153 = vector.shape_cast %152 : vector<1x128x512xf32> to vector<128x512xf32>
      %cst_104 = arith.constant dense<0.000000e+00> : vector<8x512xf32>
      %154 = tpu.matmul %148, %153, %cst_104 {dimension_numbers = #tpu.dot_dimension_numbers<[1], [0], [0], [1], [0, 0, 1, 1], [], []>} : vector<8x128xf32>, vector<128x512xf32>, vector<8x512xf32> -> vector<8x512xf32>
      %c1_105 = arith.constant 1 : index
      %c0_106 = arith.constant 0 : index
      %c0_107 = arith.constant 0 : index
      %155 = vector.load %arg9[%c1_105, %c0_106, %c0_107] : memref<2x128x512xf32, #tpu.memory_space<vmem>>, vector<1x128x512xf32>
      %156 = vector.shape_cast %155 : vector<1x128x512xf32> to vector<128x512xf32>
      %cst_108 = arith.constant dense<0.000000e+00> : vector<8x512xf32>
      %157 = tpu.matmul %arg30, %156, %cst_108 {dimension_numbers = #tpu.dot_dimension_numbers<[1], [0], [0], [1], [0, 0, 1, 1], [], []>} : vector<8x128xf32>, vector<128x512xf32>, vector<8x512xf32> -> vector<8x512xf32>
      %158 = arith.addf %154, %157 : vector<8x512xf32>
      %159 = vector.broadcast %4 : vector<1x512xf32> to vector<8x512xf32>
      %160 = arith.addf %158, %159 : vector<8x512xf32>
      %161 = vector.extract_strided_slice %160 {offsets = [0, 0], sizes = [8, 128], strides = [1, 1]} : vector<8x512xf32> to vector<8x128xf32>
      %162 = arith.negf %161 : vector<8x128xf32>
      %163 = math.exp %162 : vector<8x128xf32>
      %cst_109 = arith.constant 1.000000e+00 : f32
      %164 = vector.broadcast %cst_109 : f32 to vector<8x128xf32>
      %165 = arith.addf %164, %163 : vector<8x128xf32>
      %166 = arith.divf %164, %165 : vector<8x128xf32>
      %167 = vector.extract_strided_slice %160 {offsets = [0, 128], sizes = [8, 128], strides = [1, 1]} : vector<8x512xf32> to vector<8x128xf32>
      %168 = arith.negf %167 : vector<8x128xf32>
      %169 = math.exp %168 : vector<8x128xf32>
      %cst_110 = arith.constant 1.000000e+00 : f32
      %170 = vector.broadcast %cst_110 : f32 to vector<8x128xf32>
      %171 = arith.addf %170, %169 : vector<8x128xf32>
      %172 = arith.divf %170, %171 : vector<8x128xf32>
      %173 = vector.extract_strided_slice %160 {offsets = [0, 256], sizes = [8, 128], strides = [1, 1]} : vector<8x512xf32> to vector<8x128xf32>
      %174 = math.tanh %173 : vector<8x128xf32>
      %175 = vector.extract_strided_slice %160 {offsets = [0, 384], sizes = [8, 128], strides = [1, 1]} : vector<8x512xf32> to vector<8x128xf32>
      %176 = arith.negf %175 : vector<8x128xf32>
      %177 = math.exp %176 : vector<8x128xf32>
      %cst_111 = arith.constant 1.000000e+00 : f32
      %178 = vector.broadcast %cst_111 : f32 to vector<8x128xf32>
      %179 = arith.addf %178, %177 : vector<8x128xf32>
      %180 = arith.divf %178, %179 : vector<8x128xf32>
      %181 = arith.mulf %172, %arg31 : vector<8x128xf32>
      %182 = arith.mulf %166, %174 : vector<8x128xf32>
      %183 = arith.addf %181, %182 : vector<8x128xf32>
      %184 = math.tanh %183 : vector<8x128xf32>
      %185 = arith.mulf %180, %184 : vector<8x128xf32>
      %186 = vector.shape_cast %108 : vector<8x1xi1> to vector<8x1xi1>
      %187 = vector.broadcast %186 : vector<8x1xi1> to vector<8x128xi1>
      %188 = arith.select %187, %185, %arg30 : vector<8x128xi1>, vector<8x128xf32>
      %189 = vector.shape_cast %108 : vector<8x1xi1> to vector<8x1xi1>
      %190 = vector.broadcast %189 : vector<8x1xi1> to vector<8x128xi1>
      %191 = arith.select %190, %183, %arg31 : vector<8x128xi1>, vector<8x128xf32>
      scf.yield %148, %151, %188, %191 : vector<8x128xf32>, vector<8x128xf32>, vector<8x128xf32>, vector<8x128xf32>
    }
    %c8_i32_39 = arith.constant 8 : i32
    %c0_40 = arith.constant 0 : index
    %c0_41 = arith.constant 0 : index
    %53 = vector.load %arg11[%c0_40, %c0_41] : memref<128x128xf32, #tpu.memory_space<vmem>>, vector<128x128xf32>
    %cst_42 = arith.constant dense<0.000000e+00> : vector<8x128xf32>
    %54 = tpu.matmul %52#2, %53, %cst_42 {dimension_numbers = #tpu.dot_dimension_numbers<[1], [0], [0], [1], [0, 0, 1, 1], [], []>} : vector<8x128xf32>, vector<128x128xf32>, vector<8x128xf32> -> vector<8x128xf32>
    %c0_43 = arith.constant 0 : index
    %c0_44 = arith.constant 0 : index
    %55 = vector.load %arg12[%c0_43, %c0_44] : memref<1x128xf32, #tpu.memory_space<vmem>>, vector<1x128xf32>
    %56 = vector.broadcast %55 : vector<1x128xf32> to vector<8x128xf32>
    %57 = arith.addf %54, %56 : vector<8x128xf32>
    %c0_45 = arith.constant 0 : index
    %c0_46 = arith.constant 0 : index
    %58 = vector.load %arg13[%c0_45, %c0_46] : memref<128x128xf32, #tpu.memory_space<vmem>>, vector<128x128xf32>
    %cst_47 = arith.constant dense<0.000000e+00> : vector<8x128xf32>
    %59 = tpu.matmul %57, %58, %cst_47 {dimension_numbers = #tpu.dot_dimension_numbers<[1], [0], [0], [1], [0, 0, 1, 1], [], []>} : vector<8x128xf32>, vector<128x128xf32>, vector<8x128xf32> -> vector<8x128xf32>
    %c0_48 = arith.constant 0 : index
    %c0_49 = arith.constant 0 : index
    %60 = vector.load %arg14[%c0_48, %c0_49] : memref<1x128xf32, #tpu.memory_space<vmem>>, vector<1x128xf32>
    %61 = vector.broadcast %60 : vector<1x128xf32> to vector<8x128xf32>
    %62 = arith.addf %59, %61 : vector<8x128xf32>
    %c0_50 = arith.constant 0 : index
    %c0_51 = arith.constant 0 : index
    %c0_52 = arith.constant 0 : index
    %63 = vector.load %arg15[%c0_50, %c0_51, %c0_52] : memref<2x128x512xf32, #tpu.memory_space<vmem>>, vector<1x128x512xf32>
    %64 = vector.shape_cast %63 : vector<1x128x512xf32> to vector<128x512xf32>
    %cst_53 = arith.constant dense<0.000000e+00> : vector<8x512xf32>
    %65 = tpu.matmul %62, %64, %cst_53 {dimension_numbers = #tpu.dot_dimension_numbers<[1], [0], [0], [1], [0, 0, 1, 1], [], []>} : vector<8x128xf32>, vector<128x512xf32>, vector<8x512xf32> -> vector<8x512xf32>
    %c0_54 = arith.constant 0 : index
    %c0_55 = arith.constant 0 : index
    %c0_56 = arith.constant 0 : index
    %66 = vector.load %arg17[%c0_54, %c0_55, %c0_56] : memref<2x1x512xf32, #tpu.memory_space<vmem>>, vector<1x1x512xf32>
    %67 = vector.shape_cast %66 : vector<1x1x512xf32> to vector<1x512xf32>
    %68 = vector.broadcast %67 : vector<1x512xf32> to vector<8x512xf32>
    %69 = arith.addf %65, %68 : vector<8x512xf32>
    %c0_i32_57 = arith.constant 0 : i32
    %c8_i32_58 = arith.constant 8 : i32
    %70 = arith.addi %c0_i32_57, %c8_i32_58 : i32
    %c1_i32_59 = arith.constant 1 : i32
    %71:4 = scf.for %arg27 = %c0_i32_57 to %70 step %c1_i32_59 iter_args(%arg28 = %50, %arg29 = %50, %arg30 = %50, %arg31 = %50) -> (vector<8x128xf32>, vector<8x128xf32>, vector<8x128xf32>, vector<8x128xf32>)  : i32 {
      %107 = vector.broadcast %arg27 : i32 to vector<8x1xi32>
      %108 = arith.cmpi slt, %107, %0 : vector<8x1xi32>
      %c0_88 = arith.constant 0 : index
      %c0_89 = arith.constant 0 : index
      %c0_90 = arith.constant 0 : index
      %109 = vector.load %arg16[%c0_88, %c0_89, %c0_90] : memref<2x128x512xf32, #tpu.memory_space<vmem>>, vector<1x128x512xf32>
      %110 = vector.shape_cast %109 : vector<1x128x512xf32> to vector<128x512xf32>
      %cst_91 = arith.constant dense<0.000000e+00> : vector<8x512xf32>
      %111 = tpu.matmul %arg28, %110, %cst_91 {dimension_numbers = #tpu.dot_dimension_numbers<[1], [0], [0], [1], [0, 0, 1, 1], [], []>} : vector<8x128xf32>, vector<128x512xf32>, vector<8x512xf32> -> vector<8x512xf32>
      %112 = arith.addf %69, %111 : vector<8x512xf32>
      %113 = vector.extract_strided_slice %112 {offsets = [0, 0], sizes = [8, 128], strides = [1, 1]} : vector<8x512xf32> to vector<8x128xf32>
      %114 = arith.negf %113 : vector<8x128xf32>
      %115 = math.exp %114 : vector<8x128xf32>
      %cst_92 = arith.constant 1.000000e+00 : f32
      %116 = vector.broadcast %cst_92 : f32 to vector<8x128xf32>
      %117 = arith.addf %116, %115 : vector<8x128xf32>
      %118 = arith.divf %116, %117 : vector<8x128xf32>
      %119 = vector.extract_strided_slice %112 {offsets = [0, 128], sizes = [8, 128], strides = [1, 1]} : vector<8x512xf32> to vector<8x128xf32>
      %120 = arith.negf %119 : vector<8x128xf32>
      %121 = math.exp %120 : vector<8x128xf32>
      %cst_93 = arith.constant 1.000000e+00 : f32
      %122 = vector.broadcast %cst_93 : f32 to vector<8x128xf32>
      %123 = arith.addf %122, %121 : vector<8x128xf32>
      %124 = arith.divf %122, %123 : vector<8x128xf32>
      %125 = vector.extract_strided_slice %112 {offsets = [0, 256], sizes = [8, 128], strides = [1, 1]} : vector<8x512xf32> to vector<8x128xf32>
      %126 = math.tanh %125 : vector<8x128xf32>
      %127 = vector.extract_strided_slice %112 {offsets = [0, 384], sizes = [8, 128], strides = [1, 1]} : vector<8x512xf32> to vector<8x128xf32>
      %128 = arith.negf %127 : vector<8x128xf32>
      %129 = math.exp %128 : vector<8x128xf32>
      %cst_94 = arith.constant 1.000000e+00 : f32
      %130 = vector.broadcast %cst_94 : f32 to vector<8x128xf32>
      %131 = arith.addf %130, %129 : vector<8x128xf32>
      %132 = arith.divf %130, %131 : vector<8x128xf32>
      %133 = arith.mulf %124, %arg29 : vector<8x128xf32>
      %134 = arith.mulf %118, %126 : vector<8x128xf32>
      %135 = arith.addf %133, %134 : vector<8x128xf32>
      %136 = math.tanh %135 : vector<8x128xf32>
      %137 = arith.mulf %132, %136 : vector<8x128xf32>
      %138 = vector.shape_cast %108 : vector<8x1xi1> to vector<8x1xi1>
      %139 = vector.broadcast %138 : vector<8x1xi1> to vector<8x128xi1>
      %140 = arith.select %139, %137, %arg28 : vector<8x128xi1>, vector<8x128xf32>
      %141 = vector.shape_cast %108 : vector<8x1xi1> to vector<8x1xi1>
      %142 = vector.broadcast %141 : vector<8x1xi1> to vector<8x128xi1>
      %143 = arith.select %142, %135, %arg29 : vector<8x128xi1>, vector<8x128xf32>
      %c1_95 = arith.constant 1 : index
      %c0_96 = arith.constant 0 : index
      %c0_97 = arith.constant 0 : index
      %144 = vector.load %arg15[%c1_95, %c0_96, %c0_97] : memref<2x128x512xf32, #tpu.memory_space<vmem>>, vector<1x128x512xf32>
      %145 = vector.shape_cast %144 : vector<1x128x512xf32> to vector<128x512xf32>
      %cst_98 = arith.constant dense<0.000000e+00> : vector<8x512xf32>
      %146 = tpu.matmul %140, %145, %cst_98 {dimension_numbers = #tpu.dot_dimension_numbers<[1], [0], [0], [1], [0, 0, 1, 1], [], []>} : vector<8x128xf32>, vector<128x512xf32>, vector<8x512xf32> -> vector<8x512xf32>
      %c1_99 = arith.constant 1 : index
      %c0_100 = arith.constant 0 : index
      %c0_101 = arith.constant 0 : index
      %147 = vector.load %arg16[%c1_99, %c0_100, %c0_101] : memref<2x128x512xf32, #tpu.memory_space<vmem>>, vector<1x128x512xf32>
      %148 = vector.shape_cast %147 : vector<1x128x512xf32> to vector<128x512xf32>
      %cst_102 = arith.constant dense<0.000000e+00> : vector<8x512xf32>
      %149 = tpu.matmul %arg30, %148, %cst_102 {dimension_numbers = #tpu.dot_dimension_numbers<[1], [0], [0], [1], [0, 0, 1, 1], [], []>} : vector<8x128xf32>, vector<128x512xf32>, vector<8x512xf32> -> vector<8x512xf32>
      %150 = arith.addf %146, %149 : vector<8x512xf32>
      %151 = vector.broadcast %6 : vector<1x512xf32> to vector<8x512xf32>
      %152 = arith.addf %150, %151 : vector<8x512xf32>
      %153 = vector.extract_strided_slice %152 {offsets = [0, 0], sizes = [8, 128], strides = [1, 1]} : vector<8x512xf32> to vector<8x128xf32>
      %154 = arith.negf %153 : vector<8x128xf32>
      %155 = math.exp %154 : vector<8x128xf32>
      %cst_103 = arith.constant 1.000000e+00 : f32
      %156 = vector.broadcast %cst_103 : f32 to vector<8x128xf32>
      %157 = arith.addf %156, %155 : vector<8x128xf32>
      %158 = arith.divf %156, %157 : vector<8x128xf32>
      %159 = vector.extract_strided_slice %152 {offsets = [0, 128], sizes = [8, 128], strides = [1, 1]} : vector<8x512xf32> to vector<8x128xf32>
      %160 = arith.negf %159 : vector<8x128xf32>
      %161 = math.exp %160 : vector<8x128xf32>
      %cst_104 = arith.constant 1.000000e+00 : f32
      %162 = vector.broadcast %cst_104 : f32 to vector<8x128xf32>
      %163 = arith.addf %162, %161 : vector<8x128xf32>
      %164 = arith.divf %162, %163 : vector<8x128xf32>
      %165 = vector.extract_strided_slice %152 {offsets = [0, 256], sizes = [8, 128], strides = [1, 1]} : vector<8x512xf32> to vector<8x128xf32>
      %166 = math.tanh %165 : vector<8x128xf32>
      %167 = vector.extract_strided_slice %152 {offsets = [0, 384], sizes = [8, 128], strides = [1, 1]} : vector<8x512xf32> to vector<8x128xf32>
      %168 = arith.negf %167 : vector<8x128xf32>
      %169 = math.exp %168 : vector<8x128xf32>
      %cst_105 = arith.constant 1.000000e+00 : f32
      %170 = vector.broadcast %cst_105 : f32 to vector<8x128xf32>
      %171 = arith.addf %170, %169 : vector<8x128xf32>
      %172 = arith.divf %170, %171 : vector<8x128xf32>
      %173 = arith.mulf %164, %arg31 : vector<8x128xf32>
      %174 = arith.mulf %158, %166 : vector<8x128xf32>
      %175 = arith.addf %173, %174 : vector<8x128xf32>
      %176 = math.tanh %175 : vector<8x128xf32>
      %177 = arith.mulf %172, %176 : vector<8x128xf32>
      %178 = vector.shape_cast %108 : vector<8x1xi1> to vector<8x1xi1>
      %179 = vector.broadcast %178 : vector<8x1xi1> to vector<8x128xi1>
      %180 = arith.select %179, %177, %arg30 : vector<8x128xi1>, vector<8x128xf32>
      %181 = vector.shape_cast %108 : vector<8x1xi1> to vector<8x1xi1>
      %182 = vector.broadcast %181 : vector<8x1xi1> to vector<8x128xi1>
      %183 = arith.select %182, %175, %arg31 : vector<8x128xi1>, vector<8x128xf32>
      %cst_106 = arith.constant 0.000000e+00 : f32
      %184 = vector.shape_cast %108 : vector<8x1xi1> to vector<8x1xi1>
      %185 = vector.broadcast %184 : vector<8x1xi1> to vector<8x128xi1>
      %186 = vector.broadcast %cst_106 : f32 to vector<8x128xf32>
      %187 = arith.select %185, %180, %186 : vector<8x128xi1>, vector<8x128xf32>
      %188 = arith.index_cast %arg27 : i32 to index
      %c0_107 = arith.constant 0 : index
      %c0_108 = arith.constant 0 : index
      %189 = vector.load %arg26[%188, %c0_107, %c0_108] : memref<8x8x128xf32, #tpu.memory_space<vmem>>, vector<1x8x128xf32>
      %190 = vector.shape_cast %189 : vector<1x8x128xf32> to vector<8x128xf32>
      %191 = vector.shape_cast %187 : vector<8x128xf32> to vector<1x8x128xf32>
      tpu.vector_store %arg26[%188, %c0_107, %c0_108], %191 {strides = array<i32>} : memref<8x8x128xf32, #tpu.memory_space<vmem>>, vector<1x8x128xf32>,
      scf.yield %140, %143, %180, %183 : vector<8x128xf32>, vector<8x128xf32>, vector<8x128xf32>, vector<8x128xf32>
    }
    %c8_i32_60 = arith.constant 8 : i32
    %c0_61 = arith.constant 0 : index
    %c0_62 = arith.constant 0 : index
    %c0_63 = arith.constant 0 : index
    %72 = vector.load %arg26[%c0_61, %c0_62, %c0_63] : memref<8x8x128xf32, #tpu.memory_space<vmem>>, vector<8x8x128xf32>
    %73 = vector.shape_cast %72 : vector<8x8x128xf32> to vector<64x128xf32>
    %c0_64 = arith.constant 0 : index
    %c0_65 = arith.constant 0 : index
    %74 = vector.load %arg18[%c0_64, %c0_65] : memref<128x128xf32, #tpu.memory_space<vmem>>, vector<128x128xf32>
    %cst_66 = arith.constant dense<0.000000e+00> : vector<64x128xf32>
    %75 = tpu.matmul %73, %74, %cst_66 {dimension_numbers = #tpu.dot_dimension_numbers<[1], [0], [0], [1], [0, 0, 1, 1], [], []>} : vector<64x128xf32>, vector<128x128xf32>, vector<64x128xf32> -> vector<64x128xf32>
    %c0_67 = arith.constant 0 : index
    %c0_68 = arith.constant 0 : index
    %76 = vector.load %arg19[%c0_67, %c0_68] : memref<1x128xf32, #tpu.memory_space<vmem>>, vector<1x128xf32>
    %77 = vector.broadcast %76 : vector<1x128xf32> to vector<64x128xf32>
    %78 = arith.addf %75, %77 : vector<64x128xf32>
    %cst_69 = arith.constant 5.000000e-01 : f32
    %79 = vector.broadcast %cst_69 : f32 to vector<64x128xf32>
    %80 = arith.mulf %79, %78 : vector<64x128xf32>
    %cst_70 = arith.constant 0.707106769 : f32
    %81 = vector.broadcast %cst_70 : f32 to vector<64x128xf32>
    %82 = arith.mulf %78, %81 : vector<64x128xf32>
    %83 = math.erf %82 : vector<64x128xf32>
    %cst_71 = arith.constant 1.000000e+00 : f32
    %84 = vector.broadcast %cst_71 : f32 to vector<64x128xf32>
    %85 = arith.addf %84, %83 : vector<64x128xf32>
    %86 = arith.mulf %80, %85 : vector<64x128xf32>
    %c0_72 = arith.constant 0 : index
    %c0_73 = arith.constant 0 : index
    %87 = vector.load %arg20[%c0_72, %c0_73] : memref<128x128xf32, #tpu.memory_space<vmem>>, vector<128x128xf32>
    %cst_74 = arith.constant dense<0.000000e+00> : vector<64x128xf32>
    %88 = tpu.matmul %86, %87, %cst_74 {dimension_numbers = #tpu.dot_dimension_numbers<[1], [0], [0], [1], [0, 0, 1, 1], [], []>} : vector<64x128xf32>, vector<128x128xf32>, vector<64x128xf32> -> vector<64x128xf32>
    %c0_75 = arith.constant 0 : index
    %c0_76 = arith.constant 0 : index
    %89 = vector.load %arg21[%c0_75, %c0_76] : memref<1x128xf32, #tpu.memory_space<vmem>>, vector<1x128xf32>
    %90 = vector.broadcast %89 : vector<1x128xf32> to vector<64x128xf32>
    %91 = arith.addf %88, %90 : vector<64x128xf32>
    %cst_77 = arith.constant 5.000000e-01 : f32
    %92 = vector.broadcast %cst_77 : f32 to vector<64x128xf32>
    %93 = arith.mulf %92, %91 : vector<64x128xf32>
    %cst_78 = arith.constant 0.707106769 : f32
    %94 = vector.broadcast %cst_78 : f32 to vector<64x128xf32>
    %95 = arith.mulf %91, %94 : vector<64x128xf32>
    %96 = math.erf %95 : vector<64x128xf32>
    %cst_79 = arith.constant 1.000000e+00 : f32
    %97 = vector.broadcast %cst_79 : f32 to vector<64x128xf32>
    %98 = arith.addf %97, %96 : vector<64x128xf32>
    %99 = arith.mulf %93, %98 : vector<64x128xf32>
    %c0_80 = arith.constant 0 : index
    %c0_81 = arith.constant 0 : index
    %100 = vector.load %arg22[%c0_80, %c0_81] : memref<128x128xf32, #tpu.memory_space<vmem>>, vector<128x128xf32>
    %cst_82 = arith.constant dense<0.000000e+00> : vector<64x128xf32>
    %101 = tpu.matmul %99, %100, %cst_82 {dimension_numbers = #tpu.dot_dimension_numbers<[1], [0], [0], [1], [0, 0, 1, 1], [], []>} : vector<64x128xf32>, vector<128x128xf32>, vector<64x128xf32> -> vector<64x128xf32>
    %c0_83 = arith.constant 0 : index
    %c0_84 = arith.constant 0 : index
    %102 = vector.load %arg23[%c0_83, %c0_84] : memref<1x128xf32, #tpu.memory_space<vmem>>, vector<1x128xf32>
    %103 = vector.broadcast %102 : vector<1x128xf32> to vector<64x128xf32>
    %104 = arith.addf %101, %103 : vector<64x128xf32>
    %105 = vector.shape_cast %104 : vector<64x128xf32> to vector<8x8x128xf32>
    %c0_85 = arith.constant 0 : index
    %c0_86 = arith.constant 0 : index
    %c0_87 = arith.constant 0 : index
    %106 = vector.load %arg24[%c0_85, %c0_86, %c0_87] : memref<8x8x128xf32, #tpu.memory_space<vmem>>, vector<8x8x128xf32>
    tpu.vector_store %arg24[%c0_85, %c0_86, %c0_87], %105 {strides = array<i32>} : memref<8x8x128xf32, #tpu.memory_space<vmem>>, vector<8x8x128xf32>,
    return
  }
}

</mosaic_0001>

<bundles_post_ra>
// kernel: tpu_custom_call.1
= control target key start
LH: loop header
LB: loop body
LE: loop exit
PB: predicated region body
PF: predicated region fallthrough
CT: control target
= control target key end

     0   :  { %s6411_s0 = inlined_call_operand.vmem [shape: f32[8,8,3], index: 0, kind: input, shape index: {}]   ;;  %s6412_s1 = inlined_call_operand.vmem [shape: s32[8,1], index: 1, kind: input, shape index: {}]   ;;  %s6413_s2 = inlined_call_operand.vmem [shape: f32[3,128], index: 2, kind: input, shape index: {}]   ;;  %s6414_s3 = inlined_call_operand.vmem [shape: f32[1,128], index: 3, kind: input, shape index: {}]   ;;  %s6415_s4 = inlined_call_operand.hbm [shape: f32[128,128], index: 4, kind: input, shape index: {}]   ;;  %s6416_s5 = inlined_call_operand.vmem [shape: f32[1,128], index: 5, kind: input, shape index: {}]   ;;  %s6417_s6 = inlined_call_operand.hbm [shape: f32[128,128], index: 6, kind: input, shape index: {}]   ;;  %s6418_s7 = inlined_call_operand.vmem [shape: f32[1,128], index: 7, kind: input, shape index: {}]   ;;  %s6419_s8 = inlined_call_operand.hbm [shape: f32[2,128,512], index: 8, kind: input, shape index: {}]   ;;  %s6420_s9 = inlined_call_operand.hbm [shape: f32[2,128,512], index: 9, kind: input, shape index: {}]   ;;  %s6421_s10 = inlined_call_operand.vmem [shape: f32[2,1,512], index: 10, kind: input, shape index: {}]   ;;  %s6422_s11 = inlined_call_operand.hbm [shape: f32[128,128], index: 11, kind: input, shape index: {}]   ;;  %s6423_s12 = inlined_call_operand.vmem [shape: f32[1,128], index: 12, kind: input, shape index: {}]   ;;  %s6424_s13 = inlined_call_operand.hbm [shape: f32[128,128], index: 13, kind: input, shape index: {}]   ;;  %s6425_s14 = inlined_call_operand.vmem [shape: f32[1,128], index: 14, kind: input, shape index: {}]   ;;  %s6426_s15 = inlined_call_operand.hbm [shape: f32[2,128,512], index: 15, kind: input, shape index: {}]   ;;  %s6427_s16 = inlined_call_operand.hbm [shape: f32[2,128,512], index: 16, kind: input, shape index: {}]   ;;  %s6428_s17 = inlined_call_operand.vmem [shape: f32[2,1,512], index: 17, kind: input, shape index: {}]   ;;  %s6429_s18 = inlined_call_operand.hbm [shape: f32[128,128], index: 18, kind: input, shape index: {}]   ;;  %s6430_s19 = inlined_call_operand.vmem [shape: f32[1,128], index: 19, kind: input, shape index: {}]   ;;  %s6431_s20 = inlined_call_operand.hbm [shape: f32[128,128], index: 20, kind: input, shape index: {}]   ;;  %s6432_s21 = inlined_call_operand.vmem [shape: f32[1,128], index: 21, kind: input, shape index: {}]   ;;  %s6433_s22 = inlined_call_operand.hbm [shape: f32[128,128], index: 22, kind: input, shape index: {}]   ;;  %s6434_s23 = inlined_call_operand.vmem [shape: f32[1,128], index: 23, kind: input, shape index: {}]   ;;  %s6435_s24 = inlined_call_operand.hbm [shape: f32[8,8,128], index: 24, kind: output, shape index: {}]  }
   0x1   :  { %6437 = sst [smem:[#allocation30_spill]] %s6411_s0 }
   0x2   :  { %6438 = sst [smem:[#allocation31_spill]] %s6412_s1 }
   0x3   :  { %6439 = sst [smem:[#allocation32_spill]] %s6413_s2 }
   0x4   :  { %6440 = sst [smem:[#allocation33_spill]] %s6414_s3 }
   0x5   :  { %6441 = sst [smem:[#allocation34_spill]] %s6415_s4 }
   0x6   :  { %6442 = sst [smem:[#allocation35_spill]] %s6416_s5 }
   0x7   :  { %6443 = sst [smem:[#allocation36_spill]] %s6417_s6 }
   0x8   :  { %6444 = sst [smem:[#allocation37_spill]] %s6418_s7 }
   0x9   :  { %6445 = sst [smem:[#allocation38_spill]] %s6419_s8 }
   0xa   :  { %29 = vsyncpa [#allocation5], 0 }
   0xb   :  { %30 = vsyncpa [#allocation8], 0 }
   0xc   :  { %31 = vsyncpa [#allocation11], 0 }
   0xd   :  { %32 = vsyncpa [#allocation14], 0 }
   0xe   :  { %33 = vsyncpa [#allocation17], 0 }
   0xf   :  { %34 = vsyncpa [#allocation20], 0 }
  0x10   :  { %35 = vsyncpa [#allocation6], 0  ;;  %s6446_s27 = sld [smem:[#allocation36_spill]]  ;;  %s4842_s6 = smov [#allocation7]  }
  0x11   :  { %s65_s2 = sshll.u32 %s4842_s6, 4  ;;  %s4843_s29 = smov 128   ;;  %s66_s2 = int_to_ptr.vmem [resolvable:$true] %s65_s2 }
  0x12   :  { %s4844_s0 = smov 8   ;;  %s91_s3 = sshll.u32 %s6420_s9, 4  ;;  %s92_s3 = int_to_ptr.hbm [resolvable:$true] %s91_s3 }
  0x13   :  { %s4845_s25 = smov [#allocation10]   ;;  %s121_s5 = sshll.u32 %s6424_s13, 4  ;;  %s122_s5 = int_to_ptr.hbm [resolvable:$true] %s121_s5 }
  0x14   :  { %s93_s8 = sshll.u32 %s4845_s25, 4  ;;  %s4846_s26 = smov 512   ;;  %s94_s8 = int_to_ptr.vmem [resolvable:$true] %s93_s8 }
  0x15   :  { %s4848_s9 = smov [#allocation13]   ;;  %s4849_s13 = smov [#allocation16]  }
  0x16   :  { %s63_s28 = sshll.u32 %s6446_s27, 4  ;;  %s4847_s27 = smov 32   ;;  %s64_s28 = int_to_ptr.hbm [resolvable:$true] %s63_s28 }
  0x17   :  { %71 = dma.hbm_to_vmem [thread:$0]  %s64_s28, 2048, %s66_s2, [#allocation8], %s4843_s29, %s4843_s29, %s4844_s0  }
  0x18   :  { %99 = dma.hbm_to_vmem [thread:$0]  %s92_s3, 16384, %s94_s8, [#allocation11], %s4846_s26, %s4846_s26, %s4847_s27  }
  0x19   :  { %s149_s2 = sshll.u32 %s6427_s16, 4  ;;  %s123_s7 = sshll.u32 %s4848_s9, 4  ;;  %s150_s2 = int_to_ptr.hbm [resolvable:$true] %s149_s2  ;;  %s124_s7 = int_to_ptr.vmem [resolvable:$true] %s123_s7 }
  0x1a   :  { %129 = dma.hbm_to_vmem [thread:$0]  %s122_s5, 2048, %s124_s7, [#allocation14], %s4843_s29, %s4843_s29, %s4844_s0  }
  0x1b   :  { %s151_s30 = sshll.u32 %s4849_s13, 4  ;;  %s179_s1 = sshll.u32 %s6431_s20, 4  ;;  %s152_s30 = int_to_ptr.vmem [resolvable:$true] %s151_s30  ;;  %s180_s1 = int_to_ptr.hbm [resolvable:$true] %s179_s1 }
  0x1c   :  { %157 = dma.hbm_to_vmem [thread:$0]  %s150_s2, 16384, %s152_s30, [#allocation17], %s4846_s26, %s4846_s26, %s4847_s27  }
  0x1d   :  { %s6447_s8 = sld [smem:[#allocation34_spill]]  ;;  %s4850_s6 = smov [#allocation19]  }
  0x1e   :  { %s181_s9 = sshll.u32 %s4850_s6, 4  ;;  %s4851_s5 = smov [#allocation4]   ;;  %s182_s9 = int_to_ptr.vmem [resolvable:$true] %s181_s9 }
  0x1f   :  { %187 = dma.hbm_to_vmem [thread:$0]  %s180_s1, 2048, %s182_s9, [#allocation20], %s4843_s29, %s4843_s29, %s4844_s0  }
  0x20   :  { %s50_s20 = sshll.u32 %s4851_s5, 4  ;;  %s6448_s25 = sld [smem:[#allocation38_spill]]  ;;  %s51_s20 = int_to_ptr.vmem [resolvable:$true] %s50_s20 }
  0x21   :  { %s106_s16 = sshll.u32 %s6422_s11, 4  ;;  %s4852_s3 = smov [#allocation9]   ;;  %s107_s16 = int_to_ptr.hbm [resolvable:$true] %s106_s16 }
  0x22   :  { %s4853_s1 = smov [#allocation12]   ;;  %s136_s7 = sshll.u32 %s6426_s15, 4  ;;  %s137_s7 = int_to_ptr.hbm [resolvable:$true] %s136_s7 }
  0x23   :  { %s48_s28 = sshll.u32 %s6447_s8, 4  ;;  %s80_s8 = sshll.u32 %s4852_s3, 4  ;;  %s49_s28 = int_to_ptr.hbm [resolvable:$true] %s48_s28  ;;  %s81_s8 = int_to_ptr.vmem [resolvable:$true] %s80_s8 }
  0x24   :  { %56 = dma.hbm_to_vmem [thread:$0]  %s49_s28, 2048, %s51_s20, [#allocation5], %s4843_s29, %s4843_s29, %s4844_s0  }
  0x25   :  { %s108_s6 = sshll.u32 %s4853_s1, 4  ;;  %s164_s20 = sshll.u32 %s6429_s18, 4  ;;  %s109_s6 = int_to_ptr.vmem [resolvable:$true] %s108_s6  ;;  %s165_s20 = int_to_ptr.hbm [resolvable:$true] %s164_s20 }
  0x26   :  { %s78_s4 = sshll.u32 %s6448_s25, 4  ;;  %s4854_s13 = smov [#allocation15]   ;;  %s79_s4 = int_to_ptr.hbm [resolvable:$true] %s78_s4 }
  0x27   :  { %86 = dma.hbm_to_vmem [thread:$0]  %s79_s4, 16384, %s81_s8, [#allocation8], %s4846_s26, %s4846_s26, %s4847_s27  }
  0x28   :  { %114 = dma.hbm_to_vmem [thread:$0]  %s107_s16, 2048, %s109_s6, [#allocation11], %s4843_s29, %s4843_s29, %s4844_s0  }
  0x29   :  { %s138_s25 = sshll.u32 %s4854_s13, 4  ;;  %s4855_s4 = smov [#allocation18]   ;;  %s139_s25 = int_to_ptr.vmem [resolvable:$true] %s138_s25 }
  0x2a   :  { %144 = dma.hbm_to_vmem [thread:$0]  %s137_s7, 16384, %s139_s25, [#allocation14], %s4846_s26, %s4846_s26, %s4847_s27  }
  0x2b   :  { %s166_s15 = sshll.u32 %s4855_s4, 4  ;;  %s194_s3 = sshll.u32 %s6433_s22, 4  ;;  %s167_s15 = int_to_ptr.vmem [resolvable:$true] %s166_s15  ;;  %s195_s3 = int_to_ptr.hbm [resolvable:$true] %s194_s3 }
  0x2c   :  { %172 = dma.hbm_to_vmem [thread:$0]  %s165_s20, 2048, %s167_s15, [#allocation17], %s4843_s29, %s4843_s29, %s4844_s0  }
  0x2d   :  { %s4856_s18 = smov [#allocation21]  }
  0x2e   :  { %s196_s16 = sshll.u32 %s4856_s18, 4  ;;  %s197_s16 = int_to_ptr.vmem [resolvable:$true] %s196_s16 }
  0x2f   :  { %202 = dma.hbm_to_vmem [thread:$0]  %s195_s3, 2048, %s197_s16, [#allocation20], %s4843_s29, %s4843_s29, %s4844_s0  }
  0x30   :  { %4788 = dma.done.wait [#allocation5], 2048  }
  0x31   :  { %4789 = vsyncadd [#allocation5], 4294965248 }
  0x32   :  { %4790 = dma.done.wait [#allocation8], 18432  }
  0x33   :  { %4791 = vsyncadd [#allocation8], 4294948864 }
  0x34   :  { %4792 = dma.done.wait [#allocation11], 18432  }
  0x35   :  { %4793 = vsyncadd [#allocation11], 4294948864 }
  0x36   :  { %4794 = dma.done.wait [#allocation14], 18432  }
  0x37   :  { %4795 = vsyncadd [#allocation14], 4294948864 }
  0x38   :  { %4796 = dma.done.wait [#allocation17], 18432  }
  0x39   :  { %4797 = vsyncadd [#allocation17], 4294948864 }
  0x3a   :  { %4798 = dma.done.wait [#allocation20], 4096  }
  0x3b   :  { %4799 = vsyncadd [#allocation20], 4294963200  ;;  %vm293_vm0 = vcmask 1042432   ;;  %s6449_s27 = sld [smem:[#allocation31_spill]]  ;;  %v5059_v1 = vld [vmem:[%s6421_s10] sm:$0xf] }
  0x3c   :  { %v5064_v2 = vld [vmem:[%s6421_s10 + $0x4] sm:$0xf]  ;;  %vm268_vm1 = vcmask 23552   ;;  %s6450_s20 = sld [smem:[#allocation32_spill]]  ;;  %v705_v13 = vld [vmem:[#allocation4 + $0x78] sm:$0xff]  ;;  %v704_v14 = vld [vmem:[#allocation4 + $0x70] sm:$0xff] }
  0x3d   :  { %v5069_v3 = vld [vmem:[%s6428_s17 + $0x4] sm:$0xf]  ;;  %s6451_s4 = sld [smem:[#allocation30_spill]]  ;;  %710 = vmatpush.msra.mxu1 %v705_v13  ;;  %4144 = vmatpush.msra.mxu3 %v705_v13  ;;  %v703_v15 = vld [vmem:[#allocation4 + $0x68] sm:$0xff]  ;;  %v701_v18 = vld [vmem:[#allocation4 + $0x58] sm:$0xff]  ;;  %s5724_s10 = smov 0  }
  0x3e   :  { %s6452_s11 = sld [smem:[#allocation33_spill]]  ;;  %v702_v17 = vld [vmem:[#allocation4 + $0x60] sm:$0xff]  ;;  %v700_v21 = vld [vmem:[#allocation4 + $0x50] sm:$0xff]  ;;  %v699_v23 = vld [vmem:[#allocation4 + $0x48] sm:$0xff] }
  0x3f   :  { %711 = vmatpush.msra.mxu1 %v704_v14  ;;  %4145 = vmatpush.msra.mxu3 %v704_v14  ;;  %v698_v25 = vld [vmem:[#allocation4 + $0x40] sm:$0xff]  ;;  %v697_v27 = vld [vmem:[#allocation4 + $0x38] sm:$0xff]  ;;  %v696_v31 = vld [vmem:[#allocation4 + $0x30] sm:$0xff]  ;;  %s6453_s13 = sld [smem:[#allocation35_spill]] }
  0x40   :  { %v695_v35 = vld [vmem:[#allocation4 + $0x28] sm:$0xff]  ;;  %v694_v39 = vld [vmem:[#allocation4 + $0x20] sm:$0xff]  ;;  %v693_v43 = vld [vmem:[#allocation4 + $0x18] sm:$0xff]  ;;  %s6454_s15 = sld [smem:[#allocation37_spill]] }
  0x41   :  { %v5054_v0 = vld [vmem:[%s6449_s27] sm:$0xff]  ;;  %712 = vmatpush.msra.mxu1 %v703_v15  ;;  %4146 = vmatpush.msra.mxu3 %v703_v15  ;;  %v692_v48 = vld [vmem:[#allocation4 + $0x10] sm:$0xff]  ;;  %v691_v53 = vld [vmem:[#allocation4 + $0x8] sm:$0xff] }
  0x42   :  { %v263_v4 = vld [vmem:[%s6450_s20] sm:$0x7] }
  0x43   :  { %v255_v5 = vld [vmem:[%s6451_s4] sm:$0xff]  ;;  %4081 = vmatpush.msk.msra.mxu0 %vm293_vm0, %v263_v4  ;;  %v256_v6 = vld [vmem:[%s6451_s4 + $0x8] sm:$0xff]  ;;  %v257_v7 = vld [vmem:[%s6451_s4 + $0x10] sm:$0xff]  ;;  %713 = vmatpush.msra.mxu1 %v702_v17 }
  0x44   :  { %4082 = vmatmul.msk.f32.vlgmr.msra.gmra.mxu0 %vm268_vm1, %v255_v5  ;;  %v258_v8 = vld [vmem:[%s6451_s4 + $0x18] sm:$0xff]  ;;  %v259_v9 = vld [vmem:[%s6451_s4 + $0x20] sm:$0xff]  ;;  %v260_v10 = vld [vmem:[%s6451_s4 + $0x28] sm:$0xff]  ;;  %4147 = vmatpush.msra.mxu3 %v702_v17 }
  0x45   :  { %v261_v11 = vld [vmem:[%s6451_s4 + $0x30] sm:$0xff]  ;;  %v262_v12 = vld [vmem:[%s6451_s4 + $0x38] sm:$0xff]  ;;  %v5109_v16 = vld [vmem:[%s6452_s11] ss:$0 sm:$0xff]  ;;  %714 = vmatpush.msra.mxu1 %v701_v18 }
  0x46   :  { %4148 = vmatpush.msra.mxu3 %v701_v18  ;;  %v690_v58 = vld [vmem:[#allocation4] sm:$0xff] }
  0x47   :  { %715 = vmatpush.msra.mxu1 %v700_v21 }
  0x48   :  { %4149 = vmatpush.msra.mxu3 %v700_v21 }
  0x49   :  { %716 = vmatpush.msra.mxu1 %v699_v23 }
  0x4a   :  { %4150 = vmatpush.msra.mxu3 %v699_v23 }
  0x4b   :  { %717 = vmatpush.msra.mxu1 %v698_v25 }
  0x4c   :  { %4083 = vmatmul.msk.f32.gmra.mxu0 %vm268_vm1, %v256_v6  ;;  %4151 = vmatpush.msra.mxu3 %v698_v25 }
  0x4d   :  { %718 = vmatpush.msra.mxu1 %v697_v27 }
  0x4e   :  { %4152 = vmatpush.msra.mxu3 %v697_v27 }
  0x4f   :  { %719 = vmatpush.msra.mxu1 %v696_v31 }
  0x50   :  { %4153 = vmatpush.msra.mxu3 %v696_v31 }
  0x51   :  { %720 = vmatpush.msra.mxu1 %v695_v35 }
  0x52   :  { %4154 = vmatpush.msra.mxu3 %v695_v35 }
  0x53   :  { %721 = vmatpush.msra.mxu1 %v694_v39 }
  0x54   :  { %4084 = vmatmul.msk.f32.gmra.mxu0 %vm268_vm1, %v257_v7  ;;  %4155 = vmatpush.msra.mxu3 %v694_v39 }
  0x55   :  { %722 = vmatpush.msra.mxu1 %v693_v43 }
  0x56   :  { %4156 = vmatpush.msra.mxu3 %v693_v43 }
  0x57   :  { %723 = vmatpush.msra.mxu1 %v692_v48 }
  0x58   :  { %4157 = vmatpush.msra.mxu3 %v692_v48 }
  0x59   :  { %724 = vmatpush.msra.mxu1 %v691_v53 }
  0x5a   :  { %4158 = vmatpush.msra.mxu3 %v691_v53 }
  0x5b   :  { %725 = vmatpush.msra.mxu1 %v690_v58 }
  0x5c   :  { %4085 = vmatmul.msk.f32.gmra.mxu0 %vm268_vm1, %v258_v8  ;;  %4159 = vmatpush.msra.mxu3 %v690_v58 }
  0x64   :  { %4086 = vmatmul.msk.f32.gmra.mxu0 %vm268_vm1, %v259_v9 }
  0x6c   :  { %4087 = vmatmul.msk.f32.gmra.mxu0 %vm268_vm1, %v260_v10 }
  0x74   :  { %4088 = vmatmul.msk.f32.gmra.mxu0 %vm268_vm1, %v261_v11 }
  0x7c   :  { %4089 = vmatmul.msk.f32.gmra.mxu0 %vm268_vm1, %v262_v12 }
  0xc1   :  { %v314_v19 = vpop.f32.mrf.mxu0 }
  0xc2   :  { %v5112_v20 = vadd.f32 %v5109_v16, %v314_v19 }
  0xc4   :  { %v5115_v22 = vmul.f32 0.70710677, %v5112_v20 }
  0xc6   :  { %v354_v24 = vmul.f32 %v5115_v22, %v5115_v22 }
  0xc8   :  { %v5119_v26 = vmin.f32 %v354_v24, 16.0 }
  0xc9   :  { %v317_v28 = vpop.f32.mrf.mxu0 }
  0xca   :  { %v356_v29 = vmul.f32 2.1237322e-06, %v5119_v26  ;;  %v5123_v30 = vadd.f32 %v5109_v16, %v317_v28  ;;  %v367_v32 = vmul.f32 3.8918573e-05, %v5119_v26 }
  0xcc   :  { %v357_v33 = vadd.f32 0.00028619796, %v356_v29  ;;  %v5127_v34 = vmul.f32 0.70710677, %v5123_v30  ;;  %v368_v36 = vadd.f32 0.001143296, %v367_v32 }
  0xce   :  { %v358_v37 = vmul.f32 %v357_v33, %v5119_v26  ;;  %v394_v38 = vmul.f32 %v5127_v34, %v5127_v34  ;;  %v369_v40 = vmul.f32 %v368_v36, %v5119_v26 }
  0xd0   :  { %v359_v41 = vadd.f32 0.0036580483, %v358_v37  ;;  %v5133_v42 = vmin.f32 %v394_v38, 16.0  ;;  %v370_v45 = vadd.f32 0.014752088, %v369_v40 }
  0xd1   :  { %v320_v44 = vpop.f32.mrf.mxu0 }
  0xd2   :  { %v396_v46 = vmul.f32 2.1237322e-06, %v5133_v42  ;;  %v5137_v47 = vadd.f32 %v5109_v16, %v320_v44  ;;  %v407_v49 = vmul.f32 3.8918573e-05, %v5133_v42  ;;  %v371_v50 = vmul.f32 %v370_v45, %v5119_v26 }
  0xd3   :  { %v360_v51 = vmul.f32 %v359_v41, %v5119_v26 }
  0xd4   :  { %v397_v52 = vadd.f32 0.00028619796, %v396_v46  ;;  %v5143_v54 = vmul.f32 0.70710677, %v5137_v47  ;;  %v372_v55 = vadd.f32 0.112945676, %v371_v50 }
  0xd5   :  { %v408_v56 = vadd.f32 0.001143296, %v407_v49  ;;  %v361_v62 = vadd.f32 0.05243302, %v360_v51 }
  0xd6   :  { %v398_v57 = vmul.f32 %v397_v52, %v5133_v42  ;;  %v434_v59 = vmul.f32 %v5143_v54, %v5143_v54  ;;  %v373_v60 = vmul.f32 %v372_v55, %v5119_v26 }
  0xd7   :  { %v409_v61 = vmul.f32 %v408_v56, %v5133_v42  ;;  %v362_v13 = vmul.f32 %v361_v62, %v5119_v26 }
  0xd8   :  { %v399_v63 = vadd.f32 0.0036580483, %v398_v57  ;;  %v5150_v4 = vmin.f32 %v434_v59, 16.0  ;;  %v374_v6 = vadd.f32 0.4994258, %v373_v60 }
  0xd9   :  { %v323_v5 = vpop.f32.mrf.mxu0  ;;  %v410_v7 = vadd.f32 0.014752088, %v409_v61  ;;  %v363_v25 = vadd.f32 0.18741608, %v362_v13 }
  0xda   :  { %v5153_v8 = vadd.f32 %v5109_v16, %v323_v5  ;;  %v436_v9 = vmul.f32 2.1237322e-06, %v5150_v4  ;;  %v375_v10 = vmul.f32 %v374_v6, %v5119_v26  ;;  %v447_v12 = vmul.f32 3.8918573e-05, %v5150_v4 }
  0xdb   :  { %v411_v11 = vmul.f32 %v410_v7, %v5133_v42  ;;  %v400_v14 = vmul.f32 %v399_v63, %v5133_v42  ;;  %v364_v40 = vmul.f32 %v363_v25, %v5119_v26 }
  0xdc   :  { %v437_v15 = vadd.f32 0.00028619796, %v436_v9  ;;  %v5162_v17 = vmul.f32 0.70710677, %v5153_v8  ;;  %v376_v18 = vadd.f32 1.0, %v375_v10 }
  0xdd   :  { %v412_v19 = vadd.f32 0.112945676, %v411_v11  ;;  %v448_v21 = vadd.f32 0.001143296, %v447_v12  ;;  %v401_v28 = vadd.f32 0.05243302, %v400_v14 }
  0xde   :  { %v438_v23 = vmul.f32 %v437_v15, %v5150_v4  ;;  %v474_v24 = vmul.f32 %v5162_v17, %v5162_v17  ;;  %4309 = vrcp.f32 %v376_v18  ;;  %v365_v53 = vadd.f32 1.1283791, %v364_v40 }
  0xdf   :  { %v413_v27 = vmul.f32 %v412_v19, %v5133_v42  ;;  %v449_v33 = vmul.f32 %v448_v21, %v5150_v4  ;;  %v402_v43 = vmul.f32 %v401_v28, %v5133_v42  ;;  %v386_v57 = vand.u32 2147483647, %v376_v18 }
  0xe0   :  { %v439_v29 = vadd.f32 0.0036580483, %v438_v23  ;;  %v5168_v31 = vmin.f32 %v474_v24, 16.0  ;;  %v388_v58 = vand.u32 2147483648, %v376_v18  ;;  %vm382_vm3 = vweird.f32 %v376_v18 }
  0xe1   :  { %v326_v32 = vpop.f32.mrf.mxu0  ;;  %v414_v38 = vadd.f32 0.4994258, %v413_v27  ;;  %v450_v39 = vadd.f32 0.014752088, %v449_v33  ;;  %v403_v56 = vadd.f32 0.18741608, %v402_v43  ;;  %v366_v10 = vmul.f32 %v365_v53, %v5115_v22 }
  0xe2   :  { %v5172_v35 = vadd.f32 %v5109_v16, %v326_v32  ;;  %v440_v36 = vmul.f32 %v439_v29, %v5150_v4  ;;  %v476_v37 = vmul.f32 2.1237322e-06, %v5168_v31  ;;  %v487_v6 = vmul.f32 3.8918573e-05, %v5168_v31 }
  0xe3   :  { %v415_v44 = vmul.f32 %v414_v38, %v5133_v42  ;;  %v451_v45 = vmul.f32 %v450_v39, %v5150_v4  ;;  %v404_v11 = vmul.f32 %v403_v56, %v5133_v42  ;;  %v389_v12 = vor.u32 1.1754944e-38, %v388_v58 }
  0xe4   :  { %v4310_v41 = vpop.eup %4309  ;;  %v441_v46 = vadd.f32 0.05243302, %v440_v36  ;;  %v5181_v48 = vmul.f32 0.70710677, %v5172_v35  ;;  %v477_v50 = vadd.f32 0.00028619796, %v476_v37 }
  0xe5   :  { %v378_v49 = vmul.f32 %v4310_v41, %v376_v18  ;;  %v5183_v51 = vadd.f32 1.0, %v415_v44  ;;  %v452_v52 = vadd.f32 0.112945676, %v451_v45  ;;  %vm383_vm2 = vweird.f32 %v4310_v41 }
  0xe6   :  { %v514_v59 = vmul.f32 %v5181_v48, %v5181_v48  ;;  %v442_v62 = vmul.f32 %v441_v46, %v5150_v4  ;;  %v478_v63 = vmul.f32 %v477_v50, %v5168_v31  ;;  %vm384_vm4 = vmor %vm382_vm3, %vm383_vm2  ;;  %vm387_vm5 = vcmp.eq.f32.partialorder %v386_v57, 8.507059e+37 }
  0xe7   :  { %v379_v55 = vsub.f32 1.0, %v378_v49  ;;  %4311 = vrcp.f32 %v5183_v51  ;;  %v453_v5 = vmul.f32 %v452_v52, %v5150_v4  ;;  %v488_v25 = vadd.f32 0.001143296, %v487_v6 }
  0xe8   :  { %v5200_v13 = vmin.f32 %v514_v59, 16.0  ;;  %v443_v21 = vadd.f32 0.18741608, %v442_v62  ;;  %v479_v23 = vadd.f32 0.0036580483, %v478_v63  ;;  %v338_v42 = vmul.f32 0.5, %v5112_v20 }
  0xe9   :  { %v329_v26 = vpop.f32.mrf.mxu0  ;;  %v380_v61 = vmul.f32 %v4310_v41, %v379_v55  ;;  %v454_v15 = vadd.f32 0.4994258, %v453_v5  ;;  %v405_v28 = vadd.f32 1.1283791, %v404_v11  ;;  %v489_v33 = vmul.f32 %v488_v25, %v5168_v31 }
  0xea   :  { %v5189_v60 = vadd.f32 %v5109_v16, %v329_v26  ;;  %v516_v36 = vmul.f32 2.1237322e-06, %v5200_v13  ;;  %v426_v39 = vand.u32 2147483647, %v5183_v51  ;;  %v444_v40 = vmul.f32 %v443_v21, %v5150_v4 }
  0xeb   :  { %v381_v9 = vadd.f32 %v4310_v41, %v380_v61  ;;  %v455_v32 = vmul.f32 %v454_v15, %v5150_v4  ;;  %v428_v46 = vand.u32 2147483648, %v5183_v51  ;;  %v490_v49 = vadd.f32 0.014752088, %v489_v33 }
  0xec   :  { %v5196_v7 = vmul.f32 0.70710677, %v5189_v60  ;;  %v517_v53 = vadd.f32 0.00028619796, %v516_v36  ;;  %v406_v55 = vmul.f32 %v405_v28, %v5127_v34  ;;  %vm422_vm7 = vweird.f32 %v5183_v51 }
  0xed   :  { %v385_v14 = vsel %vm384_vm4, %v4310_v41, %v381_v9  ;;  %v4312_v19 = vpop.eup %4311  ;;  %v480_v41 = vmul.f32 %v479_v23, %v5168_v31  ;;  %v5215_v20 = vadd.f32 1.0, %v455_v32  ;;  %v445_v26 = vadd.f32 1.1283791, %v444_v40 }
  0xee   :  { %v390_v24 = vsel %vm387_vm5, %v389_v12, %v385_v14  ;;  %v554_v27 = vmul.f32 %v5196_v7, %v5196_v7  ;;  %v418_v22 = vmul.f32 %v4312_v19, %v5183_v51  ;;  %vm423_vm6 = vweird.f32 %v4312_v19 }
  0xef   :  { %v391_v18 = vmul.f32 %v390_v24, %v366_v10  ;;  %4313 = vrcp.f32 %v5215_v20  ;;  %v481_v57 = vadd.f32 0.05243302, %v480_v41  ;;  %vm424_vm8 = vmor %vm422_vm7, %vm423_vm6  ;;  %v429_v58 = vor.u32 1.1754944e-38, %v428_v46 }
  0xf0   :  { %v419_v43 = vsub.f32 1.0, %v418_v22  ;;  %v5217_v44 = vmin.f32 %v554_v27, 16.0  ;;  %v491_v59 = vmul.f32 %v490_v49, %v5168_v31  ;;  %vm427_vm9 = vcmp.eq.f32.partialorder %v426_v39, 8.507059e+37 }
  0xf1   :  { %v332_v29 = vpop.f32.mrf.mxu0  ;;  %v4090_v38 = vclamps-f32 %v391_v18, 1.0  ;;  %v518_v34 = vmul.f32 %v517_v53, %v5200_v13  ;;  %v527_v12 = vmul.f32 3.8918573e-05, %v5200_v13  ;;  %v339_v14 = vmul.f32 0.5, %v5123_v30 }
  0xf2   :  { %v5210_v37 = vadd.f32 %v5109_v16, %v332_v29  ;;  %v420_v52 = vmul.f32 %v4312_v19, %v419_v43  ;;  %v556_v61 = vmul.f32 2.1237322e-06, %v5217_v44  ;;  %v492_v11 = vadd.f32 0.112945676, %v491_v59 }
  0xf3   :  { %v674_v45 = vadd.f32 1.0, %v4090_v38  ;;  %v446_v15 = vmul.f32 %v445_v26, %v5143_v54  ;;  %v482_v21 = vmul.f32 %v481_v57, %v5168_v31  ;;  %v519_v27 = vadd.f32 0.0036580483, %v518_v34 }
  0xf4   :  { %v5221_v50 = vmul.f32 0.70710677, %v5210_v37  ;;  %v421_v56 = vadd.f32 %v4312_v19, %v420_v52  ;;  %v557_v23 = vadd.f32 0.00028619796, %v556_v61  ;;  %v466_v22 = vand.u32 2147483647, %v5215_v20 }
  0xf5   :  { %v682_v4 = vmul.f32 %v674_v45, %v338_v42  ;;  %v4314_v9 = vpop.eup %4313  ;;  %v493_v42 = vmul.f32 %v492_v11, %v5168_v31  ;;  %v468_v28 = vand.u32 2147483648, %v5215_v20  ;;  %v528_v29 = vadd.f32 0.001143296, %v527_v12 }
  0xf6   :  { %v594_v62 = vmul.f32 %v5221_v50, %v5221_v50  ;;  %v425_v5 = vsel %vm424_vm8, %v4312_v19, %v421_v56  ;;  %v458_v19 = vmul.f32 %v4314_v9, %v5215_v20  ;;  %vm463_vm10 = vweird.f32 %v4314_v9 }
  0xf7   :  { %726 = vmatmul.f32.vlgmr.msra.gmra.mxu1 %v682_v4  ;;  %v430_v51 = vsel %vm427_vm9, %v429_v58, %v425_v5  ;;  %v494_v33 = vadd.f32 0.4994258, %v493_v42  ;;  %v567_v36 = vmul.f32 3.8918573e-05, %v5217_v44  ;;  %v558_v38 = vmul.f32 %v557_v23, %v5217_v44 }
  0xf8   :  { %v431_v10 = vmul.f32 %v430_v51, %v406_v55  ;;  %v5239_v24 = vmin.f32 %v594_v62, 16.0  ;;  %v459_v18 = vsub.f32 1.0, %v458_v19  ;;  %v529_v41 = vmul.f32 %v528_v29, %v5200_v13 }
  0xf9   :  { %v335_v63 = vpop.f32.mrf.mxu0  ;;  %vm462_vm11 = vweird.f32 %v5215_v20  ;;  %v495_v45 = vmul.f32 %v494_v33, %v5168_v31  ;;  %v568_v46 = vadd.f32 0.001143296, %v567_v36  ;;  %v520_v49 = vmul.f32 %v519_v27, %v5200_v13 }
  0xfa   :  { %v5232_v6 = vadd.f32 %v5109_v16, %v335_v63  ;;  %v4091_v25 = vclamps-f32 %v431_v10, 1.0  ;;  %v460_v32 = vmul.f32 %v4314_v9, %v459_v18  ;;  %v596_v39 = vmul.f32 2.1237322e-06, %v5239_v24  ;;  %vm464_vm12 = vmor %vm462_vm11, %vm463_vm10 }
  0xfb   :  { %v469_v53 = vor.u32 1.1754944e-38, %v468_v28  ;;  %v530_v4 = vadd.f32 0.014752088, %v529_v41  ;;  %vm467_vm13 = vcmp.eq.f32.partialorder %v466_v22, 8.507059e+37  ;;  %v5258_v56 = vadd.f32 1.0, %v495_v45 }
  0xfc   :  { %v5242_v16 = vmul.f32 0.70710677, %v5232_v6  ;;  %v675_v54 = vadd.f32 1.0, %v4091_v25  ;;  %v461_v43 = vadd.f32 %v4314_v9, %v460_v32  ;;  %v569_v26 = vmul.f32 %v568_v46, %v5217_v44 }
  0xfd   :  { %v559_v57 = vadd.f32 0.0036580483, %v558_v38  ;;  %v597_v58 = vadd.f32 0.00028619796, %v596_v39  ;;  %v531_v59 = vmul.f32 %v530_v4, %v5200_v13  ;;  %4315 = vrcp.f32 %v5258_v56 }
  0xfe   :  { %v634_v30 = vmul.f32 %v5242_v16, %v5242_v16  ;;  %v683_v40 = vmul.f32 %v675_v54, %v339_v14  ;;  %v465_v55 = vsel %vm464_vm12, %v4314_v9, %v461_v43  ;;  %v607_v62 = vmul.f32 3.8918573e-05, %v5239_v24 }
  0xff   :  { %v470_v20 = vsel %vm467_vm13, %v469_v53, %v465_v55  ;;  %v483_v63 = vadd.f32 0.18741608, %v482_v21  ;;  %v532_v51 = vadd.f32 0.112945676, %v531_v59  ;;  %v570_v9 = vadd.f32 0.014752088, %v569_v26 }
 0x100   :  { %v5256_v52 = vmin.f32 %v634_v30, 16.0  ;;  %729 = vmatmul.f32.gmra.mxu1 %v683_v40  ;;  %v471_v61 = vmul.f32 %v470_v20, %v446_v15  ;;  %v340_v10 = vmul.f32 0.5, %v5137_v47  ;;  %v521_v11 = vadd.f32 0.05243302, %v520_v49 }
 0x101   :  { %v560_v12 = vmul.f32 %v559_v57, %v5217_v44  ;;  %v598_v14 = vmul.f32 %v597_v58, %v5239_v24  ;;  %v533_v15 = vmul.f32 %v532_v51, %v5200_v13  ;;  %v571_v23 = vmul.f32 %v570_v9, %v5217_v44 }
 0x102   :  { %v636_v5 = vmul.f32 2.1237322e-06, %v5256_v52  ;;  %v4092_v34 = vclamps-f32 %v471_v61, 1.0  ;;  %v608_v25 = vadd.f32 0.001143296, %v607_v62  ;;  %v484_v21 = vmul.f32 %v483_v63, %v5168_v31 }
 0x103   :  { %v647_v18 = vmul.f32 3.8918573e-05, %v5256_v52  ;;  %v4316_v22 = vpop.eup %4315  ;;  %v534_v30 = vadd.f32 0.4994258, %v533_v15  ;;  %v572_v47 = vadd.f32 0.112945676, %v571_v23  ;;  %v522_v28 = vmul.f32 %v521_v11, %v5200_v13 }
 0x104   :  { %v676_v19 = vadd.f32 1.0, %v4092_v34  ;;  %v637_v27 = vadd.f32 0.00028619796, %v636_v5  ;;  %v609_v54 = vmul.f32 %v608_v25, %v5239_v24  ;;  %v561_v29 = vadd.f32 0.05243302, %v560_v12 }
 0x105   :  { %v599_v32 = vadd.f32 0.0036580483, %v598_v14  ;;  %v498_v33 = vmul.f32 %v4316_v22, %v5258_v56  ;;  %v535_v36 = vmul.f32 %v534_v30, %v5200_v13  ;;  %v573_v31 = vmul.f32 %v572_v47, %v5217_v44 }
 0x106   :  { %v684_v42 = vmul.f32 %v676_v19, %v340_v10  ;;  %v610_v38 = vadd.f32 0.014752088, %v609_v54  ;;  %v648_v39 = vadd.f32 0.001143296, %v647_v18  ;;  %v485_v40 = vadd.f32 1.1283791, %v484_v21 }
 0x107   :  { %v638_v41 = vmul.f32 %v637_v27, %v5256_v52  ;;  %v499_v43 = vsub.f32 1.0, %v498_v33  ;;  %v508_v45 = vand.u32 2147483648, %v5258_v56  ;;  %v5279_v46 = vadd.f32 1.0, %v535_v36 }
 0x108   :  { %732 = vmatmul.f32.gmra.mxu1 %v684_v42  ;;  %v574_v49 = vadd.f32 0.4994258, %v573_v31  ;;  %v611_v53 = vmul.f32 %v610_v38, %v5239_v24  ;;  %v649_v4 = vmul.f32 %v648_v39, %v5256_v52  ;;  %vm503_vm14 = vweird.f32 %v4316_v22 }
 0x109   :  { %v500_v55 = vmul.f32 %v4316_v22, %v499_v43  ;;  %v506_v26 = vand.u32 2147483647, %v5258_v56  ;;  %v523_v57 = vadd.f32 0.18741608, %v522_v28  ;;  %v562_v58 = vmul.f32 %v561_v29, %v5217_v44 }
 0x10a   :  { %v600_v20 = vmul.f32 %v599_v32, %v5239_v24  ;;  %4317 = vrcp.f32 %v5279_v46  ;;  %vm502_vm15 = vweird.f32 %v5258_v56  ;;  %v575_v61 = vmul.f32 %v574_v49, %v5217_v44 }
 0x10b   :  { %v501_v59 = vadd.f32 %v4316_v22, %v500_v55  ;;  %v612_v62 = vadd.f32 0.112945676, %v611_v53  ;;  %v486_v63 = vmul.f32 %v485_v40, %v5162_v17  ;;  %v639_v5 = vadd.f32 0.0036580483, %v638_v41  ;;  %vm504_vm0 = vmor %vm502_vm15, %vm503_vm14 }
 0x10c   :  { %v509_v34 = vor.u32 1.1754944e-38, %v508_v45  ;;  %v650_v51 = vadd.f32 0.014752088, %v649_v4  ;;  %vm507_vm1 = vcmp.eq.f32.partialorder %v506_v26, 8.507059e+37  ;;  %v5290_v10 = vadd.f32 1.0, %v575_v61 }
 0x10d   :  { %v505_v9 = vsel %vm504_vm0, %v4316_v22, %v501_v59  ;;  %v613_v11 = vmul.f32 %v612_v62, %v5239_v24  ;;  %v524_v12 = vmul.f32 %v523_v57, %v5200_v13  ;;  %v563_v14 = vadd.f32 0.18741608, %v562_v58 }
 0x10e   :  { %v510_v19 = vsel %vm507_vm1, %v509_v34, %v505_v9  ;;  %v651_v56 = vmul.f32 %v650_v51, %v5256_v52  ;;  %v601_v15 = vadd.f32 0.05243302, %v600_v20  ;;  %4319 = vrcp.f32 %v5290_v10 }
 0x10f   :  { %v511_v23 = vmul.f32 %v510_v19, %v486_v63  ;;  %v640_v25 = vmul.f32 %v639_v5, %v5256_v52  ;;  %v614_v21 = vadd.f32 0.4994258, %v613_v11  ;;  %v341_v42 = vmul.f32 0.5, %v5153_v8 }
 0x110   :  { %v4318_v17 = vpop.eup %4317  ;;  %v652_v22 = vadd.f32 0.112945676, %v651_v56  ;;  %v525_v30 = vadd.f32 1.1283791, %v524_v12  ;;  %v564_v13 = vmul.f32 %v563_v14, %v5217_v44  ;;  %v602_v54 = vmul.f32 %v601_v15, %v5239_v24 }
 0x111   :  { %v4093_v27 = vclamps-f32 %v511_v23, 1.0  ;;  %v538_v18 = vmul.f32 %v4318_v17, %v5279_v46  ;;  %v615_v47 = vmul.f32 %v614_v21, %v5239_v24  ;;  %v641_v33 = vadd.f32 0.05243302, %v640_v25 }
 0x112   :  { %v653_v32 = vmul.f32 %v652_v22, %v5256_v52  ;;  %v546_v36 = vand.u32 2147483647, %v5279_v46  ;;  %v548_v31 = vand.u32 2147483648, %v5279_v46  ;;  %vm543_vm2 = vweird.f32 %v4318_v17 }
 0x113   :  { %v677_v28 = vadd.f32 1.0, %v4093_v27  ;;  %v539_v29 = vsub.f32 1.0, %v538_v18  ;;  %v5305_v38 = vadd.f32 1.0, %v615_v47  ;;  %v526_v41 = vmul.f32 %v525_v30, %v5181_v48 }
 0x114   :  { %v4320_v39 = vpop.eup %4319  ;;  %v654_v44 = vadd.f32 0.4994258, %v653_v32  ;;  %v603_v45 = vadd.f32 0.18741608, %v602_v54  ;;  %vm542_vm3 = vweird.f32 %v5279_v46  ;;  %v565_v4 = vadd.f32 1.1283791, %v564_v13 }
 0x115   :  { %v685_v8 = vmul.f32 %v677_v28, %v341_v42  ;;  %v540_v40 = vmul.f32 %v4318_v17, %v539_v29  ;;  %v578_v43 = vmul.f32 %v4320_v39, %v5290_v10  ;;  %4321 = vrcp.f32 %v5305_v38  ;;  %vm544_vm4 = vmor %vm542_vm3, %vm543_vm2 }
 0x116   :  { %v655_v53 = vmul.f32 %v654_v44, %v5256_v52  ;;  %v642_v55 = vmul.f32 %v641_v33, %v5256_v52  ;;  %v549_v26 = vor.u32 1.1754944e-38, %v548_v31  ;;  %vm547_vm5 = vcmp.eq.f32.partialorder %v546_v36, 8.507059e+37 }
 0x117   :  { %735 = vmatmul.f32.gmra.mxu1 %v685_v8  ;;  %v541_v49 = vadd.f32 %v4318_v17, %v540_v40  ;;  %v579_v57 = vsub.f32 1.0, %v578_v43  ;;  %v588_v48 = vand.u32 2147483648, %v5290_v10  ;;  %vm583_vm6 = vweird.f32 %v4320_v39 }
 0x118   :  { %v656_v20 = vadd.f32 1.0, %v655_v53  ;;  %v586_v62 = vand.u32 2147483647, %v5290_v10  ;;  %v604_v46 = vmul.f32 %v603_v45, %v5239_v24  ;;  %v643_v34 = vadd.f32 0.18741608, %v642_v55 }
 0x119   :  { %v545_v58 = vsel %vm544_vm4, %v4318_v17, %v541_v49  ;;  %v580_v61 = vmul.f32 %v4320_v39, %v579_v57  ;;  %vm582_vm7 = vweird.f32 %v5290_v10  ;;  %v589_v11 = vor.u32 1.1754944e-38, %v588_v48  ;;  %v5332_v48 = vld [vmem:[%s6453_s13] ss:$0 sm:$0xff] }
 0x11a   :  { %v550_v59 = vsel %vm547_vm5, %v549_v26, %v545_v58  ;;  %4323 = vrcp.f32 %v656_v20  ;;  %vm584_vm8 = vmor %vm582_vm7, %vm583_vm6  ;;  %v342_v14 = vmul.f32 0.5, %v5172_v35  ;;  %v566_v19 = vmul.f32 %v565_v4, %v5196_v7 }
 0x11b   :  { %v551_v63 = vmul.f32 %v550_v59, %v526_v41  ;;  %v4322_v5 = vpop.eup %4321  ;;  %v581_v51 = vadd.f32 %v4320_v39, %v580_v61  ;;  %vm587_vm9 = vcmp.eq.f32.partialorder %v586_v62, 8.507059e+37  ;;  %v605_v15 = vadd.f32 1.1283791, %v604_v46  ;;  %v1118_v62 = vld [vmem:[#allocation7 + $0x78] sm:$0xff] }
 0x11c   :  { %v618_v12 = vmul.f32 %v4322_v5, %v5305_v38  ;;  %v644_v25 = vmul.f32 %v643_v34, %v5256_v52  ;;  %v628_v10 = vand.u32 2147483648, %v5305_v38  ;;  %vm623_vm10 = vweird.f32 %v4322_v5  ;;  %1123 = vmatpush.msra.mxu2 %v1118_v62  ;;  %4160 = vmatpush.msrb.mxu3 %v1118_v62  ;;  %v1117_v34 = vld [vmem:[#allocation7 + $0x70] sm:$0xff] }
 0x11d   :  { %v4094_v9 = vclamps-f32 %v551_v63, 1.0  ;;  %v585_v56 = vsel %vm584_vm8, %v4320_v39, %v581_v51  ;;  %v626_v42 = vand.u32 2147483647, %v5305_v38  ;;  %v343_v7 = vmul.f32 0.5, %v5189_v60 }
 0x11e   :  { %v590_v23 = vsel %vm587_vm9, %v589_v11, %v585_v56  ;;  %v619_v17 = vsub.f32 1.0, %v618_v12  ;;  %v606_v13 = vmul.f32 %v605_v15, %v5221_v50  ;;  %vm622_vm11 = vweird.f32 %v5305_v38  ;;  %1124 = vmatpush.msra.mxu2 %v1117_v34  ;;  %4161 = vmatpush.msrb.mxu3 %v1117_v34  ;;  %v1116_v12 = vld [vmem:[#allocation7 + $0x68] sm:$0xff]  ;;  %v1115_v15 = vld [vmem:[#allocation7 + $0x60] sm:$0xff]  ;;  %v1105_v34 = vld [vmem:[#allocation7 + $0x10] sm:$0xff] }
 0x11f   :  { %v678_v24 = vadd.f32 1.0, %v4094_v9  ;;  %v591_v21 = vmul.f32 %v590_v23, %v566_v19  ;;  %v645_v52 = vadd.f32 1.1283791, %v644_v25  ;;  %vm624_vm12 = vmor %vm622_vm11, %vm623_vm10  ;;  %v629_v28 = vor.u32 1.1754944e-38, %v628_v10 }
 0x120   :  { %v4324_v27 = vpop.eup %4323  ;;  %v620_v22 = vmul.f32 %v4322_v5, %v619_v17  ;;  %vm627_vm13 = vcmp.eq.f32.partialorder %v626_v42, 8.507059e+37  ;;  %v666_v33 = vand.u32 2147483647, %v656_v20  ;;  %v668_v36 = vand.u32 2147483648, %v656_v20  ;;  %1125 = vmatpush.msra.mxu2 %v1116_v12  ;;  %4162 = vmatpush.msrb.mxu3 %v1116_v12  ;;  %v1114_v17 = vld [vmem:[#allocation7 + $0x58] sm:$0xff] }
 0x121   :  { %v686_v18 = vmul.f32 %v678_v24, %v342_v14  ;;  %v4095_v35 = vclamps-f32 %v591_v21, 1.0  ;;  %v658_v30 = vmul.f32 %v4324_v27, %v656_v20  ;;  %vm663_vm14 = vweird.f32 %v4324_v27 }
 0x122   :  { %v621_v47 = vadd.f32 %v4322_v5, %v620_v22  ;;  %vm662_vm15 = vweird.f32 %v656_v20  ;;  %v669_v38 = vor.u32 1.1754944e-38, %v668_v36  ;;  %v646_v44 = vmul.f32 %v645_v52, %v5242_v16  ;;  %1126 = vmatpush.msra.mxu2 %v1115_v15  ;;  %4163 = vmatpush.msrb.mxu3 %v1115_v15  ;;  %v1104_v15 = vld [vmem:[#allocation7 + $0x8] sm:$0xff] }
 0x123   :  { %738 = vmatmul.f32.gmra.mxu1 %v686_v18  ;;  %v679_v54 = vadd.f32 1.0, %v4095_v35  ;;  %v659_v29 = vsub.f32 1.0, %v658_v30  ;;  %vm664_vm0 = vmor %vm662_vm15, %vm663_vm14  ;;  %vm667_vm1 = vcmp.eq.f32.partialorder %v666_v33, 8.507059e+37  ;;  %v344_v43 = vmul.f32 0.5, %v5210_v37  ;;  %v1112_v35 = vld [vmem:[#allocation7 + $0x48] sm:$0xff] }
 0x124   :  { %v625_v32 = vsel %vm624_vm12, %v4322_v5, %v621_v47  ;;  %v345_v57 = vmul.f32 0.5, %v5232_v6  ;;  %1127 = vmatpush.msra.mxu2 %v1114_v17  ;;  %4164 = vmatpush.msrb.mxu3 %v1114_v17 }
 0x125   :  { %v687_v31 = vmul.f32 %v679_v54, %v343_v7  ;;  %v630_v39 = vsel %vm627_vm13, %v629_v28, %v625_v32  ;;  %v660_v8 = vmul.f32 %v4324_v27, %v659_v29  ;;  %v1111_v28 = vld [vmem:[#allocation7 + $0x40] sm:$0xff] }
 0x126   :  { %v631_v60 = vmul.f32 %v630_v39, %v606_v13 }
 0x127   :  { %741 = vmatmul.f32.vlgmr.msra.gmra.mxu3 %v687_v31  ;;  %v661_v50 = vadd.f32 %v4324_v27, %v660_v8  ;;  %v1110_v31 = vld [vmem:[#allocation7 + $0x38] sm:$0xff] }
 0x128   :  { %v4096_v40 = vclamps-f32 %v631_v60, 1.0 }
 0x129   :  { %v665_v41 = vsel %vm664_vm0, %v4324_v27, %v661_v50  ;;  %v1113_v27 = vld [vmem:[#allocation7 + $0x50] sm:$0xff] }
 0x12a   :  { %v680_v45 = vadd.f32 1.0, %v4096_v40  ;;  %v670_v49 = vsel %vm667_vm1, %v669_v38, %v665_v41  ;;  %1128 = vmatpush.msra.mxu2 %v1113_v27  ;;  %4165 = vmatpush.msrb.mxu3 %v1113_v27  ;;  %v1109_v38 = vld [vmem:[#allocation7 + $0x30] sm:$0xff] }
 0x12b   :  { %v671_v53 = vmul.f32 %v670_v49, %v646_v44  ;;  %v1108_v49 = vld [vmem:[#allocation7 + $0x28] sm:$0xff] }
 0x12c   :  { %v688_v4 = vmul.f32 %v680_v45, %v344_v43  ;;  %1129 = vmatpush.msra.mxu2 %v1112_v35  ;;  %4166 = vmatpush.msrb.mxu3 %v1112_v35 }
 0x12d   :  { %v4097_v55 = vclamps-f32 %v671_v53, 1.0 }
 0x12e   :  { %1130 = vmatpush.msra.mxu2 %v1111_v28  ;;  %4167 = vmatpush.msrb.mxu3 %v1111_v28 }
 0x12f   :  { %744 = vmatmul.f32.gmra.mxu3 %v688_v4  ;;  %v681_v26 = vadd.f32 1.0, %v4097_v55  ;;  %v1107_v55 = vld [vmem:[#allocation7 + $0x20] sm:$0xff] }
 0x130   :  { %1131 = vmatpush.msra.mxu2 %v1110_v31  ;;  %4168 = vmatpush.msrb.mxu3 %v1110_v31 }
 0x131   :  { %v689_v58 = vmul.f32 %v681_v26, %v345_v57 }
 0x132   :  { %1132 = vmatpush.msra.mxu2 %v1109_v38  ;;  %4169 = vmatpush.msrb.mxu3 %v1109_v38 }
 0x134   :  { %1133 = vmatpush.msra.mxu2 %v1108_v49  ;;  %4170 = vmatpush.msrb.mxu3 %v1108_v49 }
 0x136   :  { %1134 = vmatpush.msra.mxu2 %v1107_v55  ;;  %4171 = vmatpush.msrb.mxu3 %v1107_v55 }
 0x137   :  { %747 = vmatmul.f32.gmra.mxu3 %v689_v58 }
 0x174   :  { %v727_v16 = vpop.f32.mrf.mxu1 }
 0x175   :  { %v5335_v20 = vadd.f32 %v5332_v48, %v727_v16 }
 0x177   :  { %v5338_v37 = vmul.f32 0.70710677, %v5335_v20 }
 0x179   :  { %v767_v59 = vmul.f32 %v5338_v37, %v5338_v37 }
 0x17b   :  { %v5342_v61 = vmin.f32 %v767_v59, 16.0  ;;  %v1106_v59 = vld [vmem:[#allocation7 + $0x18] sm:$0xff] }
 0x17c   :  { %1135 = vmatpush.msra.mxu2 %v1106_v59  ;;  %4172 = vmatpush.msrb.mxu3 %v1106_v59 }
 0x17d   :  { %v769_v6 = vmul.f32 2.1237322e-06, %v5342_v61  ;;  %v780_v46 = vmul.f32 3.8918573e-05, %v5342_v61  ;;  %v730_v5 = vpop.f32.mrf.mxu1 }
 0x17e   :  { %v5347_v9 = vadd.f32 %v5332_v48, %v730_v5  ;;  %1136 = vmatpush.msra.mxu2 %v1105_v34  ;;  %4173 = vmatpush.msrb.mxu3 %v1105_v34 }
 0x17f   :  { %v770_v63 = vadd.f32 0.00028619796, %v769_v6  ;;  %v781_v51 = vadd.f32 0.001143296, %v780_v46 }
 0x180   :  { %v5352_v19 = vmul.f32 0.70710677, %v5347_v9  ;;  %1137 = vmatpush.msra.mxu2 %v1104_v15  ;;  %4174 = vmatpush.msrb.mxu3 %v1104_v15 }
 0x181   :  { %v771_v11 = vmul.f32 %v770_v63, %v5342_v61  ;;  %v782_v14 = vmul.f32 %v781_v51, %v5342_v61 }
 0x182   :  { %v807_v23 = vmul.f32 %v5352_v19, %v5352_v19 }
 0x183   :  { %v772_v56 = vadd.f32 0.0036580483, %v771_v11  ;;  %v783_v24 = vadd.f32 0.014752088, %v782_v14 }
 0x184   :  { %v5358_v10 = vmin.f32 %v807_v23, 16.0 }
 0x185   :  { %v784_v25 = vmul.f32 %v783_v24, %v5342_v61  ;;  %v773_v21 = vmul.f32 %v772_v56, %v5342_v61  ;;  %v733_v47 = vpop.f32.mrf.mxu1 }
 0x186   :  { %v809_v22 = vmul.f32 2.1237322e-06, %v5358_v10  ;;  %v820_v42 = vmul.f32 3.8918573e-05, %v5358_v10  ;;  %v5364_v54 = vadd.f32 %v5332_v48, %v733_v47 }
 0x187   :  { %v785_v18 = vadd.f32 0.112945676, %v784_v25  ;;  %v774_v7 = vadd.f32 0.05243302, %v773_v21  ;;  %v1103_v21 = vld [vmem:[#allocation7] sm:$0xff] }
 0x188   :  { %v810_v13 = vadd.f32 0.00028619796, %v809_v22  ;;  %v821_v52 = vadd.f32 0.001143296, %v820_v42  ;;  %v5369_v36 = vmul.f32 0.70710677, %v5364_v54  ;;  %1138 = vmatpush.msra.mxu2 %v1103_v21  ;;  %4175 = vmatpush.msrb.mxu3 %v1103_v21 }
 0x189   :  { %v786_v30 = vmul.f32 %v785_v18, %v5342_v61  ;;  %v775_v8 = vmul.f32 %v774_v7, %v5342_v61 }
 0x18a   :  { %v811_v32 = vmul.f32 %v810_v13, %v5358_v10  ;;  %v822_v33 = vmul.f32 %v821_v52, %v5358_v10  ;;  %v847_v40 = vmul.f32 %v5369_v36, %v5369_v36 }
 0x18b   :  { %v787_v29 = vadd.f32 0.4994258, %v786_v30  ;;  %v776_v53 = vadd.f32 0.18741608, %v775_v8 }
 0x18c   :  { %v812_v60 = vadd.f32 0.0036580483, %v811_v32  ;;  %v823_v50 = vadd.f32 0.014752088, %v822_v33  ;;  %v5379_v45 = vmin.f32 %v847_v40, 16.0 }
 0x18d   :  { %v788_v39 = vmul.f32 %v787_v29, %v5342_v61  ;;  %v777_v62 = vmul.f32 %v776_v53, %v5342_v61 }
 0x18e   :  { %v824_v41 = vmul.f32 %v823_v50, %v5358_v10  ;;  %v813_v43 = vmul.f32 %v812_v60, %v5358_v10  ;;  %v849_v4 = vmul.f32 2.1237322e-06, %v5379_v45  ;;  %v860_v57 = vmul.f32 3.8918573e-05, %v5379_v45 }
 0x18f   :  { %v5375_v44 = vadd.f32 1.0, %v788_v39  ;;  %v778_v24 = vadd.f32 1.1283791, %v777_v62 }
 0x190   :  { %v825_v26 = vadd.f32 0.112945676, %v824_v41  ;;  %v814_v58 = vadd.f32 0.05243302, %v813_v43  ;;  %v850_v16 = vadd.f32 0.00028619796, %v849_v4 }
 0x191   :  { %4325 = vrcp.f32 %v5375_v44  ;;  %v861_v46 = vadd.f32 0.001143296, %v860_v57  ;;  %v799_v27 = vand.u32 2147483647, %v5375_v44  ;;  %v801_v18 = vand.u32 2147483648, %v5375_v44 }
 0x192   :  { %v826_v6 = vmul.f32 %v825_v26, %v5358_v10  ;;  %v851_v5 = vmul.f32 %v850_v16, %v5379_v45  ;;  %v815_v14 = vmul.f32 %v814_v58, %v5358_v10  ;;  %vm795_vm3 = vweird.f32 %v5375_v44 }
 0x193   :  { %v862_v12 = vmul.f32 %v861_v46, %v5379_v45  ;;  %v802_v28 = vor.u32 1.1754944e-38, %v801_v18  ;;  %v779_v32 = vmul.f32 %v778_v24, %v5338_v37  ;;  %vm800_vm5 = vcmp.eq.f32.partialorder %v799_v27, 8.507059e+37 }
 0x194   :  { %v827_v51 = vadd.f32 0.4994258, %v826_v6  ;;  %v852_v56 = vadd.f32 0.0036580483, %v851_v5  ;;  %v736_v25 = vpop.f32.mrf.mxu1  ;;  %v816_v7 = vadd.f32 0.18741608, %v815_v14 }
 0x195   :  { %v863_v17 = vadd.f32 0.014752088, %v862_v12  ;;  %v5396_v42 = vadd.f32 %v5332_v48, %v736_v25  ;;  %v751_v43 = vmul.f32 0.5, %v5335_v20 }
 0x196   :  { %v828_v61 = vmul.f32 %v827_v51, %v5358_v10  ;;  %v853_v13 = vmul.f32 %v852_v56, %v5379_v45  ;;  %v817_v39 = vmul.f32 %v816_v7, %v5358_v10 }
 0x197   :  { %v4326_v63 = vpop.eup %4325  ;;  %v864_v30 = vmul.f32 %v863_v17, %v5379_v45  ;;  %v5402_v47 = vmul.f32 0.70710677, %v5396_v42 }
 0x198   :  { %v791_v11 = vmul.f32 %v4326_v63, %v5375_v44  ;;  %v5393_v22 = vadd.f32 1.0, %v828_v61  ;;  %vm796_vm2 = vweird.f32 %v4326_v63  ;;  %v854_v8 = vadd.f32 0.05243302, %v853_v13 }
 0x199   :  { %vm797_vm4 = vmor %vm795_vm3, %vm796_vm2  ;;  %v865_v29 = vadd.f32 0.112945676, %v864_v30  ;;  %v887_v33 = vmul.f32 %v5402_v47, %v5402_v47  ;;  %v818_v4 = vadd.f32 1.1283791, %v817_v39  ;;  %v752_v13 = vmul.f32 0.5, %v5347_v9 }
 0x19a   :  { %v792_v23 = vsub.f32 1.0, %v791_v11  ;;  %4327 = vrcp.f32 %v5393_v22  ;;  %v855_v55 = vmul.f32 %v854_v8, %v5379_v45  ;;  %v839_v59 = vand.u32 2147483647, %v5393_v22 }
 0x19b   :  { %v866_v50 = vmul.f32 %v865_v29, %v5379_v45  ;;  %v5410_v40 = vmin.f32 %v887_v33, 16.0  ;;  %v841_v20 = vand.u32 2147483648, %v5393_v22  ;;  %vm835_vm7 = vweird.f32 %v5393_v22 }
 0x19c   :  { %v793_v35 = vmul.f32 %v4326_v63, %v792_v23  ;;  %v856_v11 = vadd.f32 0.18741608, %v855_v55  ;;  %v819_v24 = vmul.f32 %v818_v4, %v5352_v19  ;;  %vm840_vm9 = vcmp.eq.f32.partialorder %v839_v59, 8.507059e+37 }
 0x19d   :  { %v867_v41 = vadd.f32 0.4994258, %v866_v50  ;;  %v889_v37 = vmul.f32 2.1237322e-06, %v5410_v40  ;;  %v900_v26 = vmul.f32 3.8918573e-05, %v5410_v40 }
 0x19e   :  { %v794_v52 = vadd.f32 %v4326_v63, %v793_v35  ;;  %v842_v15 = vor.u32 1.1754944e-38, %v841_v20  ;;  %v857_v25 = vmul.f32 %v856_v11, %v5379_v45 }
 0x19f   :  { %v868_v10 = vmul.f32 %v867_v41, %v5379_v45  ;;  %v890_v57 = vadd.f32 0.00028619796, %v889_v37  ;;  %v901_v46 = vadd.f32 0.001143296, %v900_v26 }
 0x1a0   :  { %v798_v31 = vsel %vm797_vm4, %v4326_v63, %v794_v52  ;;  %v4328_v44 = vpop.eup %4327  ;;  %v739_v6 = vpop.f32.mrf.mxu1  ;;  %v858_v29 = vadd.f32 1.1283791, %v857_v25 }
 0x1a1   :  { %v803_v60 = vsel %vm800_vm5, %v802_v28, %v798_v31  ;;  %v831_v53 = vmul.f32 %v4328_v44, %v5393_v22  ;;  %vm836_vm6 = vweird.f32 %v4328_v44  ;;  %v5420_v62 = vadd.f32 1.0, %v868_v10 }
 0x1a2   :  { %v804_v38 = vmul.f32 %v803_v60, %v779_v32  ;;  %v891_v63 = vmul.f32 %v890_v57, %v5410_v40  ;;  %v5424_v5 = vadd.f32 %v5332_v48, %v739_v6  ;;  %vm837_vm8 = vmor %vm835_vm7, %vm836_vm6  ;;  %v902_v61 = vmul.f32 %v901_v46, %v5410_v40 }
 0x1a3   :  { %v832_v16 = vsub.f32 1.0, %v831_v53  ;;  %4329 = vrcp.f32 %v5420_v62  ;;  %v879_v37 = vand.u32 2147483647, %v5420_v62  ;;  %vm875_vm11 = vweird.f32 %v5420_v62 }
 0x1a4   :  { %v4098_v49 = vclamps-f32 %v804_v38, 1.0  ;;  %v892_v12 = vadd.f32 0.0036580483, %v891_v63  ;;  %v5428_v14 = vmul.f32 0.70710677, %v5424_v5  ;;  %v881_v38 = vand.u32 2147483648, %v5420_v62 }
 0x1a5   :  { %v833_v51 = vmul.f32 %v4328_v44, %v832_v16  ;;  %v903_v27 = vadd.f32 0.014752088, %v902_v61  ;;  %v859_v6 = vmul.f32 %v858_v29, %v5369_v36  ;;  %vm880_vm13 = vcmp.eq.f32.partialorder %v879_v37, 8.507059e+37 }
 0x1a6   :  { %v1087_v58 = vadd.f32 1.0, %v4098_v49  ;;  %v927_v23 = vmul.f32 %v5428_v14, %v5428_v14  ;;  %v893_v18 = vmul.f32 %v892_v12, %v5410_v40  ;;  %v753_v36 = vmul.f32 0.5, %v5364_v54 }
 0x1a7   :  { %v834_v56 = vadd.f32 %v4328_v44, %v833_v51  ;;  %v904_v7 = vmul.f32 %v903_v27, %v5410_v40 }
 0x1a8   :  { %v1095_v34 = vmul.f32 %v1087_v58, %v751_v43  ;;  %v5438_v35 = vmin.f32 %v927_v23, 16.0  ;;  %v894_v33 = vadd.f32 0.05243302, %v893_v18  ;;  %v882_v58 = vor.u32 1.1754944e-38, %v881_v38 }
 0x1a9   :  { %v838_v17 = vsel %vm837_vm8, %v4328_v44, %v834_v56  ;;  %v4330_v30 = vpop.eup %4329  ;;  %v905_v32 = vadd.f32 0.112945676, %v904_v7 }
 0x1aa   :  { %1139 = vmatmul.f32.vlgmr.msra.gmra.mxu2 %v1095_v34  ;;  %v843_v21 = vsel %vm840_vm9, %v842_v15, %v838_v17  ;;  %v929_v19 = vmul.f32 2.1237322e-06, %v5438_v35  ;;  %v871_v28 = vmul.f32 %v4330_v30, %v5420_v62  ;;  %v940_v45 = vmul.f32 3.8918573e-05, %v5438_v35  ;;  %v742_v39 = vpop.f32.mrf.mxu3 }
 0x1ab   :  { %v844_v22 = vmul.f32 %v843_v21, %v819_v24  ;;  %v5446_v50 = vadd.f32 %v5332_v48, %v742_v39  ;;  %v906_v9 = vmul.f32 %v905_v32, %v5410_v40  ;;  %vm876_vm10 = vweird.f32 %v4330_v30 }
 0x1ac   :  { %v930_v31 = vadd.f32 0.00028619796, %v929_v19  ;;  %v872_v60 = vsub.f32 1.0, %v871_v28  ;;  %v941_v44 = vadd.f32 0.001143296, %v940_v45  ;;  %v895_v55 = vmul.f32 %v894_v33, %v5410_v40  ;;  %vm877_vm12 = vmor %vm875_vm11, %vm876_vm10 }
 0x1ad   :  { %v4099_v52 = vclamps-f32 %v844_v22, 1.0  ;;  %v5452_v49 = vmul.f32 0.70710677, %v5446_v50  ;;  %v907_v53 = vadd.f32 0.4994258, %v906_v9 }
 0x1ae   :  { %v873_v43 = vmul.f32 %v4330_v30, %v872_v60  ;;  %v942_v4 = vmul.f32 %v941_v44, %v5438_v35  ;;  %v931_v10 = vmul.f32 %v930_v31, %v5438_v35  ;;  %v896_v34 = vadd.f32 0.18741608, %v895_v55 }
 0x1af   :  { %v1088_v8 = vadd.f32 1.0, %v4099_v52  ;;  %v967_v57 = vmul.f32 %v5452_v49, %v5452_v49  ;;  %v908_v16 = vmul.f32 %v907_v53, %v5410_v40 }
 0x1b0   :  { %v874_v26 = vadd.f32 %v4330_v30, %v873_v43  ;;  %v943_v59 = vadd.f32 0.014752088, %v942_v4  ;;  %v932_v51 = vadd.f32 0.0036580483, %v931_v10  ;;  %v897_v23 = vmul.f32 %v896_v34, %v5410_v40 }
 0x1b1   :  { %v1096_v41 = vmul.f32 %v1088_v8, %v752_v13  ;;  %v909_v63 = vadd.f32 1.0, %v908_v16  ;;  %v5462_v56 = vmin.f32 %v967_v57, 16.0 }
 0x1b2   :  { %v878_v20 = vsel %vm877_vm12, %v4330_v30, %v874_v26  ;;  %v745_v11 = vpop.f32.mrf.mxu3  ;;  %v944_v15 = vmul.f32 %v943_v59, %v5438_v35  ;;  %v933_v17 = vmul.f32 %v932_v51, %v5438_v35  ;;  %v898_v52 = vadd.f32 1.1283791, %v897_v23 }
 0x1b3   :  { %1142 = vmatmul.f32.gmra.mxu2 %v1096_v41  ;;  %v883_v46 = vsel %vm880_vm13, %v882_v58, %v878_v20  ;;  %v5465_v62 = vadd.f32 %v5332_v48, %v745_v11  ;;  %4331 = vrcp.f32 %v909_v63  ;;  %v969_v21 = vmul.f32 2.1237322e-06, %v5462_v56 }
 0x1b4   :  { %v884_v12 = vmul.f32 %v883_v46, %v859_v6  ;;  %v945_v18 = vadd.f32 0.112945676, %v944_v15  ;;  %v980_v22 = vmul.f32 3.8918573e-05, %v5462_v56  ;;  %v934_v40 = vadd.f32 0.05243302, %v933_v17 }
 0x1b5   :  { %v5469_v24 = vmul.f32 0.70710677, %v5465_v62  ;;  %v970_v32 = vadd.f32 0.00028619796, %v969_v21  ;;  %v919_v8 = vand.u32 2147483647, %v909_v63  ;;  %vm915_vm14 = vweird.f32 %v909_v63 }
 0x1b6   :  { %v4100_v61 = vclamps-f32 %v884_v12, 1.0  ;;  %v946_v19 = vmul.f32 %v945_v18, %v5438_v35  ;;  %v981_v54 = vadd.f32 0.001143296, %v980_v22  ;;  %v921_v41 = vand.u32 2147483648, %v909_v63 }
 0x1b7   :  { %v1007_v27 = vmul.f32 %v5469_v24, %v5469_v24  ;;  %v971_v4 = vmul.f32 %v970_v32, %v5462_v56  ;;  %v935_v26 = vmul.f32 %v934_v40, %v5438_v35  ;;  %v899_v59 = vmul.f32 %v898_v52, %v5402_v47 }
 0x1b8   :  { %v1089_v25 = vadd.f32 1.0, %v4100_v61  ;;  %v947_v60 = vadd.f32 0.4994258, %v946_v19  ;;  %v982_v38 = vmul.f32 %v981_v54, %v5462_v56  ;;  %v922_v46 = vor.u32 1.1754944e-38, %v921_v41 }
 0x1b9   :  { %v4332_v7 = vpop.eup %4331  ;;  %v5478_v13 = vmin.f32 %v1007_v27, 16.0  ;;  %vm920_vm1 = vcmp.eq.f32.partialorder %v919_v8, 8.507059e+37  ;;  %v972_v11 = vadd.f32 0.0036580483, %v971_v4 }
 0x1ba   :  { %v1097_v30 = vmul.f32 %v1089_v25, %v753_v36  ;;  %v748_v28 = vpop.f32.mrf.mxu3  ;;  %v911_v29 = vmul.f32 %v4332_v7, %v909_v63  ;;  %vm916_vm15 = vweird.f32 %v4332_v7  ;;  %v948_v53 = vmul.f32 %v947_v60, %v5438_v35 }
 0x1bb   :  { %v1009_v45 = vmul.f32 2.1237322e-06, %v5478_v13  ;;  %v1020_v33 = vmul.f32 3.8918573e-05, %v5478_v13  ;;  %v5484_v31 = vadd.f32 %v5332_v48, %v748_v28  ;;  %v983_v10 = vadd.f32 0.014752088, %v982_v38  ;;  %vm917_vm0 = vmor %vm915_vm14, %vm916_vm15 }
 0x1bc   :  { %1145 = vmatmul.f32.gmra.mxu2 %v1097_v30  ;;  %v912_v39 = vsub.f32 1.0, %v911_v29  ;;  %v5497_v16 = vadd.f32 1.0, %v948_v53  ;;  %v936_v36 = vadd.f32 0.18741608, %v935_v26  ;;  %v973_v21 = vmul.f32 %v972_v11, %v5462_v56 }
 0x1bd   :  { %v1010_v9 = vadd.f32 0.00028619796, %v1009_v45  ;;  %v1021_v44 = vadd.f32 0.001143296, %v1020_v33  ;;  %v5488_v43 = vmul.f32 0.70710677, %v5484_v31  ;;  %v984_v61 = vmul.f32 %v983_v10, %v5462_v56 }
 0x1be   :  { %v913_v37 = vmul.f32 %v4332_v7, %v912_v39  ;;  %4333 = vrcp.f32 %v5497_v16  ;;  %v754_v30 = vmul.f32 0.5, %v5396_v42  ;;  %v974_v39 = vadd.f32 0.05243302, %v973_v21 }
 0x1bf   :  { %v1011_v48 = vmul.f32 %v1010_v9, %v5478_v13  ;;  %v1022_v55 = vmul.f32 %v1021_v44, %v5478_v13  ;;  %v1047_v57 = vmul.f32 %v5488_v43, %v5488_v43  ;;  %v985_v18 = vadd.f32 0.112945676, %v984_v61 }
 0x1c0   :  { %v914_v58 = vadd.f32 %v4332_v7, %v913_v37  ;;  %v961_v42 = vand.u32 2147483648, %v5497_v16  ;;  %v959_v4 = vand.u32 2147483647, %v5497_v16  ;;  %v975_v10 = vmul.f32 %v974_v39, %v5462_v56 }
 0x1c1   :  { %v1012_v6 = vadd.f32 0.0036580483, %v1011_v48  ;;  %v1023_v20 = vadd.f32 0.014752088, %v1022_v55  ;;  %v5501_v34 = vmin.f32 %v1047_v57, 16.0  ;;  %v986_v45 = vmul.f32 %v985_v18, %v5462_v56 }
 0x1c2   :  { %v918_v51 = vsel %vm917_vm0, %v4332_v7, %v914_v58  ;;  %v937_v7 = vmul.f32 %v936_v36, %v5438_v35  ;;  %vm955_vm3 = vweird.f32 %v5497_v16  ;;  %vm960_vm5 = vcmp.eq.f32.partialorder %v959_v4, 8.507059e+37 }
 0x1c3   :  { %v1024_v12 = vmul.f32 %v1023_v20, %v5478_v13  ;;  %v923_v15 = vsel %vm920_vm1, %v922_v46, %v918_v51  ;;  %v1013_v47 = vmul.f32 %v1012_v6, %v5478_v13  ;;  %v1049_v63 = vmul.f32 2.1237322e-06, %v5501_v34 }
 0x1c4   :  { %v924_v23 = vmul.f32 %v923_v15, %v899_v59  ;;  %v4334_v22 = vpop.eup %4333  ;;  %v1060_v54 = vmul.f32 3.8918573e-05, %v5501_v34  ;;  %v938_v38 = vadd.f32 1.1283791, %v937_v7  ;;  %v987_v35 = vadd.f32 0.4994258, %v986_v45 }
 0x1c5   :  { %v1025_v17 = vadd.f32 0.112945676, %v1024_v12  ;;  %v1014_v52 = vadd.f32 0.05243302, %v1013_v47  ;;  %v1050_v28 = vadd.f32 0.00028619796, %v1049_v63  ;;  %v951_v29 = vmul.f32 %v4334_v22, %v5497_v16 }
 0x1c6   :  { %v4101_v25 = vclamps-f32 %v924_v23, 1.0  ;;  %v1061_v33 = vadd.f32 0.001143296, %v1060_v54  ;;  %vm956_vm2 = vweird.f32 %v4334_v22  ;;  %v988_v48 = vmul.f32 %v987_v35, %v5462_v56 }
 0x1c7   :  { %v1026_v27 = vmul.f32 %v1025_v17, %v5478_v13  ;;  %v952_v60 = vsub.f32 1.0, %v951_v29  ;;  %v1015_v44 = vmul.f32 %v1014_v52, %v5478_v13  ;;  %v1051_v37 = vmul.f32 %v1050_v28, %v5501_v34  ;;  %vm957_vm4 = vmor %vm955_vm3, %vm956_vm2 }
 0x1c8   :  { %v1090_v19 = vadd.f32 1.0, %v4101_v25  ;;  %v1062_v9 = vmul.f32 %v1061_v33, %v5501_v34  ;;  %v989_v57 = vadd.f32 1.0, %v988_v48  ;;  %v962_v6 = vor.u32 1.1754944e-38, %v961_v42 }
 0x1c9   :  { %v1027_v40 = vadd.f32 0.4994258, %v1026_v27  ;;  %v953_v53 = vmul.f32 %v4334_v22, %v952_v60  ;;  %v1016_v58 = vadd.f32 0.18741608, %v1015_v44  ;;  %v1052_v59 = vadd.f32 0.0036580483, %v1051_v37 }
 0x1ca   :  { %v1098_v32 = vmul.f32 %v1090_v19, %v754_v30  ;;  %v1063_v55 = vadd.f32 0.014752088, %v1062_v9  ;;  %v939_v46 = vmul.f32 %v938_v38, %v5428_v14  ;;  %v976_v11 = vadd.f32 0.18741608, %v975_v10 }
 0x1cb   :  { %v1028_v8 = vmul.f32 %v1027_v40, %v5478_v13  ;;  %v954_v26 = vadd.f32 %v4334_v22, %v953_v53  ;;  %v1017_v23 = vmul.f32 %v1016_v58, %v5478_v13  ;;  %v1053_v16 = vmul.f32 %v1052_v59, %v5501_v34 }
 0x1cc   :  { %1148 = vmatmul.f32.gmra.mxu2 %v1098_v32  ;;  %v1064_v20 = vmul.f32 %v1063_v55, %v5501_v34  ;;  %v977_v63 = vmul.f32 %v976_v11, %v5462_v56  ;;  %v755_v14 = vmul.f32 0.5, %v5424_v5  ;;  %v1001_v5 = vand.u32 2147483648, %v989_v57 }
 0x1cd   :  { %v1029_v41 = vadd.f32 1.0, %v1028_v8  ;;  %v958_v51 = vsel %vm957_vm4, %v4334_v22, %v954_v26  ;;  %v1018_v30 = vadd.f32 1.1283791, %v1017_v23  ;;  %v1054_v7 = vadd.f32 0.05243302, %v1053_v16 }
 0x1ce   :  { %v963_v12 = vsel %vm960_vm5, %v962_v6, %v958_v51  ;;  %v1065_v61 = vadd.f32 0.112945676, %v1064_v20  ;;  %v978_v28 = vadd.f32 1.1283791, %v977_v63  ;;  %v999_v39 = vand.u32 2147483647, %v989_v57 }
 0x1cf   :  { %4335 = vrcp.f32 %v1029_v41  ;;  %v964_v15 = vmul.f32 %v963_v12, %v939_v46  ;;  %v1041_v18 = vand.u32 2147483648, %v1029_v41  ;;  %v1039_v13 = vand.u32 2147483647, %v1029_v41 }
 0x1d0   :  { %4337 = vrcp.f32 %v989_v57  ;;  %v1066_v25 = vmul.f32 %v1065_v61, %v5501_v34  ;;  %vm1035_vm7 = vweird.f32 %v1029_v41  ;;  %v1019_v60 = vmul.f32 %v1018_v30, %v5469_v24 }
 0x1d1   :  { %v4102_v17 = vclamps-f32 %v964_v15, 1.0  ;;  %v1042_v45 = vor.u32 1.1754944e-38, %v1041_v18  ;;  %vm1040_vm10 = vcmp.eq.f32.partialorder %v1039_v13, 8.507059e+37  ;;  %v1055_v42 = vmul.f32 %v1054_v7, %v5501_v34 }
 0x1d2   :  { %v1067_v54 = vadd.f32 0.4994258, %v1066_v25  ;;  %vm995_vm11 = vweird.f32 %v989_v57  ;;  %v979_v37 = vmul.f32 %v978_v28, %v5452_v49  ;;  %vm1000_vm13 = vcmp.eq.f32.partialorder %v999_v39, 8.507059e+37 }
 0x1d3   :  { %v1091_v22 = vadd.f32 1.0, %v4102_v17  ;;  %v1056_v4 = vadd.f32 0.18741608, %v1055_v42  ;;  %v757_v24 = vmul.f32 0.5, %v5465_v62  ;;  %v756_v46 = vmul.f32 0.5, %v5446_v50 }
 0x1d4   :  { %v1068_v56 = vmul.f32 %v1067_v54, %v5501_v34  ;;  %v758_v63 = vmul.f32 0.5, %v5484_v31 }
 0x1d5   :  { %v4336_v36 = vpop.eup %4335  ;;  %v1099_v40 = vmul.f32 %v1091_v22, %v755_v14  ;;  %v1057_v6 = vmul.f32 %v1056_v4, %v5501_v34  ;;  %v5543_v14 = vld [vmem:[%s6454_s15] ss:$0 sm:$0xff] }
 0x1d6   :  { %v1031_v47 = vmul.f32 %v4336_v36, %v1029_v41  ;;  %v4338_v21 = vpop.eup %4337  ;;  %vm1036_vm6 = vweird.f32 %v4336_v36  ;;  %v1069_v8 = vadd.f32 1.0, %v1068_v56  ;;  %v1002_v41 = vor.u32 1.1754944e-38, %v1001_v5 }
 0x1d7   :  { %v991_v19 = vmul.f32 %v4338_v21, %v989_v57  ;;  %1151 = vmatmul.f32.gmra.mxu2 %v1099_v40  ;;  %vm1037_vm8 = vmor %vm1035_vm7, %vm1036_vm6  ;;  %vm996_vm9 = vweird.f32 %v4338_v21  ;;  %v1058_v15 = vadd.f32 1.1283791, %v1057_v6 }
 0x1d8   :  { %v1032_v27 = vsub.f32 1.0, %v1031_v47  ;;  %4339 = vrcp.f32 %v1069_v8  ;;  %vm997_vm12 = vmor %vm995_vm11, %vm996_vm9  ;;  %v1081_v12 = vand.u32 2147483648, %v1069_v8  ;;  %vm1075_vm15 = vweird.f32 %v1069_v8 }
 0x1d9   :  { %v992_v29 = vsub.f32 1.0, %v991_v19  ;;  %v1059_v34 = vmul.f32 %v1058_v15, %v5488_v43 }
 0x1da   :  { %v1033_v52 = vmul.f32 %v4336_v36, %v1032_v27  ;;  %v1082_v23 = vor.u32 1.1754944e-38, %v1081_v12 }
 0x1db   :  { %v993_v33 = vmul.f32 %v4338_v21, %v992_v29 }
 0x1dc   :  { %v1034_v32 = vadd.f32 %v4336_v36, %v1033_v52 }
 0x1dd   :  { %v994_v9 = vadd.f32 %v4338_v21, %v993_v33 }
 0x1de   :  { %v1038_v38 = vsel %vm1037_vm8, %v4336_v36, %v1034_v32  ;;  %v4340_v58 = vpop.eup %4339  ;;  %v1079_v36 = vand.u32 2147483647, %v1069_v8 }
 0x1df   :  { %v1043_v35 = vsel %vm1040_vm10, %v1042_v45, %v1038_v38  ;;  %v998_v53 = vsel %vm997_vm12, %v4338_v21, %v994_v9  ;;  %v1071_v20 = vmul.f32 %v4340_v58, %v1069_v8  ;;  %vm1076_vm14 = vweird.f32 %v4340_v58 }
 0x1e0   :  { %v1044_v44 = vmul.f32 %v1043_v35, %v1019_v60  ;;  %v1003_v48 = vsel %vm1000_vm13, %v1002_v41, %v998_v53  ;;  %vm1077_vm0 = vmor %vm1075_vm15, %vm1076_vm14  ;;  %vm1080_vm1 = vcmp.eq.f32.partialorder %v1079_v36, 8.507059e+37 }
 0x1e1   :  { %v1004_v10 = vmul.f32 %v1003_v48, %v979_v37  ;;  %v1072_v49 = vsub.f32 1.0, %v1071_v20 }
 0x1e2   :  { %v4104_v55 = vclamps-f32 %v1044_v44, 1.0 }
 0x1e3   :  { %v4103_v59 = vclamps-f32 %v1004_v10, 1.0  ;;  %v1073_v61 = vmul.f32 %v4340_v58, %v1072_v49 }
 0x1e4   :  { %v1093_v26 = vadd.f32 1.0, %v4104_v55 }
 0x1e5   :  { %v1092_v51 = vadd.f32 1.0, %v4103_v59  ;;  %v1074_v62 = vadd.f32 %v4340_v58, %v1073_v61 }
 0x1e6   :  { %v1101_v57 = vmul.f32 %v1093_v26, %v757_v24 }
 0x1e7   :  { %v1100_v11 = vmul.f32 %v1092_v51, %v756_v46  ;;  %v1078_v16 = vsel %vm1077_vm0, %v4340_v58, %v1074_v62 }
 0x1e8   :  { %1157 = vmatmul.f32.vlgmr.msrb.gmra.mxu3 %v1101_v57  ;;  %v1083_v47 = vsel %vm1080_vm1, %v1082_v23, %v1078_v16 }
 0x1e9   :  { %1154 = vmatmul.f32.gmra.mxu2 %v1100_v11  ;;  %v1084_v50 = vmul.f32 %v1083_v47, %v1059_v34 }
 0x1eb   :  { %v4105_v17 = vclamps-f32 %v1084_v50, 1.0 }
 0x1ed   :  { %v1094_v25 = vadd.f32 1.0, %v4105_v17 }
 0x1ef   :  { %v1102_v21 = vmul.f32 %v1094_v25, %v758_v63 }
 0x1f1   :  { %1160 = vmatmul.f32.gmra.mxu3 %v1102_v21 }
 0x22d   :  { %v1140_v27 = vpop.f32.mrf.mxu2 }
 0x22e   :  { %v5546_v18 = vadd.f32 %v5543_v14, %v1140_v27 }
 0x230   :  { %v5549_v43 = vmul.f32 0.70710677, %v5546_v18 }
 0x232   :  { %v1180_v22 = vmul.f32 %v5549_v43, %v5549_v43 }
 0x234   :  { %v1181_v30 = vmin.f32 %v1180_v22, 16.0 }
 0x236   :  { %v1182_v31 = vmul.f32 2.1237322e-06, %v1181_v30  ;;  %v1193_v7 = vmul.f32 3.8918573e-05, %v1181_v30  ;;  %v1143_v52 = vpop.f32.mrf.mxu2 }
 0x237   :  { %v5554_v28 = vadd.f32 %v5543_v14, %v1143_v52 }
 0x238   :  { %v1183_v19 = vadd.f32 0.00028619796, %v1182_v31  ;;  %v1194_v54 = vadd.f32 0.001143296, %v1193_v7 }
 0x239   :  { %v5557_v32 = vmul.f32 0.70710677, %v5554_v28 }
 0x23a   :  { %v1184_v13 = vmul.f32 %v1183_v19, %v1181_v30  ;;  %v1195_v40 = vmul.f32 %v1194_v54, %v1181_v30 }
 0x23b   :  { %v1220_v33 = vmul.f32 %v5557_v32, %v5557_v32 }
 0x23c   :  { %v1185_v29 = vadd.f32 0.0036580483, %v1184_v13  ;;  %v1196_v56 = vadd.f32 0.014752088, %v1195_v40 }
 0x23d   :  { %v5561_v8 = vmin.f32 %v1220_v33, 16.0 }
 0x23e   :  { %v1197_v45 = vmul.f32 %v1196_v56, %v1181_v30  ;;  %v1186_v5 = vmul.f32 %v1185_v29, %v1181_v30 }
 0x23f   :  { %v1222_v42 = vmul.f32 2.1237322e-06, %v5561_v8  ;;  %v1233_v35 = vmul.f32 3.8918573e-05, %v5561_v8  ;;  %v1146_v37 = vpop.f32.mrf.mxu2 }
 0x240   :  { %v1198_v39 = vadd.f32 0.112945676, %v1197_v45  ;;  %v1187_v38 = vadd.f32 0.05243302, %v1186_v5  ;;  %v5566_v4 = vadd.f32 %v5543_v14, %v1146_v37 }
 0x241   :  { %v1223_v44 = vadd.f32 0.00028619796, %v1222_v42  ;;  %v1234_v41 = vadd.f32 0.001143296, %v1233_v35 }
 0x242   :  { %v1199_v60 = vmul.f32 %v1198_v39, %v1181_v30  ;;  %v1188_v48 = vmul.f32 %v1187_v38, %v1181_v30  ;;  %v5571_v26 = vmul.f32 0.70710677, %v5566_v4 }
 0x243   :  { %v1224_v55 = vmul.f32 %v1223_v44, %v5561_v8  ;;  %v1235_v10 = vmul.f32 %v1234_v41, %v5561_v8 }
 0x244   :  { %v1200_v9 = vadd.f32 0.4994258, %v1199_v60  ;;  %v1189_v6 = vadd.f32 0.18741608, %v1188_v48  ;;  %v1260_v20 = vmul.f32 %v5571_v26, %v5571_v26 }
 0x245   :  { %v1225_v58 = vadd.f32 0.0036580483, %v1224_v55  ;;  %v1236_v59 = vadd.f32 0.014752088, %v1235_v10 }
 0x246   :  { %v1201_v53 = vmul.f32 %v1200_v9, %v1181_v30  ;;  %v5577_v49 = vmin.f32 %v1260_v20, 16.0  ;;  %v1190_v11 = vmul.f32 %v1189_v6, %v1181_v30 }
 0x247   :  { %v1237_v57 = vmul.f32 %v1236_v59, %v5561_v8  ;;  %v1226_v46 = vmul.f32 %v1225_v58, %v5561_v8 }
 0x248   :  { %v1202_v24 = vadd.f32 1.0, %v1201_v53  ;;  %v1262_v15 = vmul.f32 2.1237322e-06, %v5577_v49  ;;  %v1273_v61 = vmul.f32 3.8918573e-05, %v5577_v49  ;;  %v1164_v53 = vmul.f32 0.5, %v5546_v18 }
 0x249   :  { %v1238_v51 = vadd.f32 0.112945676, %v1237_v57  ;;  %v1227_v62 = vadd.f32 0.05243302, %v1226_v46  ;;  %v1191_v50 = vadd.f32 1.1283791, %v1190_v11 }
 0x24a   :  { %4341 = vrcp.f32 %v1202_v24  ;;  %v1263_v16 = vadd.f32 0.00028619796, %v1262_v15  ;;  %v1274_v47 = vadd.f32 0.001143296, %v1273_v61  ;;  %v1214_v25 = vand.u32 2147483648, %v1202_v24 }
 0x24b   :  { %v1239_v12 = vmul.f32 %v1238_v51, %v5561_v8  ;;  %v1228_v21 = vmul.f32 %v1227_v62, %v5561_v8  ;;  %v1212_v31 = vand.u32 2147483647, %v1202_v24  ;;  %vm1208_vm3 = vweird.f32 %v1202_v24 }
 0x24c   :  { %v1264_v27 = vmul.f32 %v1263_v16, %v5577_v49  ;;  %v1275_v22 = vmul.f32 %v1274_v47, %v5577_v49  ;;  %v1215_v40 = vor.u32 1.1754944e-38, %v1214_v25  ;;  %v1192_v45 = vmul.f32 %v1191_v50, %v5549_v43 }
 0x24d   :  { %v1240_v34 = vadd.f32 0.4994258, %v1239_v12  ;;  %v1229_v29 = vadd.f32 0.18741608, %v1228_v21  ;;  %vm1213_vm5 = vcmp.eq.f32.partialorder %v1212_v31, 8.507059e+37 }
 0x24e   :  { %v1276_v19 = vadd.f32 0.014752088, %v1275_v22  ;;  %v1265_v52 = vadd.f32 0.0036580483, %v1264_v27 }
 0x24f   :  { %v1241_v63 = vmul.f32 %v1240_v34, %v5561_v8  ;;  %v1149_v13 = vpop.f32.mrf.mxu2  ;;  %v1230_v9 = vmul.f32 %v1229_v29, %v5561_v8 }
 0x250   :  { %v4342_v36 = vpop.eup %4341  ;;  %v1277_v56 = vmul.f32 %v1276_v19, %v5577_v49  ;;  %v5589_v33 = vadd.f32 %v5543_v14, %v1149_v13  ;;  %v1266_v38 = vmul.f32 %v1265_v52, %v5577_v49  ;;  %v1165_v52 = vmul.f32 0.5, %v5554_v28 }
 0x251   :  { %v1204_v23 = vmul.f32 %v4342_v36, %v1202_v24  ;;  %vm1209_vm2 = vweird.f32 %v4342_v36  ;;  %v1242_v7 = vadd.f32 1.0, %v1241_v63  ;;  %v1231_v59 = vadd.f32 1.1283791, %v1230_v9 }
 0x252   :  { %vm1210_vm4 = vmor %vm1208_vm3, %vm1209_vm2  ;;  %v1278_v42 = vadd.f32 0.112945676, %v1277_v56  ;;  %v5593_v35 = vmul.f32 0.70710677, %v5589_v33  ;;  %v1267_v10 = vadd.f32 0.05243302, %v1266_v38 }
 0x253   :  { %v1205_v17 = vsub.f32 1.0, %v1204_v23  ;;  %4343 = vrcp.f32 %v1242_v7  ;;  %v1254_v57 = vand.u32 2147483648, %v1242_v7  ;;  %v1252_v12 = vand.u32 2147483647, %v1242_v7 }
 0x254   :  { %v1279_v37 = vmul.f32 %v1278_v42, %v5577_v49  ;;  %v1300_v43 = vmul.f32 %v5593_v35, %v5593_v35  ;;  %v1268_v18 = vmul.f32 %v1267_v10, %v5577_v49  ;;  %vm1248_vm7 = vweird.f32 %v1242_v7 }
 0x255   :  { %v1206_v30 = vmul.f32 %v4342_v36, %v1205_v17  ;;  %v1232_v23 = vmul.f32 %v1231_v59, %v5557_v32  ;;  %v1255_v34 = vor.u32 1.1754944e-38, %v1254_v57  ;;  %vm1253_vm9 = vcmp.eq.f32.partialorder %v1252_v12, 8.507059e+37 }
 0x256   :  { %v1280_v24 = vadd.f32 0.4994258, %v1279_v37  ;;  %v5600_v58 = vmin.f32 %v1300_v43, 16.0  ;;  %v1269_v63 = vadd.f32 0.18741608, %v1268_v18 }
 0x257   :  { %v1207_v54 = vadd.f32 %v4342_v36, %v1206_v30 }
 0x258   :  { %v1281_v8 = vmul.f32 %v1280_v24, %v5577_v49  ;;  %v1302_v46 = vmul.f32 2.1237322e-06, %v5600_v58  ;;  %v1313_v51 = vmul.f32 3.8918573e-05, %v5600_v58 }
 0x259   :  { %v1211_v5 = vsel %vm1210_vm4, %v4342_v36, %v1207_v54  ;;  %v4344_v44 = vpop.eup %4343 }
 0x25a   :  { %v1216_v39 = vsel %vm1213_vm5, %v1215_v40, %v1211_v5  ;;  %v1244_v48 = vmul.f32 %v4344_v44, %v1242_v7  ;;  %vm1249_vm6 = vweird.f32 %v4344_v44  ;;  %v1282_v15 = vadd.f32 1.0, %v1281_v8  ;;  %v1152_v25 = vpop.f32.mrf.mxu2 }
 0x25b   :  { %v1217_v60 = vmul.f32 %v1216_v39, %v1192_v45  ;;  %v1303_v61 = vadd.f32 0.00028619796, %v1302_v46  ;;  %v1314_v36 = vadd.f32 0.001143296, %v1313_v51  ;;  %vm1250_vm8 = vmor %vm1248_vm7, %vm1249_vm6  ;;  %v5610_v30 = vadd.f32 %v5543_v14, %v1152_v25 }
 0x25c   :  { %v1245_v6 = vsub.f32 1.0, %v1244_v48  ;;  %4345 = vrcp.f32 %v1282_v15  ;;  %v1270_v40 = vmul.f32 %v1269_v63, %v5577_v49  ;;  %v1294_v38 = vand.u32 2147483648, %v1282_v15 }
 0x25d   :  { %v4106_v41 = vclamps-f32 %v1217_v60, 1.0  ;;  %v1304_v47 = vmul.f32 %v1303_v61, %v5600_v58  ;;  %v1315_v50 = vmul.f32 %v1314_v36, %v5600_v58  ;;  %v5615_v54 = vmul.f32 0.70710677, %v5610_v30 }
 0x25e   :  { %v1246_v11 = vmul.f32 %v4344_v44, %v1245_v6  ;;  %v1292_v28 = vand.u32 2147483647, %v1282_v15  ;;  %vm1288_vm11 = vweird.f32 %v1282_v15 }
 0x25f   :  { %v1500_v55 = vadd.f32 1.0, %v4106_v41  ;;  %v1305_v27 = vadd.f32 0.0036580483, %v1304_v47  ;;  %v1316_v22 = vadd.f32 0.014752088, %v1315_v50  ;;  %v1340_v45 = vmul.f32 %v5615_v54, %v5615_v54 }
 0x260   :  { %v1247_v62 = vadd.f32 %v4344_v44, %v1246_v11  ;;  %vm1293_vm13 = vcmp.eq.f32.partialorder %v1292_v28, 8.507059e+37 }
 0x261   :  { %v1508_v20 = vmul.f32 %v1500_v55, %v1164_v53  ;;  %v1306_v32 = vmul.f32 %v1305_v27, %v5600_v58  ;;  %v1317_v7 = vmul.f32 %v1316_v22, %v5600_v58  ;;  %v5622_v9 = vmin.f32 %v1340_v45, 16.0 }
 0x262   :  { %v1251_v16 = vsel %vm1250_vm8, %v4344_v44, %v1247_v62  ;;  %v4346_v19 = vpop.eup %4345  ;;  %v1271_v44 = vadd.f32 1.1283791, %v1270_v40  ;;  %v1295_v55 = vor.u32 1.1754944e-38, %v1294_v38 }
 0x263   :  { %1516 = vst [vmem:[#allocation2] sm:$0xff] %v1508_v20  ;;  %v1256_v17 = vsel %vm1253_vm9, %v1255_v34, %v1251_v16  ;;  %v1284_v29 = vmul.f32 %v4346_v19, %v1282_v15  ;;  %v1318_v56 = vadd.f32 0.112945676, %v1317_v7  ;;  %v1307_v60 = vadd.f32 0.05243302, %v1306_v32 }
 0x264   :  { %v1257_v21 = vmul.f32 %v1256_v17, %v1232_v23  ;;  %vm1289_vm10 = vweird.f32 %v4346_v19  ;;  %v1342_v49 = vmul.f32 2.1237322e-06, %v5622_v9  ;;  %v1353_v43 = vmul.f32 3.8918573e-05, %v5622_v9 }
 0x265   :  { %v1285_v39 = vsub.f32 1.0, %v1284_v29  ;;  %v1319_v42 = vmul.f32 %v1318_v56, %v5600_v58  ;;  %v1308_v48 = vmul.f32 %v1307_v60, %v5600_v58  ;;  %vm1290_vm12 = vmor %vm1288_vm11, %vm1289_vm10  ;;  %v1272_v57 = vmul.f32 %v1271_v44, %v5571_v26 }
 0x266   :  { %v4107_v31 = vclamps-f32 %v1257_v21, 1.0  ;;  %v1343_v24 = vadd.f32 0.00028619796, %v1342_v49  ;;  %v1354_v59 = vadd.f32 0.001143296, %v1353_v43  ;;  %v1166_v16 = vmul.f32 0.5, %v5566_v4 }
 0x267   :  { %v1286_v41 = vmul.f32 %v4346_v19, %v1285_v39  ;;  %v1320_v37 = vadd.f32 0.4994258, %v1319_v42  ;;  %v1309_v15 = vadd.f32 0.18741608, %v1308_v48 }
 0x268   :  { %v1501_v13 = vadd.f32 1.0, %v4107_v31  ;;  %v1344_v11 = vmul.f32 %v1343_v24, %v5622_v9  ;;  %v1355_v12 = vmul.f32 %v1354_v59, %v5622_v9 }
 0x269   :  { %v1287_v53 = vadd.f32 %v4346_v19, %v1286_v41  ;;  %v1321_v10 = vmul.f32 %v1320_v37, %v5600_v58  ;;  %v1310_v17 = vmul.f32 %v1309_v15, %v5600_v58 }
 0x26a   :  { %v1509_v5 = vmul.f32 %v1501_v13, %v1165_v52  ;;  %v1345_v26 = vadd.f32 0.0036580483, %v1344_v11  ;;  %v1356_v23 = vadd.f32 0.014752088, %v1355_v12 }
 0x26b   :  { %v1158_v6 = vpop.f32.mrf.mxu3  ;;  %v1291_v20 = vsel %vm1290_vm12, %v4346_v19, %v1287_v53  ;;  %v1322_v51 = vadd.f32 1.0, %v1321_v10  ;;  %v1311_v58 = vadd.f32 1.1283791, %v1310_v17 }
 0x26c   :  { %1517 = vst [vmem:[#allocation2 + $0x8] sm:$0xff] %v1509_v5  ;;  %v5630_v8 = vadd.f32 %v5543_v14, %v1158_v6  ;;  %v1296_v46 = vsel %vm1293_vm13, %v1295_v55, %v1291_v20  ;;  %v1155_v61 = vpop.f32.mrf.mxu2  ;;  %v1346_v63 = vmul.f32 %v1345_v26, %v5622_v9  ;;  %v1357_v25 = vmul.f32 %v1356_v23, %v5622_v9 }
 0x26d   :  { %v1297_v18 = vmul.f32 %v1296_v46, %v1272_v57  ;;  %4347 = vrcp.f32 %v1322_v51  ;;  %v5638_v34 = vadd.f32 %v5543_v14, %v1155_v61  ;;  %v1332_v39 = vand.u32 2147483647, %v1322_v51 }
 0x26e   :  { %v5635_v36 = vmul.f32 0.70710677, %v5630_v8  ;;  %v1358_v31 = vadd.f32 0.112945676, %v1357_v25  ;;  %v1347_v13 = vadd.f32 0.05243302, %v1346_v63  ;;  %vm1328_vm15 = vweird.f32 %v1322_v51 }
 0x26f   :  { %v4108_v62 = vclamps-f32 %v1297_v18, 1.0  ;;  %v5647_v21 = vmul.f32 0.70710677, %v5638_v34  ;;  %v1334_v60 = vand.u32 2147483648, %v1322_v51  ;;  %v1312_v57 = vmul.f32 %v1311_v58, %v5593_v35 }
 0x270   :  { %v1420_v47 = vmul.f32 %v5635_v36, %v5635_v36  ;;  %v1359_v40 = vmul.f32 %v1358_v31, %v5622_v9  ;;  %v1348_v49 = vmul.f32 %v1347_v13, %v5622_v9  ;;  %vm1333_vm1 = vcmp.eq.f32.partialorder %v1332_v39, 8.507059e+37 }
 0x271   :  { %v1502_v50 = vadd.f32 1.0, %v4108_v62  ;;  %v1380_v4 = vmul.f32 %v5647_v21, %v5647_v21  ;;  %v1335_v20 = vor.u32 1.1754944e-38, %v1334_v60  ;;  %v1167_v63 = vmul.f32 0.5, %v5589_v33 }
 0x272   :  { %v5649_v27 = vmin.f32 %v1420_v47, 16.0  ;;  %v1360_v38 = vadd.f32 0.4994258, %v1359_v40  ;;  %v1349_v18 = vadd.f32 0.18741608, %v1348_v49 }
 0x273   :  { %v1510_v22 = vmul.f32 %v1502_v50, %v1166_v16  ;;  %v4348_v32 = vpop.eup %4347  ;;  %v5656_v29 = vmin.f32 %v1380_v4, 16.0 }
 0x274   :  { %v1422_v7 = vmul.f32 2.1237322e-06, %v5649_v27  ;;  %v1433_v19 = vmul.f32 3.8918573e-05, %v5649_v27  ;;  %v1324_v52 = vmul.f32 %v4348_v32, %v1322_v51  ;;  %vm1329_vm14 = vweird.f32 %v4348_v32  ;;  %v1161_v6 = vpop.f32.mrf.mxu3 }
 0x275   :  { %1518 = vst [vmem:[#allocation2 + $0x10] sm:$0xff] %v1510_v22  ;;  %v1382_v42 = vmul.f32 2.1237322e-06, %v5656_v29  ;;  %v1393_v44 = vmul.f32 3.8918573e-05, %v5656_v29  ;;  %v1361_v43 = vmul.f32 %v1360_v38, %v5622_v9  ;;  %vm1330_vm0 = vmor %vm1328_vm15, %vm1329_vm14  ;;  %v5672_v61 = vadd.f32 %v5543_v14, %v1161_v6 }
 0x276   :  { %v1423_v56 = vadd.f32 0.00028619796, %v1422_v7  ;;  %v1434_v45 = vadd.f32 0.001143296, %v1433_v19  ;;  %v1325_v5 = vsub.f32 1.0, %v1324_v52  ;;  %v1350_v47 = vmul.f32 %v1349_v18, %v5622_v9 }
 0x277   :  { %v1383_v53 = vadd.f32 0.00028619796, %v1382_v42  ;;  %v1394_v48 = vadd.f32 0.001143296, %v1393_v44  ;;  %v5664_v24 = vadd.f32 1.0, %v1361_v43 }
 0x278   :  { %v1424_v41 = vmul.f32 %v1423_v56, %v5649_v27  ;;  %v1435_v28 = vmul.f32 %v1434_v45, %v5649_v27  ;;  %v1326_v37 = vmul.f32 %v4348_v32, %v1325_v5  ;;  %v5679_v22 = vmul.f32 0.70710677, %v5672_v61 }
 0x279   :  { %v1384_v46 = vmul.f32 %v1383_v53, %v5656_v29  ;;  %v1395_v11 = vmul.f32 %v1394_v48, %v5656_v29  ;;  %4349 = vrcp.f32 %v5664_v24  ;;  %v1351_v52 = vadd.f32 1.1283791, %v1350_v47 }
 0x27a   :  { %v1425_v55 = vadd.f32 0.0036580483, %v1424_v41  ;;  %v1327_v10 = vadd.f32 %v4348_v32, %v1326_v37  ;;  %v1436_v59 = vadd.f32 0.014752088, %v1435_v28  ;;  %v1460_v9 = vmul.f32 %v5679_v22, %v5679_v22 }
 0x27b   :  { %v1385_v26 = vadd.f32 0.0036580483, %v1384_v46  ;;  %v1396_v35 = vadd.f32 0.014752088, %v1395_v11  ;;  %v1372_v56 = vand.u32 2147483647, %v5664_v24  ;;  %vm1368_vm3 = vweird.f32 %v5664_v24 }
 0x27c   :  { %v1331_v12 = vsel %vm1330_vm0, %v4348_v32, %v1327_v10  ;;  %v1426_v51 = vmul.f32 %v1425_v55, %v5649_v27  ;;  %v1437_v23 = vmul.f32 %v1436_v59, %v5649_v27  ;;  %v1374_v45 = vand.u32 2147483648, %v5664_v24 }
 0x27d   :  { %v1336_v15 = vsel %vm1333_vm1, %v1335_v20, %v1331_v12  ;;  %v1397_v50 = vmul.f32 %v1396_v35, %v5656_v29  ;;  %v1386_v32 = vmul.f32 %v1385_v26, %v5656_v29  ;;  %v5689_v5 = vmin.f32 %v1460_v9, 16.0 }
 0x27e   :  { %v1337_v62 = vmul.f32 %v1336_v15, %v1312_v57  ;;  %v1438_v17 = vadd.f32 0.112945676, %v1437_v23  ;;  %v1427_v25 = vadd.f32 0.05243302, %v1426_v51  ;;  %v1375_v53 = vor.u32 1.1754944e-38, %v1374_v45 }
 0x27f   :  { %v4350_v31 = vpop.eup %4349  ;;  %v1398_v4 = vadd.f32 0.112945676, %v1397_v50  ;;  %v1387_v39 = vadd.f32 0.05243302, %v1386_v32  ;;  %v1462_v41 = vmul.f32 2.1237322e-06, %v5689_v5  ;;  %v1352_v6 = vmul.f32 %v1351_v52, %v5615_v54 }
 0x280   :  { %v4109_v16 = vclamps-f32 %v1337_v62, 1.0  ;;  %v1439_v7 = vmul.f32 %v1438_v17, %v5649_v27  ;;  %v1364_v19 = vmul.f32 %v4350_v31, %v5664_v24  ;;  %v1428_v38 = vmul.f32 %v1427_v25, %v5649_v27 }
 0x281   :  { %v1399_v33 = vmul.f32 %v1398_v4, %v5656_v29  ;;  %vm1369_vm2 = vweird.f32 %v4350_v31  ;;  %v1473_v28 = vmul.f32 3.8918573e-05, %v5689_v5  ;;  %v1463_v48 = vadd.f32 0.00028619796, %v1462_v41 }
 0x282   :  { %v1503_v14 = vadd.f32 1.0, %v4109_v16  ;;  %v1440_v13 = vadd.f32 0.4994258, %v1439_v7  ;;  %v1365_v40 = vsub.f32 1.0, %v1364_v19  ;;  %vm1370_vm4 = vmor %vm1368_vm3, %vm1369_vm2  ;;  %v1388_v55 = vmul.f32 %v1387_v39, %v5656_v29 }
 0x283   :  { %v1400_v60 = vadd.f32 0.4994258, %v1399_v33  ;;  %v1474_v59 = vadd.f32 0.001143296, %v1473_v28  ;;  %vm1373_vm5 = vcmp.eq.f32.partialorder %v1372_v56, 8.507059e+37  ;;  %v1464_v12 = vmul.f32 %v1463_v48, %v5689_v5 }
 0x284   :  { %v1511_v58 = vmul.f32 %v1503_v14, %v1167_v63  ;;  %v1441_v42 = vmul.f32 %v1440_v13, %v5649_v27  ;;  %v1366_v44 = vmul.f32 %v4350_v31, %v1365_v40  ;;  %v1429_v20 = vadd.f32 0.18741608, %v1428_v38 }
 0x285   :  { %v1401_v37 = vmul.f32 %v1400_v60, %v5656_v29  ;;  %v1389_v18 = vadd.f32 0.18741608, %v1388_v55  ;;  %v1475_v24 = vmul.f32 %v1474_v59, %v5689_v5  ;;  %v1168_v35 = vmul.f32 0.5, %v5610_v30 }
 0x286   :  { %1519 = vst [vmem:[#allocation2 + $0x18] sm:$0xff] %v1511_v58  ;;  %v1442_v49 = vadd.f32 1.0, %v1441_v42  ;;  %v1367_v43 = vadd.f32 %v4350_v31, %v1366_v44  ;;  %v1430_v51 = vmul.f32 %v1429_v20, %v5649_v27  ;;  %v1465_v16 = vadd.f32 0.0036580483, %v1464_v12 }
 0x287   :  { %v1402_v10 = vadd.f32 1.0, %v1401_v37  ;;  %v1476_v26 = vadd.f32 0.014752088, %v1475_v24  ;;  %v1390_v50 = vmul.f32 %v1389_v18, %v5656_v29  ;;  %v1170_v59 = vmul.f32 0.5, %v5630_v8 }
 0x288   :  { %4351 = vrcp.f32 %v1442_v49  ;;  %v1371_v57 = vsel %vm1370_vm4, %v4350_v31, %v1367_v43  ;;  %v1431_v31 = vadd.f32 1.1283791, %v1430_v51  ;;  %v1452_v32 = vand.u32 2147483647, %v1442_v49 }
 0x289   :  { %v1376_v46 = vsel %vm1373_vm5, %v1375_v53, %v1371_v57  ;;  %4353 = vrcp.f32 %v1402_v10  ;;  %v1477_v17 = vmul.f32 %v1476_v26, %v5689_v5  ;;  %v1454_v4 = vand.u32 2147483648, %v1442_v49 }
 0x28a   :  { %v1377_v11 = vmul.f32 %v1376_v46, %v1352_v6  ;;  %v1466_v30 = vmul.f32 %v1465_v16, %v5689_v5  ;;  %v1391_v9 = vadd.f32 1.1283791, %v1390_v50  ;;  %v1414_v58 = vand.u32 2147483648, %v1402_v10 }
 0x28b   :  { %v1478_v7 = vadd.f32 0.112945676, %v1477_v17  ;;  %vm1448_vm7 = vweird.f32 %v1442_v49  ;;  %v1412_v33 = vand.u32 2147483647, %v1402_v10  ;;  %vm1408_vm9 = vweird.f32 %v1402_v10 }
 0x28c   :  { %v4110_v15 = vclamps-f32 %v1377_v11, 1.0  ;;  %v1432_v40 = vmul.f32 %v1431_v31, %v5635_v36  ;;  %v1455_v56 = vor.u32 1.1754944e-38, %v1454_v4  ;;  %vm1453_vm11 = vcmp.eq.f32.partialorder %v1452_v32, 8.507059e+37 }
 0x28d   :  { %v1479_v29 = vmul.f32 %v1478_v7, %v5689_v5  ;;  %v1467_v38 = vadd.f32 0.05243302, %v1466_v30  ;;  %v1415_v42 = vor.u32 1.1754944e-38, %v1414_v58  ;;  %v1392_v28 = vmul.f32 %v1391_v9, %v5647_v21 }
 0x28e   :  { %v4352_v62 = vpop.eup %4351  ;;  %v1504_v23 = vadd.f32 1.0, %v4110_v15  ;;  %vm1413_vm13 = vcmp.eq.f32.partialorder %v1412_v33, 8.507059e+37  ;;  %v1169_v57 = vmul.f32 0.5, %v5638_v34  ;;  %v5718_v31 = vmov 0.0  }
 0x28f   :  { %v1444_v54 = vmul.f32 %v4352_v62, %v1442_v49  ;;  %v4354_v47 = vpop.eup %4353  ;;  %vm1449_vm6 = vweird.f32 %v4352_v62  ;;  %v1480_v45 = vadd.f32 0.4994258, %v1479_v29  ;;  %v1468_v55 = vmul.f32 %v1467_v38, %v5689_v5 }
 0x290   :  { %v1512_v63 = vmul.f32 %v1504_v23, %v1168_v35  ;;  %v1404_v25 = vmul.f32 %v4354_v47, %v1402_v10  ;;  %vm1409_vm8 = vweird.f32 %v4354_v47  ;;  %vm1450_vm10 = vmor %vm1448_vm7, %vm1449_vm6  ;;  %v5722_v32 = vmov 0.0  }
 0x291   :  { %v1445_v14 = vsub.f32 1.0, %v1444_v54  ;;  %vm1410_vm12 = vmor %vm1408_vm9, %vm1409_vm8  ;;  %v1481_v41 = vmul.f32 %v1480_v45, %v5689_v5  ;;  %v1469_v11 = vadd.f32 0.18741608, %v1468_v55 }
 0x292   :  { %1520 = vst [vmem:[#allocation2 + $0x20] sm:$0xff] %v1512_v63  ;;  %v1405_v27 = vsub.f32 1.0, %v1404_v25  ;;  %v5716_v25 = vmov 0.0  }
 0x293   :  { %v1446_v19 = vmul.f32 %v4352_v62, %v1445_v14  ;;  %v1482_v53 = vadd.f32 1.0, %v1481_v41  ;;  %v1470_v18 = vmul.f32 %v1469_v11, %v5689_v5  ;;  %v1171_v5 = vmul.f32 0.5, %v5672_v61 }
 0x294   :  { %v1406_v52 = vmul.f32 %v4354_v47, %v1405_v27  ;;  %v5720_v14 = vmov 0.0  }
 0x295   :  { %v1447_v13 = vadd.f32 %v4352_v62, %v1446_v19  ;;  %4355 = vrcp.f32 %v1482_v53  ;;  %v1494_v51 = vand.u32 2147483648, %v1482_v53  ;;  %v1492_v35 = vand.u32 2147483647, %v1482_v53 }
 0x296   :  { %v1407_v39 = vadd.f32 %v4354_v47, %v1406_v52  ;;  %vm1488_vm15 = vweird.f32 %v1482_v53 }
 0x297   :  { %v1451_v60 = vsel %vm1450_vm10, %v4352_v62, %v1447_v13  ;;  %v1471_v62 = vadd.f32 1.1283791, %v1470_v18  ;;  %v1495_v34 = vor.u32 1.1754944e-38, %v1494_v51  ;;  %vm1493_vm1 = vcmp.eq.f32.partialorder %v1492_v35, 8.507059e+37 }
 0x298   :  { %v1456_v44 = vsel %vm1453_vm11, %v1455_v56, %v1451_v60  ;;  %v1411_v37 = vsel %vm1410_vm12, %v4354_v47, %v1407_v39 }
 0x299   :  { %v1457_v49 = vmul.f32 %v1456_v44, %v1432_v40  ;;  %v1416_v43 = vsel %vm1413_vm13, %v1415_v42, %v1411_v37  ;;  %v1472_v23 = vmul.f32 %v1471_v62, %v5679_v22 }
 0x29a   :  { %v1417_v36 = vmul.f32 %v1416_v43, %v1392_v28 }
 0x29b   :  { %v4112_v48 = vclamps-f32 %v1457_v49, 1.0  ;;  %v4356_v12 = vpop.eup %4355 }
 0x29c   :  { %v4111_v10 = vclamps-f32 %v1417_v36, 1.0  ;;  %v1484_v24 = vmul.f32 %v4356_v12, %v1482_v53  ;;  %vm1489_vm14 = vweird.f32 %v4356_v12 }
 0x29d   :  { %v1506_v6 = vadd.f32 1.0, %v4112_v48  ;;  %vm1490_vm0 = vmor %vm1488_vm15, %vm1489_vm14 }
 0x29e   :  { %v1505_v20 = vadd.f32 1.0, %v4111_v10  ;;  %v1485_v15 = vsub.f32 1.0, %v1484_v24 }
 0x29f   :  { %v1514_v46 = vmul.f32 %v1506_v6, %v1170_v59 }
 0x2a0   :  { %v1513_v21 = vmul.f32 %v1505_v20, %v1169_v57  ;;  %v1486_v26 = vmul.f32 %v4356_v12, %v1485_v15 }
 0x2a1   :  { %1522 = vst [vmem:[#allocation2 + $0x30] sm:$0xff] %v1514_v46 }
 0x2a2   :  { %1521 = vst [vmem:[#allocation2 + $0x28] sm:$0xff] %v1513_v21  ;;  %v1487_v8 = vadd.f32 %v4356_v12, %v1486_v26 }
 0x2a4   :  { %v1491_v54 = vsel %vm1490_vm0, %v4356_v12, %v1487_v8 }
 0x2a5   :  { %v1496_v16 = vsel %vm1493_vm1, %v1495_v34, %v1491_v54 }
 0x2a6   :  { %v1497_v47 = vmul.f32 %v1496_v16, %v1472_v23 }
 0x2a8   :  { %v4113_v50 = vclamps-f32 %v1497_v47, 1.0 }
 0x2aa   :  { %v1507_v17 = vadd.f32 1.0, %v4113_v50 }
 0x2ac   :  { %v1515_v63 = vmul.f32 %v1507_v17, %v1171_v5 }
 0x2ae   :  { %1523 = vst [vmem:[#allocation2 + $0x38] sm:$0xff] %v1515_v63 }
 0x2af LB: > { %v1663_v61 = vld [vmem:[#allocation10 + $0x1e0] sm:$0xff]  ;;  %v1664_v22 = vld [vmem:[#allocation10 + $0x1e8] sm:$0xff]  ;;  %v1666_v4 = vld [vmem:[#allocation10 + $0x1f8] sm:$0xff]  ;;  %s4114_s2 = sshll.u32 %s4820_s10, 3  ;;  %s4820_s10 = sphi %s5724_s10, %s1529_s10   ;;  %v4816_v32 = vphi %v5722_v32, %v5771_v32   ;;  %v4812_v14 = vphi %v5720_v14, %v5766_v14   ;;  %v4808_v31 = vphi %v5718_v31, %v6456_v31   ;;  %v4804_v25 = vphi %v5716_v25, %v2277_v25  }
 0x2b0   : > { %1667 = vmatpush.msra.mxu0 %v1663_v61  ;;  %1687 = vmatpush.msra.mxu1 %v1664_v22  ;;  %v1659_v7 = vld [vmem:[#allocation10 + $0x1c0] sm:$0xff]  ;;  %v1660_v27 = vld [vmem:[#allocation10 + $0x1c8] sm:$0xff]  ;;  %v1662_v19 = vld [vmem:[#allocation10 + $0x1d8] sm:$0xff]  ;;  %s1537_s30 = scalar_lea.vmem [#allocation2], %s4114_s2 }
 0x2b1   : > { %1727 = vmatpush.msra.mxu3 %v1666_v4  ;;  %v1655_v30 = vld [vmem:[#allocation10 + $0x1a0] sm:$0xff]  ;;  %v1656_v9 = vld [vmem:[#allocation10 + $0x1a8] sm:$0xff]  ;;  %v1658_v58 = vld [vmem:[#allocation10 + $0x1b8] sm:$0xff] }
 0x2b2   : > { %1668 = vmatpush.msra.mxu0 %v1659_v7  ;;  %1688 = vmatpush.msra.mxu1 %v1660_v27  ;;  %v1651_v29 = vld [vmem:[#allocation10 + $0x180] sm:$0xff]  ;;  %v1652_v52 = vld [vmem:[#allocation10 + $0x188] sm:$0xff]  ;;  %v1665_v33 = vld [vmem:[#allocation10 + $0x1f0] sm:$0xff] }
 0x2b3   : > { %1728 = vmatpush.msra.mxu3 %v1662_v19  ;;  %v1654_v13 = vld [vmem:[#allocation10 + $0x198] sm:$0xff]  ;;  %v1661_v40 = vld [vmem:[#allocation10 + $0x1d0] sm:$0xff]  ;;  %1707 = vmatpush.msra.mxu2 %v1665_v33  ;;  %v1647_v56 = vld [vmem:[#allocation10 + $0x160] sm:$0xff] }
 0x2b4   : > { %1669 = vmatpush.msra.mxu0 %v1655_v30  ;;  %1689 = vmatpush.msra.mxu1 %v1656_v9  ;;  %v1648_v45 = vld [vmem:[#allocation10 + $0x168] sm:$0xff]  ;;  %v1650_v39 = vld [vmem:[#allocation10 + $0x178] sm:$0xff]  ;;  %v1657_v60 = vld [vmem:[#allocation10 + $0x1b0] sm:$0xff] }
 0x2b5   : > { %1729 = vmatpush.msra.mxu3 %v1658_v58  ;;  %1708 = vmatpush.msra.mxu2 %v1661_v40  ;;  %v1643_v38 = vld [vmem:[#allocation10 + $0x140] sm:$0xff]  ;;  %v1644_v42 = vld [vmem:[#allocation10 + $0x148] sm:$0xff]  ;;  %v1646_v44 = vld [vmem:[#allocation10 + $0x158] sm:$0xff] }
 0x2b6   : > { %1670 = vmatpush.msra.mxu0 %v1651_v29  ;;  %1690 = vmatpush.msra.mxu1 %v1652_v52  ;;  %v1653_v41 = vld [vmem:[#allocation10 + $0x190] sm:$0xff]  ;;  %v1639_v28 = vld [vmem:[#allocation10 + $0x120] sm:$0xff]  ;;  %v1640_v37 = vld [vmem:[#allocation10 + $0x128] sm:$0xff] }
 0x2b7   : > { %1730 = vmatpush.msra.mxu3 %v1654_v13  ;;  %1709 = vmatpush.msra.mxu2 %v1657_v60  ;;  %v1642_v49 = vld [vmem:[#allocation10 + $0x138] sm:$0xff]  ;;  %v1649_v43 = vld [vmem:[#allocation10 + $0x170] sm:$0xff]  ;;  %v1635_v53 = vld [vmem:[#allocation10 + $0x100] sm:$0xff] }
 0x2b8   : > { %1671 = vmatpush.msra.mxu0 %v1647_v56  ;;  %1691 = vmatpush.msra.mxu1 %v1648_v45  ;;  %v1636_v36 = vld [vmem:[#allocation10 + $0x108] sm:$0xff]  ;;  %v1638_v48 = vld [vmem:[#allocation10 + $0x118] sm:$0xff]  ;;  %v1645_v55 = vld [vmem:[#allocation10 + $0x150] sm:$0xff] }
 0x2b9   : > { %1731 = vmatpush.msra.mxu3 %v1650_v39  ;;  %1710 = vmatpush.msra.mxu2 %v1653_v41  ;;  %v1631_v10 = vld [vmem:[#allocation10 + $0xe0] sm:$0xff]  ;;  %v1632_v59 = vld [vmem:[#allocation10 + $0xe8] sm:$0xff]  ;;  %v1634_v6 = vld [vmem:[#allocation10 + $0xf8] sm:$0xff] }
 0x2ba   : > { %1672 = vmatpush.msra.mxu0 %v1643_v38  ;;  %1692 = vmatpush.msra.mxu1 %v1644_v42  ;;  %v1641_v57 = vld [vmem:[#allocation10 + $0x130] sm:$0xff]  ;;  %v1627_v20 = vld [vmem:[#allocation10 + $0xc0] sm:$0xff]  ;;  %v1628_v46 = vld [vmem:[#allocation10 + $0xc8] sm:$0xff] }
 0x2bb   : > { %1732 = vmatpush.msra.mxu3 %v1646_v44  ;;  %1711 = vmatpush.msra.mxu2 %v1649_v43  ;;  %v1630_v11 = vld [vmem:[#allocation10 + $0xd8] sm:$0xff]  ;;  %v1637_v21 = vld [vmem:[#allocation10 + $0x110] sm:$0xff]  ;;  %v1623_v12 = vld [vmem:[#allocation10 + $0xa0] sm:$0xff] }
 0x2bc   : > { %1673 = vmatpush.msra.mxu0 %v1639_v28  ;;  %1693 = vmatpush.msra.mxu1 %v1640_v37  ;;  %v1624_v18 = vld [vmem:[#allocation10 + $0xa8] sm:$0xff]  ;;  %v1626_v24 = vld [vmem:[#allocation10 + $0xb8] sm:$0xff]  ;;  %v1633_v15 = vld [vmem:[#allocation10 + $0xf0] sm:$0xff] }
 0x2bd   : > { %1733 = vmatpush.msra.mxu3 %v1642_v49  ;;  %1712 = vmatpush.msra.mxu2 %v1645_v55  ;;  %v1619_v51 = vld [vmem:[#allocation10 + $0x80] sm:$0xff]  ;;  %v1620_v62 = vld [vmem:[#allocation10 + $0x88] sm:$0xff]  ;;  %v1622_v26 = vld [vmem:[#allocation10 + $0x98] sm:$0xff] }
 0x2be   : > { %1674 = vmatpush.msra.mxu0 %v1635_v53  ;;  %1694 = vmatpush.msra.mxu1 %v1636_v36  ;;  %v1629_v35 = vld [vmem:[#allocation10 + $0xd0] sm:$0xff]  ;;  %v1615_v8 = vld [vmem:[#allocation10 + $0x60] sm:$0xff]  ;;  %v1616_v34 = vld [vmem:[#allocation10 + $0x68] sm:$0xff] }
 0x2bf   : > { %1734 = vmatpush.msra.mxu3 %v1638_v48  ;;  %1713 = vmatpush.msra.mxu2 %v1641_v57  ;;  %v1618_v23 = vld [vmem:[#allocation10 + $0x78] sm:$0xff]  ;;  %v1625_v54 = vld [vmem:[#allocation10 + $0xb0] sm:$0xff]  ;;  %v1611_v16 = vld [vmem:[#allocation10 + $0x40] sm:$0xff] }
 0x2c0   : > { %1675 = vmatpush.msra.mxu0 %v1631_v10  ;;  %1695 = vmatpush.msra.mxu1 %v1632_v59  ;;  %v1612_v47 = vld [vmem:[#allocation10 + $0x48] sm:$0xff]  ;;  %v1614_v50 = vld [vmem:[#allocation10 + $0x58] sm:$0xff]  ;;  %v1621_v5 = vld [vmem:[#allocation10 + $0x90] sm:$0xff] }
 0x2c1   : > { %1735 = vmatpush.msra.mxu3 %v1634_v6  ;;  %1714 = vmatpush.msra.mxu2 %v1637_v21  ;;  %v1607_v17 = vld [vmem:[#allocation10 + $0x20] sm:$0xff]  ;;  %v1608_v63 = vld [vmem:[#allocation10 + $0x28] sm:$0xff]  ;;  %v1610_v61 = vld [vmem:[#allocation10 + $0x38] sm:$0xff] }
 0x2c2   : > { %1676 = vmatpush.msra.mxu0 %v1627_v20  ;;  %1696 = vmatpush.msra.mxu1 %v1628_v46  ;;  %v1617_v22 = vld [vmem:[#allocation10 + $0x70] sm:$0xff]  ;;  %v1603_v4 = vld [vmem:[#allocation10] sm:$0xff]  ;;  %v1604_v7 = vld [vmem:[#allocation10 + $0x8] sm:$0xff] }
 0x2c3   : > { %1736 = vmatpush.msra.mxu3 %v1630_v11  ;;  %1715 = vmatpush.msra.mxu2 %v1633_v15  ;;  %v1606_v27 = vld [vmem:[#allocation10 + $0x18] sm:$0xff]  ;;  %v1599_v19 = vld [vmem:[#allocation9 + $0x1e0] sm:$0xff]  ;;  %v1600_v30 = vld [vmem:[#allocation9 + $0x1e8] sm:$0xff] }
 0x2c4   : > { %1677 = vmatpush.msra.mxu0 %v1623_v12  ;;  %1697 = vmatpush.msra.mxu1 %v1624_v18  ;;  %v1602_v9 = vld [vmem:[#allocation9 + $0x1f8] sm:$0xff]  ;;  %v1613_v58 = vld [vmem:[#allocation10 + $0x50] sm:$0xff]  ;;  %v1595_v29 = vld [vmem:[#allocation9 + $0x1c0] sm:$0xff] }
 0x2c5   : > { %1737 = vmatpush.msra.mxu3 %v1626_v24  ;;  %1716 = vmatpush.msra.mxu2 %v1629_v35  ;;  %v1596_v52 = vld [vmem:[#allocation9 + $0x1c8] sm:$0xff]  ;;  %v1598_v33 = vld [vmem:[#allocation9 + $0x1d8] sm:$0xff]  ;;  %v1609_v13 = vld [vmem:[#allocation10 + $0x30] sm:$0xff] }
 0x2c6   : > { %1678 = vmatpush.msra.mxu0 %v1619_v51  ;;  %1698 = vmatpush.msra.mxu1 %v1620_v62  ;;  %v1591_v40 = vld [vmem:[#allocation9 + $0x1a0] sm:$0xff]  ;;  %v1592_v56 = vld [vmem:[#allocation9 + $0x1a8] sm:$0xff]  ;;  %v1594_v45 = vld [vmem:[#allocation9 + $0x1b8] sm:$0xff] }
 0x2c7   : > { %1738 = vmatpush.msra.mxu3 %v1622_v26  ;;  %1717 = vmatpush.msra.mxu2 %v1625_v54  ;;  %v1605_v39 = vld [vmem:[#allocation10 + $0x10] sm:$0xff]  ;;  %v1587_v60 = vld [vmem:[#allocation9 + $0x180] sm:$0xff]  ;;  %v1588_v38 = vld [vmem:[#allocation9 + $0x188] sm:$0xff] }
 0x2c8   : > { %1679 = vmatpush.msra.mxu0 %v1615_v8  ;;  %1699 = vmatpush.msra.mxu1 %v1616_v34  ;;  %v1590_v42 = vld [vmem:[#allocation9 + $0x198] sm:$0xff]  ;;  %v1601_v44 = vld [vmem:[#allocation9 + $0x1f0] sm:$0xff]  ;;  %v1583_v41 = vld [vmem:[#allocation9 + $0x160] sm:$0xff] }
 0x2c9   : > { %1739 = vmatpush.msra.mxu3 %v1618_v23  ;;  %1718 = vmatpush.msra.mxu2 %v1621_v5  ;;  %v1584_v28 = vld [vmem:[#allocation9 + $0x168] sm:$0xff]  ;;  %v1586_v37 = vld [vmem:[#allocation9 + $0x178] sm:$0xff]  ;;  %v1597_v49 = vld [vmem:[#allocation9 + $0x1d0] sm:$0xff] }
 0x2ca   : > { %1680 = vmatpush.msra.mxu0 %v1611_v16  ;;  %1700 = vmatpush.msra.mxu1 %v1612_v47  ;;  %v1579_v43 = vld [vmem:[#allocation9 + $0x140] sm:$0xff]  ;;  %v1580_v53 = vld [vmem:[#allocation9 + $0x148] sm:$0xff]  ;;  %v1582_v36 = vld [vmem:[#allocation9 + $0x158] sm:$0xff] }
 0x2cb   : > { %1740 = vmatpush.msra.mxu3 %v1614_v50  ;;  %1719 = vmatpush.msra.mxu2 %v1617_v22  ;;  %v1593_v48 = vld [vmem:[#allocation9 + $0x1b0] sm:$0xff]  ;;  %v1575_v55 = vld [vmem:[#allocation9 + $0x120] sm:$0xff]  ;;  %v1576_v10 = vld [vmem:[#allocation9 + $0x128] sm:$0xff] }
 0x2cc   : > { %1681 = vmatpush.msra.mxu0 %v1607_v17  ;;  %1701 = vmatpush.msra.mxu1 %v1608_v63  ;;  %v1578_v59 = vld [vmem:[#allocation9 + $0x138] sm:$0xff]  ;;  %v1589_v6 = vld [vmem:[#allocation9 + $0x190] sm:$0xff]  ;;  %v1571_v57 = vld [vmem:[#allocation9 + $0x100] sm:$0xff] }
 0x2cd   : > { %1741 = vmatpush.msra.mxu3 %v1610_v61  ;;  %1720 = vmatpush.msra.mxu2 %v1613_v58  ;;  %v1572_v20 = vld [vmem:[#allocation9 + $0x108] sm:$0xff]  ;;  %v1574_v46 = vld [vmem:[#allocation9 + $0x118] sm:$0xff]  ;;  %v1585_v11 = vld [vmem:[#allocation9 + $0x170] sm:$0xff] }
 0x2ce   : > { %1682 = vmatpush.msra.mxu0 %v1603_v4  ;;  %1702 = vmatpush.msra.mxu1 %v1604_v7  ;;  %v1567_v21 = vld [vmem:[#allocation9 + $0xe0] sm:$0xff]  ;;  %v1568_v12 = vld [vmem:[#allocation9 + $0xe8] sm:$0xff]  ;;  %v1570_v18 = vld [vmem:[#allocation9 + $0xf8] sm:$0xff] }
 0x2cf   : > { %1742 = vmatpush.msra.mxu3 %v1606_v27  ;;  %1721 = vmatpush.msra.mxu2 %v1609_v13  ;;  %v1581_v24 = vld [vmem:[#allocation9 + $0x150] sm:$0xff]  ;;  %v1563_v15 = vld [vmem:[#allocation9 + $0xc0] sm:$0xff]  ;;  %v1564_v51 = vld [vmem:[#allocation9 + $0xc8] sm:$0xff] }
 0x2d0   : > { %1747 = vmatpush.msrb.mxu0 %v1599_v19  ;;  %1767 = vmatpush.msrb.mxu1 %v1600_v30  ;;  %v1566_v62 = vld [vmem:[#allocation9 + $0xd8] sm:$0xff]  ;;  %v1577_v26 = vld [vmem:[#allocation9 + $0x130] sm:$0xff]  ;;  %v1559_v35 = vld [vmem:[#allocation9 + $0xa0] sm:$0xff] }
 0x2d1   : > { %1807 = vmatpush.msrb.mxu3 %v1602_v9  ;;  %1722 = vmatpush.msra.mxu2 %v1605_v39  ;;  %v1560_v8 = vld [vmem:[#allocation9 + $0xa8] sm:$0xff]  ;;  %v1562_v34 = vld [vmem:[#allocation9 + $0xb8] sm:$0xff]  ;;  %v1573_v23 = vld [vmem:[#allocation9 + $0x110] sm:$0xff] }
 0x2d2   : > { %1748 = vmatpush.msrb.mxu0 %v1595_v29  ;;  %1768 = vmatpush.msrb.mxu1 %v1596_v52  ;;  %v1555_v54 = vld [vmem:[#allocation9 + $0x80] sm:$0xff]  ;;  %v1556_v16 = vld [vmem:[#allocation9 + $0x88] sm:$0xff]  ;;  %v1558_v47 = vld [vmem:[#allocation9 + $0x98] sm:$0xff]  ;;  %v1534_v29 = vstv %s4820_s10  ;;  %s1529_s10 = sadd.s32 1, %s4820_s10  }
 0x2d3   : > { %1808 = vmatpush.msrb.mxu3 %v1598_v33  ;;  %1787 = vmatpush.msrb.mxu2 %v1601_v44  ;;  %v1569_v50 = vld [vmem:[#allocation9 + $0xf0] sm:$0xff]  ;;  %v1551_v5 = vld [vmem:[#allocation9 + $0x60] sm:$0xff]  ;;  %v1552_v17 = vld [vmem:[#allocation9 + $0x68] sm:$0xff]  ;;  %vm1535_vm2 = vcmp.lt.s32.totalorder %v1534_v29, %v5054_v0  ;;  %p1526_p0 = scmp.ge.s32.totalorder %s1529_s10, 8  }
 0x2d4   : > { %1749 = vmatpush.msrb.mxu0 %v1591_v40  ;;  %1769 = vmatpush.msrb.mxu1 %v1592_v56  ;;  %v1554_v63 = vld [vmem:[#allocation9 + $0x78] sm:$0xff]  ;;  %v1565_v61 = vld [vmem:[#allocation9 + $0xd0] sm:$0xff]  ;;  %v1547_v22 = vld [vmem:[#allocation9 + $0x40] sm:$0xff] }
 0x2d5   : > { %1809 = vmatpush.msrb.mxu3 %v1594_v45  ;;  %1788 = vmatpush.msrb.mxu2 %v1597_v49  ;;  %v1548_v4 = vld [vmem:[#allocation9 + $0x48] sm:$0xff]  ;;  %v1550_v7 = vld [vmem:[#allocation9 + $0x58] sm:$0xff]  ;;  %v1561_v27 = vld [vmem:[#allocation9 + $0xb0] sm:$0xff] }
 0x2d6   : > { %1750 = vmatpush.msrb.mxu0 %v1587_v60  ;;  %1770 = vmatpush.msrb.mxu1 %v1588_v38  ;;  %v1543_v19 = vld [vmem:[#allocation9 + $0x20] sm:$0xff]  ;;  %v1544_v30 = vld [vmem:[#allocation9 + $0x28] sm:$0xff]  ;;  %v1546_v9 = vld [vmem:[#allocation9 + $0x38] sm:$0xff]  ;;  %v4857_v60 = vmov 0  }
 0x2d7   : > { %1810 = vmatpush.msrb.mxu3 %v1590_v42  ;;  %1789 = vmatpush.msrb.mxu2 %v1593_v48  ;;  %v1557_v58 = vld [vmem:[#allocation9 + $0x90] sm:$0xff]  ;;  %v1539_v52 = vld [vmem:[#allocation9] sm:$0xff]  ;;  %v1540_v33 = vld [vmem:[#allocation9 + $0x8] sm:$0xff]  ;;  %v1903_v38 = vsel %vm1535_vm2, 1, %v4857_v60 }
 0x2d8   : > { %1751 = vmatpush.msrb.mxu0 %v1583_v41  ;;  %1771 = vmatpush.msrb.mxu1 %v1584_v28  ;;  %v1542_v13 = vld [vmem:[#allocation9 + $0x18] sm:$0xff]  ;;  %v1538_v40 = vld [vmem:[%s1537_s30] sm:$0xff]  ;;  %v1553_v56 = vld [vmem:[#allocation9 + $0x70] sm:$0xff] }
 0x2d9   : > { %1811 = vmatpush.msrb.mxu3 %v1586_v37  ;;  %1790 = vmatpush.msrb.mxu2 %v1589_v6  ;;  %v2036_v45 = vld [vmem:[#allocation10 + $0x3e0] sm:$0xff]  ;;  %v1549_v39 = vld [vmem:[#allocation9 + $0x50] sm:$0xff]  ;;  %v2037_v42 = vld [vmem:[#allocation10 + $0x3e8] sm:$0xff] }
 0x2da   : > { %1752 = vmatpush.msrb.mxu0 %v1579_v43  ;;  %1772 = vmatpush.msrb.mxu1 %v1580_v53  ;;  %v2039_v44 = vld [vmem:[#allocation10 + $0x3f8] sm:$0xff]  ;;  %v1545_v41 = vld [vmem:[#allocation9 + $0x30] sm:$0xff]  ;;  %v2032_v28 = vld [vmem:[#allocation10 + $0x3c0] sm:$0xff] }
 0x2db   : > { %1812 = vmatpush.msrb.mxu3 %v1582_v36  ;;  %1791 = vmatpush.msrb.mxu2 %v1585_v11  ;;  %v2033_v37 = vld [vmem:[#allocation10 + $0x3c8] sm:$0xff]  ;;  %v2035_v49 = vld [vmem:[#allocation10 + $0x3d8] sm:$0xff]  ;;  %v1541_v43 = vld [vmem:[#allocation9 + $0x10] sm:$0xff] }
 0x2dc   : > { %1753 = vmatpush.msrb.mxu0 %v1575_v55  ;;  %1773 = vmatpush.msrb.mxu1 %v1576_v10  ;;  %v2028_v53 = vld [vmem:[#allocation10 + $0x3a0] sm:$0xff]  ;;  %v2029_v36 = vld [vmem:[#allocation10 + $0x3a8] sm:$0xff]  ;;  %v2038_v48 = vld [vmem:[#allocation10 + $0x3f0] sm:$0xff] }
 0x2dd   : > { %1813 = vmatpush.msrb.mxu3 %v1578_v59  ;;  %1792 = vmatpush.msrb.mxu2 %v1581_v24  ;;  %v2031_v55 = vld [vmem:[#allocation10 + $0x3b8] sm:$0xff]  ;;  %v2024_v10 = vld [vmem:[#allocation10 + $0x380] sm:$0xff]  ;;  %v2025_v59 = vld [vmem:[#allocation10 + $0x388] sm:$0xff] }
 0x2de   : > { %1754 = vmatpush.msrb.mxu0 %v1571_v57  ;;  %1774 = vmatpush.msrb.mxu1 %v1572_v20  ;;  %v2034_v6 = vld [vmem:[#allocation10 + $0x3d0] sm:$0xff]  ;;  %v2027_v57 = vld [vmem:[#allocation10 + $0x398] sm:$0xff]  ;;  %v2020_v11 = vld [vmem:[#allocation10 + $0x360] sm:$0xff] }
 0x2df   : > { %1814 = vmatpush.msrb.mxu3 %v1574_v46  ;;  %1793 = vmatpush.msrb.mxu2 %v1577_v26  ;;  %v2030_v20 = vld [vmem:[#allocation10 + $0x3b0] sm:$0xff]  ;;  %v2016_v24 = vld [vmem:[#allocation10 + $0x340] sm:$0xff]  ;;  %v1993_v29 = vld [vmem:[#allocation10 + $0x288] sm:$0xff] }
 0x2e0   : > { %1755 = vmatpush.msrb.mxu0 %v1567_v21  ;;  %1775 = vmatpush.msrb.mxu1 %v1568_v12  ;;  %v2026_v46 = vld [vmem:[#allocation10 + $0x390] sm:$0xff]  ;;  %v2021_v21 = vld [vmem:[#allocation10 + $0x368] sm:$0xff]  ;;  %v2012_v26 = vld [vmem:[#allocation10 + $0x320] sm:$0xff] }
 0x2e1   : > { %1815 = vmatpush.msrb.mxu3 %v1570_v18  ;;  %1794 = vmatpush.msrb.mxu2 %v1573_v23  ;;  %v2022_v12 = vld [vmem:[#allocation10 + $0x370] sm:$0xff]  ;;  %v2023_v18 = vld [vmem:[#allocation10 + $0x378] sm:$0xff]  ;;  %v2008_v23 = vld [vmem:[#allocation10 + $0x300] sm:$0xff] }
 0x2e2   : > { %1756 = vmatpush.msrb.mxu0 %v1563_v15  ;;  %1776 = vmatpush.msrb.mxu1 %v1564_v51  ;;  %v2017_v15 = vld [vmem:[#allocation10 + $0x348] sm:$0xff]  ;;  %v2018_v51 = vld [vmem:[#allocation10 + $0x350] sm:$0xff] }
 0x2e3   : > { %1816 = vmatpush.msrb.mxu3 %v1566_v62  ;;  %1683 = vmatmul.f32.vlgmr.msra.gmra.mxu0 %v4816_v32  ;;  %v2019_v62 = vld [vmem:[#allocation10 + $0x358] sm:$0xff] }
 0x2e4   : > { %1757 = vmatpush.msrb.mxu0 %v1559_v35  ;;  %1777 = vmatpush.msrb.mxu1 %v1560_v8  ;;  %v2013_v35 = vld [vmem:[#allocation10 + $0x328] sm:$0xff]  ;;  %v2014_v8 = vld [vmem:[#allocation10 + $0x330] sm:$0xff] }
 0x2e5   : > { %1817 = vmatpush.msrb.mxu3 %v1562_v34  ;;  %1703 = vmatmul.f32.vlgmr.msra.gmra.mxu1 %v4816_v32  ;;  %v2015_v34 = vld [vmem:[#allocation10 + $0x338] sm:$0xff] }
 0x2e6   : > { %1758 = vmatpush.msrb.mxu0 %v1555_v54  ;;  %1778 = vmatpush.msrb.mxu1 %v1556_v16  ;;  %v2009_v54 = vld [vmem:[#allocation10 + $0x308] sm:$0xff]  ;;  %v2010_v16 = vld [vmem:[#allocation10 + $0x310] sm:$0xff] }
 0x2e7   : > { %1818 = vmatpush.msrb.mxu3 %v1558_v47  ;;  %1795 = vmatpush.msrb.mxu2 %v1569_v50  ;;  %v2011_v47 = vld [vmem:[#allocation10 + $0x318] sm:$0xff]  ;;  %v2004_v50 = vld [vmem:[#allocation10 + $0x2e0] sm:$0xff] }
 0x2e8   : > { %1743 = vmatmul.f32.vlgmr.msra.gmra.mxu3 %v4816_v32  ;;  %1759 = vmatpush.msrb.mxu0 %v1551_v5  ;;  %v2005_v5 = vld [vmem:[#allocation10 + $0x2e8] sm:$0xff] }
 0x2e9   : > { %1779 = vmatpush.msrb.mxu1 %v1552_v17  ;;  %1819 = vmatpush.msrb.mxu3 %v1554_v63  ;;  %v2006_v17 = vld [vmem:[#allocation10 + $0x2f0] sm:$0xff]  ;;  %v2007_v63 = vld [vmem:[#allocation10 + $0x2f8] sm:$0xff] }
 0x2ea   : > { %1796 = vmatpush.msrb.mxu2 %v1565_v61  ;;  %1760 = vmatpush.msrb.mxu0 %v1547_v22  ;;  %v2000_v61 = vld [vmem:[#allocation10 + $0x2c0] sm:$0xff]  ;;  %v2001_v22 = vld [vmem:[#allocation10 + $0x2c8] sm:$0xff] }
 0x2eb   : > { %1780 = vmatpush.msrb.mxu1 %v1548_v4  ;;  %1820 = vmatpush.msrb.mxu3 %v1550_v7  ;;  %v2002_v4 = vld [vmem:[#allocation10 + $0x2d0] sm:$0xff]  ;;  %v2003_v7 = vld [vmem:[#allocation10 + $0x2d8] sm:$0xff] }
 0x2ec   : > { %1797 = vmatpush.msrb.mxu2 %v1561_v27  ;;  %1761 = vmatpush.msrb.mxu0 %v1543_v19  ;;  %v1996_v27 = vld [vmem:[#allocation10 + $0x2a0] sm:$0xff]  ;;  %v1997_v19 = vld [vmem:[#allocation10 + $0x2a8] sm:$0xff] }
 0x2ed   : > { %1781 = vmatpush.msrb.mxu1 %v1544_v30  ;;  %1821 = vmatpush.msrb.mxu3 %v1546_v9  ;;  %v1998_v30 = vld [vmem:[#allocation10 + $0x2b0] sm:$0xff]  ;;  %v1999_v9 = vld [vmem:[#allocation10 + $0x2b8] sm:$0xff] }
 0x2ee   : > { %1798 = vmatpush.msrb.mxu2 %v1557_v58  ;;  %1762 = vmatpush.msrb.mxu0 %v1539_v52  ;;  %v1992_v58 = vld [vmem:[#allocation10 + $0x280] sm:$0xff]  ;;  %v1994_v52 = vld [vmem:[#allocation10 + $0x290] sm:$0xff] }
 0x2ef   : > { %1723 = vmatmul.f32.vlgmr.msra.gmra.mxu2 %v4816_v32  ;;  %1782 = vmatpush.msrb.mxu1 %v1540_v33  ;;  %v1995_v33 = vld [vmem:[#allocation10 + $0x298] sm:$0xff] }
 0x2f0   : > { %1822 = vmatpush.msrb.mxu3 %v1542_v13  ;;  %1763 = vmatmul.f32.vlgmr.msrb.gmra.mxu0 %v1538_v40  ;;  %v1988_v13 = vld [vmem:[#allocation10 + $0x260] sm:$0xff] }
 0x2f1   : > { %1783 = vmatmul.f32.vlgmr.msrb.gmra.mxu1 %v1538_v40  ;;  %1799 = vmatpush.msrb.mxu2 %v1553_v56  ;;  %v1990_v56 = vld [vmem:[#allocation10 + $0x270] sm:$0xff] }
 0x2f2   : > { %1823 = vmatmul.f32.vlgmr.msrb.gmra.mxu3 %v1538_v40  ;;  %4357 = vset.pattern.permute.xlu0 %v4857_v60  ;;  %v1985_v60 = vld [vmem:[#allocation10 + $0x248] sm:$0xff] }
 0x2f3   : > { %2040 = vmatpush.msra.mxu0 %v2036_v45  ;;  %1800 = vmatpush.msrb.mxu2 %v1549_v39  ;;  %v1991_v45 = vld [vmem:[#allocation10 + $0x278] sm:$0xff]  ;;  %v1984_v39 = vld [vmem:[#allocation10 + $0x240] sm:$0xff] }
 0x2f4   : > { %1905 = vperm.xlu0 %4357, %v1903_v38   ;;  %2060 = vmatpush.msra.mxu1 %v2037_v42  ;;  %v1986_v38 = vld [vmem:[#allocation10 + $0x250] sm:$0xff]  ;;  %v1987_v42 = vld [vmem:[#allocation10 + $0x258] sm:$0xff] }
 0x2f5   : > { %2100 = vmatpush.msra.mxu3 %v2039_v44  ;;  %1801 = vmatpush.msrb.mxu2 %v1545_v41  ;;  %v1980_v44 = vld [vmem:[#allocation10 + $0x220] sm:$0xff]  ;;  %v1981_v41 = vld [vmem:[#allocation10 + $0x228] sm:$0xff] }
 0x2f6   : > { %2041 = vmatpush.msra.mxu0 %v2032_v28  ;;  %2061 = vmatpush.msra.mxu1 %v2033_v37  ;;  %v1982_v28 = vld [vmem:[#allocation10 + $0x230] sm:$0xff]  ;;  %v1983_v37 = vld [vmem:[#allocation10 + $0x238] sm:$0xff] }
 0x2f7   : > { %2101 = vmatpush.msra.mxu3 %v2035_v49  ;;  %1802 = vmatpush.msrb.mxu2 %v1541_v43  ;;  %v1976_v49 = vld [vmem:[#allocation10 + $0x200] sm:$0xff]  ;;  %v1977_v43 = vld [vmem:[#allocation10 + $0x208] sm:$0xff] }
 0x2f8   : > { %2042 = vmatpush.msra.mxu0 %v2028_v53  ;;  %1803 = vmatmul.f32.vlgmr.msrb.gmra.mxu2 %v1538_v40  ;;  %v1989_v40 = vld [vmem:[#allocation10 + $0x268] sm:$0xff]  ;;  %v1978_v53 = vld [vmem:[#allocation10 + $0x210] sm:$0xff] }
 0x2f9   : > { %2062 = vmatpush.msra.mxu1 %v2029_v36  ;;  %2080 = vmatpush.msra.mxu2 %v2038_v48  ;;  %v1979_v36 = vld [vmem:[#allocation10 + $0x218] sm:$0xff]  ;;  %v1971_v48 = vld [vmem:[#allocation9 + $0x3e0] sm:$0xff] }
 0x2fa   : > { %2102 = vmatpush.msra.mxu3 %v2031_v55  ;;  %2043 = vmatpush.msra.mxu0 %v2024_v10  ;;  %v1972_v55 = vld [vmem:[#allocation9 + $0x3e8] sm:$0xff]  ;;  %v1973_v10 = vld [vmem:[#allocation9 + $0x3f0] sm:$0xff] }
 0x2fb   : > { %2063 = vmatpush.msra.mxu1 %v2025_v59  ;;  %2081 = vmatpush.msra.mxu2 %v2034_v6  ;;  %v1974_v59 = vld [vmem:[#allocation9 + $0x3f8] sm:$0xff]  ;;  %v1967_v6 = vld [vmem:[#allocation9 + $0x3c0] sm:$0xff] }
 0x2fc   : > { %2103 = vmatpush.msra.mxu3 %v2027_v57  ;;  %2044 = vmatpush.msra.mxu0 %v2020_v11  ;;  %v1968_v57 = vld [vmem:[#allocation9 + $0x3c8] sm:$0xff]  ;;  %v1963_v11 = vld [vmem:[#allocation9 + $0x3a0] sm:$0xff] }
 0x2fd   : > { %2082 = vmatpush.msra.mxu2 %v2030_v20  ;;  %2064 = vmatpush.msra.mxu1 %v2021_v21  ;;  %v1969_v20 = vld [vmem:[#allocation9 + $0x3d0] sm:$0xff]  ;;  %v1964_v21 = vld [vmem:[#allocation9 + $0x3a8] sm:$0xff] }
 0x2fe   : > { %2104 = vmatpush.msra.mxu3 %v2023_v18  ;;  %2045 = vmatpush.msra.mxu0 %v2016_v24  ;;  %v1966_v18 = vld [vmem:[#allocation9 + $0x3b8] sm:$0xff] }
 0x2ff   : > { %2083 = vmatpush.msra.mxu2 %v2026_v46  ;;  %2065 = vmatpush.msra.mxu1 %v2017_v15  ;;  %v1970_v46 = vld [vmem:[#allocation9 + $0x3d8] sm:$0xff] }
 0x300   : > { %2105 = vmatpush.msra.mxu3 %v2019_v62  ;;  %2046 = vmatpush.msra.mxu0 %v2012_v26  ;;  %v1960_v62 = vld [vmem:[#allocation9 + $0x388] sm:$0xff]  ;;  %v1961_v26 = vld [vmem:[#allocation9 + $0x390] sm:$0xff] }
 0x301   : > { %2084 = vmatpush.msra.mxu2 %v2022_v12  ;;  %2066 = vmatpush.msra.mxu1 %v2013_v35  ;;  %v1965_v12 = vld [vmem:[#allocation9 + $0x3b0] sm:$0xff]  ;;  %v1962_v35 = vld [vmem:[#allocation9 + $0x398] sm:$0xff] }
 0x302   : > { %2106 = vmatpush.msra.mxu3 %v2015_v34  ;;  %2047 = vmatpush.msra.mxu0 %v2008_v23  ;;  %v1956_v34 = vld [vmem:[#allocation9 + $0x368] sm:$0xff]  ;;  %v1957_v23 = vld [vmem:[#allocation9 + $0x370] sm:$0xff] }
 0x303   : > { %2085 = vmatpush.msra.mxu2 %v2018_v51  ;;  %2067 = vmatpush.msra.mxu1 %v2009_v54  ;;  %v1959_v51 = vld [vmem:[#allocation9 + $0x380] sm:$0xff]  ;;  %v1958_v54 = vld [vmem:[#allocation9 + $0x378] sm:$0xff] }
 0x304   : > { %2107 = vmatpush.msra.mxu3 %v2011_v47  ;;  %2048 = vmatpush.msra.mxu0 %v2004_v50  ;;  %v1952_v47 = vld [vmem:[#allocation9 + $0x348] sm:$0xff]  ;;  %v1953_v50 = vld [vmem:[#allocation9 + $0x350] sm:$0xff] }
 0x305   : > { %2086 = vmatpush.msra.mxu2 %v2014_v8  ;;  %2068 = vmatpush.msra.mxu1 %v2005_v5  ;;  %v1955_v8 = vld [vmem:[#allocation9 + $0x360] sm:$0xff]  ;;  %v1954_v5 = vld [vmem:[#allocation9 + $0x358] sm:$0xff] }
 0x306   : > { %2108 = vmatpush.msra.mxu3 %v2007_v63  ;;  %2049 = vmatpush.msra.mxu0 %v2000_v61  ;;  %v1948_v63 = vld [vmem:[#allocation9 + $0x328] sm:$0xff]  ;;  %v1949_v61 = vld [vmem:[#allocation9 + $0x330] sm:$0xff] }
 0x307   : > { %2087 = vmatpush.msra.mxu2 %v2010_v16  ;;  %2069 = vmatpush.msra.mxu1 %v2001_v22  ;;  %v1951_v16 = vld [vmem:[#allocation9 + $0x340] sm:$0xff] }
 0x308   : > { %2109 = vmatpush.msra.mxu3 %v2003_v7  ;;  %2050 = vmatpush.msra.mxu0 %v1996_v27  ;;  %v1943_v7 = vld [vmem:[#allocation9 + $0x300] sm:$0xff]  ;;  %v1944_v27 = vld [vmem:[#allocation9 + $0x308] sm:$0xff] }
 0x309   : > { %2088 = vmatpush.msra.mxu2 %v2006_v17  ;;  %2070 = vmatpush.msra.mxu1 %v1997_v19  ;;  %v1947_v17 = vld [vmem:[#allocation9 + $0x320] sm:$0xff]  ;;  %v1945_v19 = vld [vmem:[#allocation9 + $0x310] sm:$0xff] }
 0x30a   : > { %2110 = vmatpush.msra.mxu3 %v1999_v9  ;;  %2051 = vmatpush.msra.mxu0 %v1992_v58  ;;  %v1829_v9 = vperm.slane %v5059_v1, 1  ;;  %v1946_v58 = vld [vmem:[#allocation9 + $0x318] sm:$0xff] }
 0x30b   : > { %2089 = vmatpush.msra.mxu2 %v2002_v4  ;;  %2071 = vmatpush.msra.mxu1 %v1993_v29  ;;  %v1950_v4 = vld [vmem:[#allocation9 + $0x338] sm:$0xff] }
 0x30c   : > { %2111 = vmatpush.msra.mxu3 %v1995_v33  ;;  %2052 = vmatpush.msra.mxu0 %v1988_v13  ;;  %v1939_v33 = vld [vmem:[#allocation9 + $0x2e0] sm:$0xff]  ;;  %v1940_v13 = vld [vmem:[#allocation9 + $0x2e8] sm:$0xff] }
 0x30d   : > { %2090 = vmatpush.msra.mxu2 %v1998_v30  ;;  %2072 = vmatpush.msra.mxu1 %v1989_v40  ;;  %v1828_v30 = vperm.slane %v5059_v1, 0  ;;  %v1941_v40 = vld [vmem:[#allocation9 + $0x2f0] sm:$0xff] }
 0x30e   : > { %2112 = vmatpush.msra.mxu3 %v1991_v45  ;;  %2053 = vmatpush.msra.mxu0 %v1984_v39  ;;  %v1942_v39 = vld [vmem:[#allocation9 + $0x2f8] sm:$0xff] }
 0x30f   : > { %2091 = vmatpush.msra.mxu2 %v1994_v52  ;;  %2073 = vmatpush.msra.mxu1 %v1985_v60  ;;  %v1935_v60 = vld [vmem:[#allocation9 + $0x2c0] sm:$0xff] }
 0x310   : > { %2113 = vmatpush.msra.mxu3 %v1987_v42  ;;  %2054 = vmatpush.msra.mxu0 %v1980_v44  ;;  %v1937_v42 = vld [vmem:[#allocation9 + $0x2d0] sm:$0xff]  ;;  %v1938_v44 = vld [vmem:[#allocation9 + $0x2d8] sm:$0xff] }
 0x311   : > { %2092 = vmatpush.msra.mxu2 %v1990_v56  ;;  %2074 = vmatpush.msra.mxu1 %v1981_v41 }
 0x312   : > { %2114 = vmatpush.msra.mxu3 %v1983_v37  ;;  %2055 = vmatpush.msra.mxu0 %v1976_v49 }
 0x313   : > { %2093 = vmatpush.msra.mxu2 %v1986_v38  ;;  %2075 = vmatpush.msra.mxu1 %v1977_v43  ;;  %v1936_v38 = vld [vmem:[#allocation9 + $0x2c8] sm:$0xff] }
 0x314   : > { %2115 = vmatpush.msra.mxu3 %v1979_v36  ;;  %2120 = vmatpush.msrb.mxu0 %v1971_v48  ;;  %v1932_v36 = vld [vmem:[#allocation9 + $0x2a8] sm:$0xff]  ;;  %v1831_v48 = vperm.slane %v5059_v1, 3 }
 0x315   : > { %2094 = vmatpush.msra.mxu2 %v1982_v28  ;;  %2140 = vmatpush.msrb.mxu1 %v1972_v55  ;;  %v1933_v55 = vld [vmem:[#allocation9 + $0x2b0] sm:$0xff] }
 0x316   : > { %2180 = vmatpush.msrb.mxu3 %v1974_v59  ;;  %2121 = vmatpush.msrb.mxu0 %v1967_v6  ;;  %v1927_v59 = vld [vmem:[#allocation9 + $0x280] sm:$0xff] }
 0x317   : > { %2095 = vmatpush.msra.mxu2 %v1978_v53  ;;  %2141 = vmatpush.msrb.mxu1 %v1968_v57  ;;  %v1931_v53 = vld [vmem:[#allocation9 + $0x2a0] sm:$0xff]  ;;  %v1928_v57 = vld [vmem:[#allocation9 + $0x288] sm:$0xff] }
 0x318   : > { %2181 = vmatpush.msrb.mxu3 %v1970_v46  ;;  %2122 = vmatpush.msrb.mxu0 %v1963_v11  ;;  %v1930_v46 = vld [vmem:[#allocation9 + $0x298] sm:$0xff] }
 0x319   : > { %2160 = vmatpush.msrb.mxu2 %v1973_v10  ;;  %2142 = vmatpush.msrb.mxu1 %v1964_v21  ;;  %v1934_v10 = vld [vmem:[#allocation9 + $0x2b8] sm:$0xff]  ;;  %v1923_v21 = vld [vmem:[#allocation9 + $0x260] sm:$0xff] }
 0x31a   : > { %2182 = vmatpush.msrb.mxu3 %v1966_v18  ;;  %2123 = vmatpush.msrb.mxu0 %v1959_v51  ;;  %v1919_v51 = vld [vmem:[#allocation9 + $0x240] sm:$0xff] }
 0x31b   : > { %2161 = vmatpush.msrb.mxu2 %v1969_v20  ;;  %2143 = vmatpush.msrb.mxu1 %v1960_v62  ;;  %v1929_v20 = vld [vmem:[#allocation9 + $0x290] sm:$0xff]  ;;  %v1920_v62 = vld [vmem:[#allocation9 + $0x248] sm:$0xff] }
 0x31c   : > { %2183 = vmatpush.msrb.mxu3 %v1962_v35  ;;  %2124 = vmatpush.msrb.mxu0 %v1955_v8  ;;  %v1921_v35 = vld [vmem:[#allocation9 + $0x250] sm:$0xff]  ;;  %v1922_v8 = vld [vmem:[#allocation9 + $0x258] sm:$0xff] }
 0x31d   : > { %2162 = vmatpush.msrb.mxu2 %v1965_v12  ;;  %2144 = vmatpush.msrb.mxu1 %v1956_v34  ;;  %v1924_v12 = vld [vmem:[#allocation9 + $0x268] sm:$0xff] }
 0x31e   : > { %2184 = vmatpush.msrb.mxu3 %v1958_v54  ;;  %2125 = vmatpush.msrb.mxu0 %v1951_v16  ;;  %v1916_v54 = vld [vmem:[#allocation9 + $0x228] sm:$0xff] }
 0x31f   : > { %2163 = vmatpush.msrb.mxu2 %v1961_v26  ;;  %2145 = vmatpush.msrb.mxu1 %v1952_v47 }
 0x320   : > { %2185 = vmatpush.msrb.mxu3 %v1954_v5  ;;  %2126 = vmatpush.msrb.mxu0 %v1947_v17  ;;  %v1918_v5 = vld [vmem:[#allocation9 + $0x238] sm:$0xff] }
 0x321   : > { %2164 = vmatpush.msrb.mxu2 %v1957_v23  ;;  %2146 = vmatpush.msrb.mxu1 %v1948_v63  ;;  %v1915_v23 = vld [vmem:[#allocation9 + $0x220] sm:$0xff] }
 0x322   : > { %2186 = vmatpush.msrb.mxu3 %v1950_v4  ;;  %2127 = vmatpush.msrb.mxu0 %v1943_v7  ;;  %v1913_v4 = vld [vmem:[#allocation9 + $0x210] sm:$0xff]  ;;  %v1914_v7 = vld [vmem:[#allocation9 + $0x218] sm:$0xff] }
 0x323   : > { %2165 = vmatpush.msrb.mxu2 %v1953_v50  ;;  %2147 = vmatpush.msrb.mxu1 %v1944_v27  ;;  %v1917_v50 = vld [vmem:[#allocation9 + $0x230] sm:$0xff] }
 0x324   : > { %2187 = vmatpush.msrb.mxu3 %v1946_v58  ;;  %2128 = vmatpush.msrb.mxu0 %v1939_v33 }
 0x325   : > { %2166 = vmatpush.msrb.mxu2 %v1949_v61  ;;  %2148 = vmatpush.msrb.mxu1 %v1940_v13  ;;  %v1911_v61 = vld [vmem:[#allocation9 + $0x200] sm:$0xff] }
 0x326   : > { %2188 = vmatpush.msrb.mxu3 %v1942_v39  ;;  %2129 = vmatpush.msrb.mxu0 %v1935_v60 }
 0x327   : > { %2167 = vmatpush.msrb.mxu2 %v1945_v19  ;;  %2149 = vmatpush.msrb.mxu1 %v1936_v38  ;;  %v1830_v19 = vperm.slane %v5059_v1, 2  ;;  %v2329_v1 = vld [vmem:[#allocation13 + $0x58] sm:$0xff] (%p1526_p0) }
 0x328   : > { %2189 = vmatpush.msrb.mxu3 %v1938_v44  ;;  %2130 = vmatpush.msrb.mxu0 %v1931_v53 }
 0x329   : > { %2168 = vmatpush.msrb.mxu2 %v1941_v40  ;;  %2150 = vmatpush.msrb.mxu1 %v1932_v36 }
 0x32a   : > { %2190 = vmatpush.msrb.mxu3 %v1934_v10  ;;  %2131 = vmatpush.msrb.mxu0 %v1927_v59 }
 0x32b   : > { %2169 = vmatpush.msrb.mxu2 %v1937_v42  ;;  %2151 = vmatpush.msrb.mxu1 %v1928_v57 }
 0x32c   : > { %2191 = vmatpush.msrb.mxu3 %v1930_v46  ;;  %2056 = vmatmul.f32.vlgmr.msra.gmra.mxu0 %v4808_v31 }
 0x32d   : > { %2170 = vmatpush.msrb.mxu2 %v1933_v55  ;;  %2076 = vmatmul.f32.vlgmr.msra.gmra.mxu1 %v4808_v31 }
 0x32e   : > { %2096 = vmatmul.f32.vlgmr.msra.gmra.mxu2 %v4808_v31  ;;  %2116 = vmatmul.f32.vlgmr.msra.gmra.mxu3 %v4808_v31 }
 0x32f   : > { %2171 = vmatpush.msrb.mxu2 %v1929_v20  ;;  %2132 = vmatpush.msrb.mxu0 %v1923_v21 }
 0x330   : > { %2152 = vmatpush.msrb.mxu1 %v1924_v12 }
 0x331   : > { %2133 = vmatpush.msrb.mxu0 %v1919_v51 }
 0x332   : > { %2153 = vmatpush.msrb.mxu1 %v1920_v62 }
 0x333   : > { %2134 = vmatpush.msrb.mxu0 %v1915_v23 }
 0x334   : > { %2154 = vmatpush.msrb.mxu1 %v1916_v54  ;;  %v2201_v54 = vperm.slane %v5064_v2, 0 }
 0x335   : > { %2135 = vmatpush.msrb.mxu0 %v1911_v61 }
 0x360   : > { %v1684_v24 = vpop.f32.mrf.mxu0 }
 0x362   : > { %v1704_v15 = vpop.f32.mrf.mxu1 }
 0x366   : > { %v5759_v59 = vpop.permute.xlu0 %1905 }
 0x367   : > { %vm1907_vm11 = vcmp.eq.s32.totalorder %v5759_v59, 1  ;;  %v2293_v59 = vld [vmem:[#allocation12 + $0x78] sm:$0xff] (%p1526_p0) }
 0x368   :  { %2298 = vmatpush.msra.mxu0 (%p1526_p0), %v2293_v59  ;;  %v2392_v59 = vld [vmem:[#allocation15 + $0x110] sm:$0xff] (%p1526_p0) }
 0x36b   : > { %v1744_v22 = vpop.f32.mrf.mxu3 }
 0x36d   : > { %v1764_v29 = vpop.f32.mrf.mxu0 }
 0x36e   : > { %v1784_v52 = vpop.f32.mrf.mxu1  ;;  %v1765_v56 = vadd.f32 %v1764_v29, %v1684_v24  ;;  %v1925_v24 = vld [vmem:[#allocation9 + $0x270] sm:$0xff] }
 0x36f   : > { %v1785_v45 = vadd.f32 %v1784_v52, %v1704_v15  ;;  %v1926_v15 = vld [vmem:[#allocation9 + $0x278] sm:$0xff]  ;;  %2172 = vmatpush.msrb.mxu2 %v1925_v24 }
 0x370   : > { %v1836_v41 = vadd.f32 %v1828_v30, %v1765_v56  ;;  %2192 = vmatpush.msrb.mxu3 %v1926_v15 }
 0x371   : > { %v1837_v28 = vadd.f32 %v1829_v9, %v1785_v45  ;;  %2173 = vmatpush.msrb.mxu2 %v1921_v35 }
 0x372   : > { %v4115_v37 = vmul.f32 -1.442695, %v1836_v41  ;;  %v5750_v43 = vpop.f32.mrf.mxu2  ;;  %2193 = vmatpush.msrb.mxu3 %v1922_v8 }
 0x373   : > { %v4116_v49 = vmul.f32 -1.442695, %v1837_v28  ;;  %2174 = vmatpush.msrb.mxu2 %v1917_v50 }
 0x374   : > { %4358 = vpow2.f32 %v4115_v37  ;;  %2194 = vmatpush.msrb.mxu3 %v1918_v5 }
 0x375   : > { %v1824_v6 = vpop.f32.mrf.mxu3  ;;  %4360 = vpow2.f32 %v4116_v49  ;;  %2175 = vmatpush.msrb.mxu2 %v1913_v4 }
 0x376   : > { %v1825_v11 = vadd.f32 %v1824_v6, %v1744_v22  ;;  %v1912_v22 = vld [vmem:[#allocation9 + $0x208] sm:$0xff]  ;;  %2195 = vmatpush.msrb.mxu3 %v1914_v7 }
 0x377   : > { %2155 = vmatpush.msrb.mxu1 %v1912_v22 }
 0x378   : > { %v1839_v18 = vadd.f32 %v1831_v48, %v1825_v11 }
 0x37a   : > { %v4117_v26 = vmul.f32 -1.442695, %v1839_v18  ;;  %v4359_v34 = vpop.eup %4358 }
 0x37b   : > { %v4361_v16 = vpop.eup %4360  ;;  %v1843_v47 = vadd.f32 1.0, %v4359_v34  ;;  %v1804_v63 = vpop.f32.mrf.mxu2 }
 0x37c   : > { %4362 = vpow2.f32 %v4117_v26  ;;  %v1862_v17 = vadd.f32 1.0, %v4361_v16  ;;  %v1805_v27 = vadd.f32 %v1804_v63, %v5750_v43  ;;  %v2202_v16 = vperm.slane %v5064_v2, 1 }
 0x37d   : > { %4364 = vrcp.f32 %v1843_v47  ;;  %v1855_v45 = vand.u32 2147483648, %v1843_v47  ;;  %v1853_v60 = vand.u32 2147483647, %v1843_v47  ;;  %vm1849_vm5 = vweird.f32 %v1843_v47 }
 0x37e   : > { %4366 = vrcp.f32 %v1862_v17  ;;  %v1838_v29 = vadd.f32 %v1830_v19, %v1805_v27  ;;  %v1874_v38 = vand.u32 2147483648, %v1862_v17  ;;  %v1872_v44 = vand.u32 2147483647, %v1862_v17 }
 0x37f   : > { %v1856_v49 = vor.u32 1.1754944e-38, %v1855_v45  ;;  %vm1868_vm7 = vweird.f32 %v1862_v17  ;;  %vm1854_vm8 = vcmp.eq.f32.partialorder %v1853_v60, 8.507059e+37  ;;  %v2204_v27 = vperm.slane %v5064_v2, 3 }
 0x380   : > { %v1875_v36 = vor.u32 1.1754944e-38, %v1874_v38  ;;  %vm1873_vm10 = vcmp.eq.f32.partialorder %v1872_v44, 8.507059e+37  ;;  %v2203_v45 = vperm.slane %v5064_v2, 2  ;;  %v2286_v2 = vld [vmem:[#allocation12 + $0x40] sm:$0xff] (%p1526_p0) }
 0x382   : > { %v4363_v30 = vpop.eup %4362 }
 0x383   : > { %v1882_v9 = vadd.f32 1.0, %v4363_v30  ;;  %v4365_v58 = vpop.eup %4364 }
 0x384   : > { %v4367_v52 = vpop.eup %4366  ;;  %v1845_v33 = vmul.f32 %v4365_v58, %v1843_v47  ;;  %vm1850_vm3 = vweird.f32 %v4365_v58 }
 0x385   : > { %4368 = vrcp.f32 %v1882_v9  ;;  %v1864_v13 = vmul.f32 %v4367_v52, %v1862_v17  ;;  %vm1869_vm4 = vweird.f32 %v4367_v52  ;;  %vm1851_vm6 = vmor %vm1849_vm5, %vm1850_vm3  ;;  %v1894_v18 = vand.u32 2147483648, %v1882_v9 }
 0x386   : > { %v1846_v40 = vsub.f32 1.0, %v1845_v33  ;;  %4370 = vtanh.f32 %v1838_v29  ;;  %vm1870_vm9 = vmor %vm1868_vm7, %vm1869_vm4  ;;  %vm1888_vm13 = vweird.f32 %v1882_v9  ;;  %v1892_v24 = vand.u32 2147483647, %v1882_v9 }
 0x387   : > { %v1865_v56 = vsub.f32 1.0, %v1864_v13  ;;  %v1895_v51 = vor.u32 1.1754944e-38, %v1894_v18 }
 0x388   : > { %v1847_v39 = vmul.f32 %v4365_v58, %v1846_v40  ;;  %vm1893_vm15 = vcmp.eq.f32.partialorder %v1892_v24, 8.507059e+37 }
 0x389   : > { %v1866_v42 = vmul.f32 %v4367_v52, %v1865_v56 }
 0x38a   : > { %v1848_v28 = vadd.f32 %v4365_v58, %v1847_v39 }
 0x38b   : > { %v4369_v41 = vpop.eup %4368  ;;  %v1867_v43 = vadd.f32 %v4367_v52, %v1866_v42 }
 0x38c   : > { %v1884_v37 = vmul.f32 %v4369_v41, %v1882_v9  ;;  %v1852_v53 = vsel %vm1851_vm6, %v4365_v58, %v1848_v28  ;;  %v4371_v48 = vpop.eup %4370  ;;  %vm1889_vm12 = vweird.f32 %v4369_v41 }
 0x38d   : > { %v1857_v10 = vsel %vm1854_vm8, %v1856_v49, %v1852_v53  ;;  %v1871_v6 = vsel %vm1870_vm9, %v4367_v52, %v1867_v43  ;;  %vm1890_vm14 = vmor %vm1888_vm13, %vm1889_vm12 }
 0x38e   : > { %v1885_v55 = vsub.f32 1.0, %v1884_v37  ;;  %v1899_v57 = vmul.f32 %v4371_v48, %v1857_v10  ;;  %v1876_v20 = vsel %vm1873_vm10, %v1875_v36, %v1871_v6 }
 0x38f   : > { %v1898_v46 = vmul.f32 %v4812_v14, %v1876_v20 }
 0x390   : > { %v1886_v11 = vmul.f32 %v4369_v41, %v1885_v55 }
 0x391   : > { %v1900_v21 = vadd.f32 %v1899_v57, %v1898_v46 }
 0x392   : > { %v1887_v12 = vadd.f32 %v4369_v41, %v1886_v11 }
 0x393   : > { %4372 = vtanh.f32 %v1900_v21  ;;  %v5766_v14 = vsel %vm1907_vm11, %v1900_v21, %v4812_v14  }
 0x394   : > { %v1891_v15 = vsel %vm1890_vm14, %v4369_v41, %v1887_v12  ;;  %v2327_v14 = vld [vmem:[#allocation13 + $0x48] sm:$0xff] (%p1526_p0) }
 0x395   : > { %v1896_v26 = vsel %vm1893_vm15, %v1895_v51, %v1891_v15 }
 0x399   : > { %v4373_v62 = vpop.eup %4372 }
 0x39a   : > { %v1902_v35 = vmul.f32 %v4373_v62, %v1896_v26 }
 0x39c   : > { %v5771_v32 = vsel %vm1907_vm11, %v1902_v35, %v4816_v32  }
 0x39d   : > { %2136 = vmatmul.f32.vlgmr.msrb.gmra.mxu0 %v5771_v32  ;;  %2156 = vmatmul.f32.vlgmr.msrb.gmra.mxu1 %v5771_v32 }
 0x39e   : > { %2176 = vmatmul.f32.vlgmr.msrb.gmra.mxu2 %v5771_v32  ;;  %2196 = vmatmul.f32.vlgmr.msrb.gmra.mxu3 %v5771_v32  ;;  %v2330_v32 = vld [vmem:[#allocation13 + $0x60] sm:$0xff] (%p1526_p0) }
 0x3a9   : > { %v2057_v8 = vpop.f32.mrf.mxu0 }
 0x3aa   : > { %v2077_v34 = vpop.f32.mrf.mxu1 }
 0x3b1   : > { %v2117_v23 = vpop.f32.mrf.mxu3  ;;  %v2097_v22 = vpop.f32.mrf.mxu2 }
 0x41a   : > { %v2137_v47 = vpop.f32.mrf.mxu0  ;;  %v2157_v50 = vpop.f32.mrf.mxu1 }
 0x41b   : > { %v2138_v5 = vadd.f32 %v2137_v47, %v2057_v8  ;;  %v2158_v17 = vadd.f32 %v2157_v50, %v2077_v34 }
 0x41d   : > { %v2209_v63 = vadd.f32 %v2201_v54, %v2138_v5  ;;  %v2210_v61 = vadd.f32 %v2202_v16, %v2158_v17 }
 0x41f   : > { %v4118_v4 = vmul.f32 -1.442695, %v2209_v63  ;;  %v4119_v7 = vmul.f32 -1.442695, %v2210_v61 }
 0x421   : > { %4374 = vpow2.f32 %v4118_v4  ;;  %v2197_v19 = vpop.f32.mrf.mxu3  ;;  %v2177_v40 = vpop.f32.mrf.mxu2  ;;  %v2291_v4 = vld [vmem:[#allocation12 + $0x68] sm:$0xff] (%p1526_p0) }
 0x422   : > { %4376 = vpow2.f32 %v4119_v7  ;;  %v2198_v30 = vadd.f32 %v2197_v19, %v2117_v23  ;;  %v2178_v56 = vadd.f32 %v2177_v40, %v2097_v22  ;;  %v2292_v22 = vld [vmem:[#allocation12 + $0x70] sm:$0xff] (%p1526_p0)  ;;  %v2290_v7 = vld [vmem:[#allocation12 + $0x60] sm:$0xff] (%p1526_p0)  ;;  %v2325_v40 = vld [vmem:[#allocation13 + $0x38] sm:$0xff] (%p1526_p0) }
 0x423   :  { %2299 = vmatpush.msra.mxu0 (%p1526_p0), %v2292_v22  ;;  %v2332_v19 = vld [vmem:[#allocation13 + $0x70] sm:$0xff] (%p1526_p0)  ;;  %v2393_v22 = vld [vmem:[#allocation15 + $0x118] sm:$0xff] (%p1526_p0) }
 0x424   : > { %v2212_v9 = vadd.f32 %v2204_v27, %v2198_v30  ;;  %v2211_v42 = vadd.f32 %v2203_v45, %v2178_v56  ;;  %v2333_v27 = vld [vmem:[#allocation13 + $0x78] sm:$0xff] (%p1526_p0)  ;;  %v2282_v56 = vld [vmem:[#allocation12 + $0x20] sm:$0xff] (%p1526_p0)  ;;  %v2324_v45 = vld [vmem:[#allocation13 + $0x30] sm:$0xff] (%p1526_p0) }
 0x425   :  { %2300 = vmatpush.msra.mxu0 (%p1526_p0), %v2291_v4  ;;  %v2289_v30 = vld [vmem:[#allocation12 + $0x58] sm:$0xff] (%p1526_p0)  ;;  %2338 = vmatpush.msra.mxu1 (%p1526_p0), %v2333_v27  ;;  %v2386_v4 = vld [vmem:[#allocation15 + $0xe0] sm:$0xff] (%p1526_p0)  ;;  %v2388_v27 = vld [vmem:[#allocation15 + $0xf0] sm:$0xff] (%p1526_p0) }
 0x426   : > { %v4120_v58 = vmul.f32 -1.442695, %v2212_v9  ;;  %v2331_v9 = vld [vmem:[#allocation13 + $0x68] sm:$0xff] (%p1526_p0) }
 0x427   : > { %v4375_v29 = vpop.eup %4374  ;;  %2301 = vmatpush.msra.mxu0 (%p1526_p0), %v2290_v7  ;;  %2339 = vmatpush.msra.mxu1 (%p1526_p0), %v2332_v19  ;;  %v2387_v7 = vld [vmem:[#allocation15 + $0xe8] sm:$0xff] (%p1526_p0)  ;;  %v2389_v19 = vld [vmem:[#allocation15 + $0xf8] sm:$0xff] (%p1526_p0) }
 0x428   : > { %v4377_v52 = vpop.eup %4376  ;;  %v2216_v33 = vadd.f32 1.0, %v4375_v29  ;;  %4378 = vpow2.f32 %v4120_v58  ;;  %v2288_v58 = vld [vmem:[#allocation12 + $0x50] sm:$0xff] (%p1526_p0)  ;;  %v2287_v29 = vld [vmem:[#allocation12 + $0x48] sm:$0xff] (%p1526_p0) }
 0x429   : > { %v2235_v13 = vadd.f32 1.0, %v4377_v52  ;;  %2302 = vmatpush.msra.mxu0 (%p1526_p0), %v2289_v30  ;;  %2340 = vmatpush.msra.mxu1 (%p1526_p0), %v2331_v9  ;;  %v2284_v52 = vld [vmem:[#allocation12 + $0x30] sm:$0xff] (%p1526_p0)  ;;  %v2382_v30 = vld [vmem:[#allocation15 + $0xc0] sm:$0xff] (%p1526_p0)  ;;  %v2383_v9 = vld [vmem:[#allocation15 + $0xc8] sm:$0xff] (%p1526_p0) }
 0x42a   : > { %4380 = vrcp.f32 %v2216_v33  ;;  %v2228_v43 = vand.u32 2147483648, %v2216_v33  ;;  %v2226_v48 = vand.u32 2147483647, %v2216_v33  ;;  %vm2222_vm2 = vweird.f32 %v2216_v33 }
 0x42b   : > { %4382 = vrcp.f32 %v2235_v13  ;;  %v2247_v53 = vand.u32 2147483648, %v2235_v13  ;;  %v2245_v10 = vand.u32 2147483647, %v2235_v13  ;;  %vm2241_vm3 = vweird.f32 %v2235_v13  ;;  %2303 = vmatpush.msra.mxu0 (%p1526_p0), %v2288_v58  ;;  %2341 = vmatpush.msra.mxu1 (%p1526_p0), %v2330_v32  ;;  %v2384_v58 = vld [vmem:[#allocation15 + $0xd0] sm:$0xff] (%p1526_p0)  ;;  %v2385_v32 = vld [vmem:[#allocation15 + $0xd8] sm:$0xff] (%p1526_p0) }
 0x42c   : > { %v2229_v20 = vor.u32 1.1754944e-38, %v2228_v43  ;;  %vm2227_vm6 = vcmp.eq.f32.partialorder %v2226_v48, 8.507059e+37  ;;  %v2318_v43 = vld [vmem:[#allocation13] sm:$0xff] (%p1526_p0)  ;;  %v2420_v48 = vld [vmem:[#allocation15 + $0x1f0] sm:$0xff] (%p1526_p0) }
 0x42d   : > { %v2248_v21 = vor.u32 1.1754944e-38, %v2247_v53  ;;  %vm2246_vm7 = vcmp.eq.f32.partialorder %v2245_v10, 8.507059e+37  ;;  %2304 = vmatpush.msra.mxu0 (%p1526_p0), %v2287_v29  ;;  %2342 = vmatpush.msra.mxu1 (%p1526_p0), %v2329_v1  ;;  %v2418_v53 = vld [vmem:[#allocation15 + $0x1e0] sm:$0xff] (%p1526_p0)  ;;  %v2379_v1 = vld [vmem:[#allocation15 + $0xa8] sm:$0xff] (%p1526_p0) }
 0x42e   : > { %v4379_v39 = vpop.eup %4378  ;;  %2432 = vmatpush.msra.mxu2 (%p1526_p0), %v2418_v53  ;;  %v2414_v10 = vld [vmem:[#allocation15 + $0x1c0] sm:$0xff] (%p1526_p0)  ;;  %v2365_v53 = vld [vmem:[#allocation15 + $0x38] sm:$0xff] (%p1526_p0) }
 0x42f   : > { %v2255_v60 = vadd.f32 1.0, %v4379_v39  ;;  %2305 = vmatpush.msra.mxu0 (%p1526_p0), %v2286_v2  ;;  %v2281_v39 = vld [vmem:[#allocation12 + $0x18] sm:$0xff] (%p1526_p0)  ;;  %v2378_v29 = vld [vmem:[#allocation15 + $0xa0] sm:$0xff] (%p1526_p0)  ;;  %v2380_v2 = vld [vmem:[#allocation15 + $0xb0] sm:$0xff] (%p1526_p0) }
 0x430   : > { %v4381_v38 = vpop.eup %4380  ;;  %2433 = vmatpush.msra.mxu2 (%p1526_p0), %v2414_v10  ;;  %v2361_v10 = vld [vmem:[#allocation15 + $0x18] sm:$0xff] (%p1526_p0) }
 0x431   : > { %v4383_v44 = vpop.eup %4382  ;;  %v2218_v41 = vmul.f32 %v4381_v38, %v2216_v33  ;;  %4384 = vrcp.f32 %v2255_v60  ;;  %vm2223_vm0 = vweird.f32 %v4381_v38  ;;  %v2267_v54 = vand.u32 2147483648, %v2255_v60  ;;  %v2326_v33 = vld [vmem:[#allocation13 + $0x40] sm:$0xff] (%p1526_p0) }
 0x432   : > { %v2237_v28 = vmul.f32 %v4383_v44, %v2235_v13  ;;  %4386 = vtanh.f32 %v2211_v42  ;;  %vm2242_vm1 = vweird.f32 %v4383_v44  ;;  %vm2224_vm4 = vmor %vm2222_vm2, %vm2223_vm0  ;;  %vm2261_vm9 = vweird.f32 %v2255_v60  ;;  %v2283_v13 = vld [vmem:[#allocation12 + $0x28] sm:$0xff] (%p1526_p0)  ;;  %v2322_v42 = vld [vmem:[#allocation13 + $0x20] sm:$0xff] (%p1526_p0) }
 0x433   : > { %v2219_v37 = vsub.f32 1.0, %v2218_v41  ;;  %vm2243_vm5 = vmor %vm2241_vm3, %vm2242_vm1  ;;  %v2265_v16 = vand.u32 2147483647, %v2255_v60  ;;  %v2268_v50 = vor.u32 1.1754944e-38, %v2267_v54  ;;  %v2321_v41 = vld [vmem:[#allocation13 + $0x18] sm:$0xff] (%p1526_p0)  ;;  %v2400_v54 = vld [vmem:[#allocation15 + $0x150] sm:$0xff] (%p1526_p0) }
 0x434   : > { %v2238_v49 = vsub.f32 1.0, %v2237_v28  ;;  %v2278_v28 = vld [vmem:[#allocation12] sm:$0xff] (%p1526_p0) }
 0x435   : > { %v2220_v36 = vmul.f32 %v4381_v38, %v2219_v37  ;;  %vm2266_vm12 = vcmp.eq.f32.partialorder %v2265_v16, 8.507059e+37  ;;  %v2320_v37 = vld [vmem:[#allocation13 + $0x10] sm:$0xff] (%p1526_p0)  ;;  %v2401_v16 = vld [vmem:[#allocation15 + $0x158] sm:$0xff] (%p1526_p0) }
 0x436   : > { %v2239_v55 = vmul.f32 %v4383_v44, %v2238_v49  ;;  %v2319_v49 = vld [vmem:[#allocation13 + $0x8] sm:$0xff] (%p1526_p0) }
 0x437   : > { %v4385_v6 = vpop.eup %4384  ;;  %v2221_v57 = vadd.f32 %v4381_v38, %v2220_v36  ;;  %v2419_v36 = vld [vmem:[#allocation15 + $0x1e8] sm:$0xff] (%p1526_p0) }
 0x438   : > { %v2240_v46 = vadd.f32 %v4383_v44, %v2239_v55  ;;  %v2257_v11 = vmul.f32 %v4385_v6, %v2255_v60  ;;  %v4387_v18 = vpop.eup %4386  ;;  %vm2262_vm8 = vweird.f32 %v4385_v6  ;;  %v2323_v60 = vld [vmem:[#allocation13 + $0x28] sm:$0xff] (%p1526_p0)  ;;  %2452 = vmatpush.msra.mxu3 (%p1526_p0), %v2419_v36  ;;  %v2421_v55 = vld [vmem:[#allocation15 + $0x1f8] sm:$0xff] (%p1526_p0)  ;;  %v2358_v36 = vld [vmem:[#allocation15] sm:$0xff] (%p1526_p0) }
 0x439   : > { %v2225_v12 = vsel %vm2224_vm4, %v4381_v38, %v2221_v57  ;;  %vm2263_vm10 = vmor %vm2261_vm9, %vm2262_vm8  ;;  %v2280_v38 = vld [vmem:[#allocation12 + $0x10] sm:$0xff] (%p1526_p0) }
 0x43a   : > { %v2230_v24 = vsel %vm2227_vm6, %v2229_v20, %v2225_v12  ;;  %v2244_v15 = vsel %vm2243_vm5, %v4383_v44, %v2240_v46  ;;  %v2258_v51 = vsub.f32 1.0, %v2257_v11  ;;  %v2279_v44 = vld [vmem:[#allocation12 + $0x8] sm:$0xff] (%p1526_p0)  ;;  %v2416_v57 = vld [vmem:[#allocation15 + $0x1d0] sm:$0xff] (%p1526_p0)  ;;  %v2417_v20 = vld [vmem:[#allocation15 + $0x1d8] sm:$0xff] (%p1526_p0) }
 0x43b   : > { %v2249_v62 = vsel %vm2246_vm7, %v2248_v21, %v2244_v15  ;;  %v2272_v26 = vmul.f32 %v4387_v18, %v2230_v24  ;;  %v2410_v46 = vld [vmem:[#allocation15 + $0x1a0] sm:$0xff] (%p1526_p0)  ;;  %v2411_v11 = vld [vmem:[#allocation15 + $0x1a8] sm:$0xff] (%p1526_p0)  ;;  %v2412_v21 = vld [vmem:[#allocation15 + $0x1b0] sm:$0xff] (%p1526_p0) }
 0x43c   : > { %v2271_v35 = vmul.f32 %v4804_v25, %v2249_v62  ;;  %v2259_v8 = vmul.f32 %v4385_v6, %v2258_v51  ;;  %v2413_v12 = vld [vmem:[#allocation15 + $0x1b8] sm:$0xff] (%p1526_p0)  ;;  %v2406_v18 = vld [vmem:[#allocation15 + $0x180] sm:$0xff] (%p1526_p0)  ;;  %v2407_v24 = vld [vmem:[#allocation15 + $0x188] sm:$0xff] (%p1526_p0)  ;;  %2434 = vmatpush.msra.mxu2 (%p1526_p0), %v2410_v46 }
 0x43d   :  { %v2408_v15 = vld [vmem:[#allocation15 + $0x190] sm:$0xff] (%p1526_p0)  ;;  %v2409_v51 = vld [vmem:[#allocation15 + $0x198] sm:$0xff] (%p1526_p0)  ;;  %v2402_v62 = vld [vmem:[#allocation15 + $0x160] sm:$0xff] (%p1526_p0) }
 0x43e   : > { %v2273_v34 = vadd.f32 %v2272_v26, %v2271_v35  ;;  %v2260_v23 = vadd.f32 %v4385_v6, %v2259_v8  ;;  %v2403_v26 = vld [vmem:[#allocation15 + $0x168] sm:$0xff] (%p1526_p0)  ;;  %2435 = vmatpush.msra.mxu2 (%p1526_p0), %v2406_v18  ;;  %v2404_v35 = vld [vmem:[#allocation15 + $0x170] sm:$0xff] (%p1526_p0)  ;;  %v2405_v8 = vld [vmem:[#allocation15 + $0x178] sm:$0xff] (%p1526_p0) }
 0x43f   :  { %v2422_v46 = vld [vmem:[%s6428_s17] sm:$0xf] (%p1526_p0) }
 0x440   : > { %4388 = vtanh.f32 %v2273_v34  ;;  %v2277_v25 = vsel %vm1907_vm11, %v2273_v34, %v4804_v25   ;;  %v2264_v47 = vsel %vm2263_vm10, %v4385_v6, %v2260_v23  ;;  %v2415_v6 = vld [vmem:[#allocation15 + $0x1c8] sm:$0xff] (%p1526_p0)  ;;  %v2398_v34 = vld [vmem:[#allocation15 + $0x140] sm:$0xff] (%p1526_p0)  ;;  %2436 = vmatpush.msra.mxu2 (%p1526_p0), %v2402_v62  ;;  %v2425_v62 = vperm.slane (%p1526_p0), %v2422_v46, 1 }
 0x441   : > { %v2269_v17 = vsel %vm2266_vm12, %v2268_v50, %v2264_v47  ;;  %v2328_v25 = vld [vmem:[#allocation13 + $0x50] sm:$0xff] (%p1526_p0)  ;;  %2453 = vmatpush.msra.mxu3 (%p1526_p0), %v2415_v6  ;;  %v2399_v23 = vld [vmem:[#allocation15 + $0x148] sm:$0xff] (%p1526_p0)  ;;  %v2394_v47 = vld [vmem:[#allocation15 + $0x120] sm:$0xff] (%p1526_p0) }
 0x442   :  { %2343 = vmatpush.msra.mxu1 (%p1526_p0), %v2328_v25  ;;  %v2395_v50 = vld [vmem:[#allocation15 + $0x128] sm:$0xff] (%p1526_p0)  ;;  %2437 = vmatpush.msra.mxu2 (%p1526_p0), %v2398_v34  ;;  %v2381_v25 = vld [vmem:[#allocation15 + $0xb8] sm:$0xff] (%p1526_p0)  ;;  %v4391_v6 = vld [vmem:[%s6425_s14] ss:$0 sm:$0xff] (%p1526_p0)  ;;  %s5830_s14 = smov (%p1526_p0), 0  }
 0x443   :  { %2454 = vmatpush.msra.mxu3 (%p1526_p0), %v2411_v11  ;;  %v2426_v11 = vperm.slane (%p1526_p0), %v2422_v46, 2 }
 0x444   :  { %2344 = vmatpush.msra.mxu1 (%p1526_p0), %v2327_v14  ;;  %2438 = vmatpush.msra.mxu2 (%p1526_p0), %v2394_v47  ;;  %v2375_v14 = vld [vmem:[#allocation15 + $0x88] sm:$0xff] (%p1526_p0)  ;;  %v5828_v47 = vmov (%p1526_p0), 0.0  }
 0x445   :  { %2455 = vmatpush.msra.mxu3 (%p1526_p0), %v2407_v24 }
 0x446   : > { %v4389_v5 = vpop.eup %4388  ;;  %2345 = vmatpush.msra.mxu1 (%p1526_p0), %v2326_v33  ;;  %v2377_v33 = vld [vmem:[#allocation15 + $0x98] sm:$0xff] (%p1526_p0) }
 0x447   : > { %v2275_v63 = vmul.f32 %v4389_v5, %v2269_v17  ;;  %1528 = sbr.rel (!%p1526_p0) target bundleno = 687 (0x2af), region = 182  ;;  %2456 = vmatpush.msra.mxu3 (%p1526_p0), %v2403_v26  ;;  %v2396_v5 = vld [vmem:[#allocation15 + $0x130] sm:$0xff] (%p1526_p0)  ;;  %v2397_v17 = vld [vmem:[#allocation15 + $0x138] sm:$0xff] (%p1526_p0) }
 0x448   :  { %2346 = vmatpush.msra.mxu1 (%p1526_p0), %v2325_v40  ;;  %v2371_v40 = vld [vmem:[#allocation15 + $0x68] sm:$0xff] (%p1526_p0) }
 0x449   : > { %v5788_v31 = vsel %vm1907_vm11, %v2275_v63, %v4808_v31   ;;  %2457 = vmatpush.msra.mxu3 (%p1526_p0), %v2399_v23  ;;  %v2390_v63 = vld [vmem:[#allocation15 + $0x100] sm:$0xff] (%p1526_p0)  ;;  %v5822_v23 = vmov (%p1526_p0), 0.0  }
 0x44a   : > { %v6455_v61 = vmov %v5788_v31  ;;  %2347 = vmatpush.msra.mxu1 (%p1526_p0), %v2324_v45  ;;  %2439 = vmatpush.msra.mxu2 (%p1526_p0), %v2390_v63  ;;  %v2373_v45 = vld [vmem:[#allocation15 + $0x78] sm:$0xff] (%p1526_p0) }
 0x44b   : > { %v6456_v31 = vmov %v6455_v61  ;;  %2458 = vmatpush.msra.mxu3 (%p1526_p0), %v2395_v50 }
 0x44c   :  { %v2285_v31 = vld [vmem:[#allocation12 + $0x38] sm:$0xff]  ;;  %2348 = vmatpush.msra.mxu1 %v2323_v60  ;;  %2440 = vmatpush.msra.mxu2 %v2386_v4  ;;  %v2367_v60 = vld [vmem:[#allocation15 + $0x48] sm:$0xff] }
 0x44d   :  { %2306 = vmatpush.msra.mxu0 %v2285_v31  ;;  %v2374_v31 = vld [vmem:[#allocation15 + $0x80] sm:$0xff] }
 0x44e   :  { %2349 = vmatpush.msra.mxu1 %v2322_v42  ;;  %2441 = vmatpush.msra.mxu2 %v2382_v30  ;;  %v2369_v42 = vld [vmem:[#allocation15 + $0x58] sm:$0xff] }
 0x44f   :  { %2307 = vmatpush.msra.mxu0 %v2284_v52  ;;  %v2376_v52 = vld [vmem:[#allocation15 + $0x90] sm:$0xff] }
 0x450   :  { %2350 = vmatpush.msra.mxu1 %v2321_v41  ;;  %2442 = vmatpush.msra.mxu2 %v2378_v29 }
 0x451   :  { %2308 = vmatpush.msra.mxu0 %v2283_v13  ;;  %v2370_v13 = vld [vmem:[#allocation15 + $0x60] sm:$0xff] }
 0x452   :  { %2351 = vmatpush.msra.mxu1 %v2320_v37  ;;  %2443 = vmatpush.msra.mxu2 %v2374_v31  ;;  %v2362_v37 = vld [vmem:[#allocation15 + $0x20] sm:$0xff] }
 0x453   :  { %2309 = vmatpush.msra.mxu0 %v2282_v56  ;;  %v2372_v56 = vld [vmem:[#allocation15 + $0x70] sm:$0xff] }
 0x454   :  { %2352 = vmatpush.msra.mxu1 %v2319_v49  ;;  %2444 = vmatpush.msra.mxu2 %v2370_v13  ;;  %v2363_v49 = vld [vmem:[#allocation15 + $0x28] sm:$0xff] }
 0x455   :  { %2310 = vmatpush.msra.mxu0 %v2281_v39  ;;  %v2366_v39 = vld [vmem:[#allocation15 + $0x40] sm:$0xff] }
 0x456   :  { %2353 = vmatpush.msra.mxu1 %v2318_v43  ;;  %2445 = vmatpush.msra.mxu2 %v2366_v39  ;;  %v2364_v43 = vld [vmem:[#allocation15 + $0x30] sm:$0xff] }
 0x457   :  { %2311 = vmatpush.msra.mxu0 %v2280_v38  ;;  %v2368_v38 = vld [vmem:[#allocation15 + $0x50] sm:$0xff] }
 0x458   :  { %2492 = vmatpush.msrb.mxu1 %v2421_v55  ;;  %2446 = vmatpush.msra.mxu2 %v2362_v37  ;;  %v2360_v55 = vld [vmem:[#allocation15 + $0x10] sm:$0xff] }
 0x459   :  { %2312 = vmatpush.msra.mxu0 %v2279_v44  ;;  %v4390_v44 = vld [vmem:[%s6423_s12] ss:$0 sm:$0xff] }
 0x45a   :  { %2493 = vmatpush.msrb.mxu1 %v2417_v20  ;;  %2447 = vmatpush.msra.mxu2 %v2358_v36 }
 0x45b   :  { %2313 = vmatpush.msra.mxu0 %v2278_v28 }
 0x45c   :  { %2314 = vmatmul.f32.vlgmr.msra.gmra.mxu0 %v6455_v61  ;;  %2494 = vmatpush.msrb.mxu1 %v2413_v12  ;;  %v2391_v61 = vld [vmem:[#allocation15 + $0x108] sm:$0xff] }
 0x45d   :  { %2472 = vmatpush.msrb.mxu0 %v2420_v48  ;;  %2459 = vmatpush.msra.mxu3 %v2391_v61  ;;  %v2359_v48 = vld [vmem:[#allocation15 + $0x8] sm:$0xff] }
 0x45e   :  { %2495 = vmatpush.msrb.mxu1 %v2409_v51  ;;  %v2424_v51 = vperm.slane %v2422_v46, 0 }
 0x45f   :  { %2473 = vmatpush.msrb.mxu0 %v2416_v57  ;;  %2460 = vmatpush.msra.mxu3 %v2387_v7 }
 0x460   :  { %2496 = vmatpush.msrb.mxu1 %v2405_v8 }
 0x461   :  { %2474 = vmatpush.msrb.mxu0 %v2412_v21  ;;  %2461 = vmatpush.msra.mxu3 %v2383_v9  ;;  %v2427_v21 = vperm.slane %v2422_v46, 3 }
 0x462   :  { %2497 = vmatpush.msrb.mxu1 %v2401_v16  ;;  %v5826_v16 = vmov 0.0  }
 0x463   :  { %2475 = vmatpush.msrb.mxu0 %v2408_v15  ;;  %2462 = vmatpush.msra.mxu3 %v2379_v1 }
 0x464   :  { %2498 = vmatpush.msrb.mxu1 %v2397_v17 }
 0x465   :  { %2476 = vmatpush.msrb.mxu0 %v2404_v35  ;;  %2463 = vmatpush.msra.mxu3 %v2375_v14 }
 0x466   :  { %2499 = vmatpush.msrb.mxu1 %v2393_v22 }
 0x467   :  { %2477 = vmatpush.msrb.mxu0 %v2400_v54  ;;  %2464 = vmatpush.msra.mxu3 %v2371_v40  ;;  %v5824_v54 = vmov 0.0  }
 0x468   :  { %2500 = vmatpush.msrb.mxu1 %v2389_v19 }
 0x469   :  { %2478 = vmatpush.msrb.mxu0 %v2396_v5  ;;  %2465 = vmatpush.msra.mxu3 %v2367_v60 }
 0x46a   :  { %2501 = vmatpush.msrb.mxu1 %v2385_v32 }
 0x46b   :  { %2479 = vmatpush.msrb.mxu0 %v2392_v59  ;;  %2466 = vmatpush.msra.mxu3 %v2363_v49 }
 0x46c   :  { %2502 = vmatpush.msrb.mxu1 %v2381_v25 }
 0x46d   :  { %2480 = vmatpush.msrb.mxu0 %v2388_v27  ;;  %2467 = vmatpush.msra.mxu3 %v2359_v48 }
 0x46e   :  { %2503 = vmatpush.msrb.mxu1 %v2377_v33 }
 0x46f   :  { %2481 = vmatpush.msrb.mxu0 %v2384_v58 }
 0x470   :  { %2504 = vmatpush.msrb.mxu1 %v2373_v45 }
 0x471   :  { %2482 = vmatpush.msrb.mxu0 %v2380_v2 }
 0x472   :  { %2505 = vmatpush.msrb.mxu1 %v2369_v42 }
 0x473   :  { %2483 = vmatpush.msrb.mxu0 %v2376_v52 }
 0x474   :  { %2506 = vmatpush.msrb.mxu1 %v2365_v53 }
 0x475   :  { %2484 = vmatpush.msrb.mxu0 %v2372_v56 }
 0x476   :  { %2507 = vmatpush.msrb.mxu1 %v2361_v10 }
 0x477   :  { %2485 = vmatpush.msrb.mxu0 %v2368_v38 }
 0x479   :  { %2486 = vmatpush.msrb.mxu0 %v2364_v43 }
 0x47b   :  { %2487 = vmatpush.msrb.mxu0 %v2360_v55 }
 0x4d9   :  { %v2315_v41 = vpop.f32.mrf.mxu0 }
 0x4da   :  { %v2316_v28 = vadd.f32 %v4390_v44, %v2315_v41 }
 0x4dc   :  { %2354 = vmatmul.f32.vlgmr.msra.gmra.mxu1 %v2316_v28 }
 0x559   :  { %v2355_v57 = vpop.f32.mrf.mxu1 }
 0x55a   :  { %v2356_v20 = vadd.f32 %v4391_v6, %v2355_v57 }
 0x55c   :  { %2448 = vmatmul.f32.vlgmr.msra.gmra.mxu2 %v2356_v20  ;;  %2468 = vmatmul.f32.vlgmr.msra.gmra.mxu3 %v2356_v20 }
 0x55d   :  { %2488 = vmatmul.f32.vlgmr.msrb.gmra.mxu0 %v2356_v20  ;;  %2508 = vmatmul.f32.vlgmr.msrb.gmra.mxu1 %v2356_v20 }
 0x5da   :  { %v2489_v12 = vpop.f32.mrf.mxu0  ;;  %v2509_v18 = vpop.f32.mrf.mxu1 }
 0x5db   :  { %v5814_v24 = vadd.f32 %v2489_v12, %v2426_v11  ;;  %v5816_v15 = vadd.f32 %v2509_v18, %v2427_v21 }
 0x5df   :  { %v2449_v26 = vpop.f32.mrf.mxu2  ;;  %v2469_v35 = vpop.f32.mrf.mxu3 }
 0x5e0   :  { %v5818_v8 = vadd.f32 %v2449_v26, %v2424_v51  ;;  %v5820_v34 = vadd.f32 %v2469_v35, %v2425_v62 }
 0x5e1 LB: > { %v2584_v50 = vld [vmem:[#allocation16 + $0x1e0] sm:$0xff]  ;;  %v2585_v5 = vld [vmem:[#allocation16 + $0x1e8] sm:$0xff]  ;;  %v2587_v17 = vld [vmem:[#allocation16 + $0x1f8] sm:$0xff]  ;;  %s4127_s17 = sshll.u32 %s4840_s14, 3  ;;  %s4840_s14 = sphi %s5830_s14, %s2517_s14   ;;  %v4836_v47 = vphi %v5828_v47, %v5873_v47   ;;  %v4832_v16 = vphi %v5826_v16, %v5868_v16   ;;  %v4828_v54 = vphi %v5824_v54, %v3108_v54   ;;  %v4824_v23 = vphi %v5822_v23, %v3109_v23  }
 0x5e2   : > { %2588 = vmatpush.msra.mxu0 %v2584_v50  ;;  %2608 = vmatpush.msra.mxu1 %v2585_v5  ;;  %v2580_v63 = vld [vmem:[#allocation16 + $0x1c0] sm:$0xff]  ;;  %v2581_v61 = vld [vmem:[#allocation16 + $0x1c8] sm:$0xff]  ;;  %v2583_v59 = vld [vmem:[#allocation16 + $0x1d8] sm:$0xff]  ;;  %v2522_v50 = vstv %s4840_s14  ;;  %s3112_s27 = scalar_lea.vmem [#allocation3], %s4127_s17  ;;  %s2517_s14 = sadd.s32 1, %s4840_s14  }
 0x5e3   : > { %2648 = vmatpush.msra.mxu3 %v2587_v17  ;;  %v2576_v22 = vld [vmem:[#allocation16 + $0x1a0] sm:$0xff]  ;;  %v2577_v4 = vld [vmem:[#allocation16 + $0x1a8] sm:$0xff]  ;;  %v2579_v7 = vld [vmem:[#allocation16 + $0x1b8] sm:$0xff]  ;;  %vm2523_vm11 = vcmp.lt.s32.totalorder %v2522_v50, %v5054_v0  ;;  %p2514_p1 = scmp.ge.s32.totalorder %s2517_s14, 8  }
 0x5e4   : > { %2589 = vmatpush.msra.mxu0 %v2580_v63  ;;  %2609 = vmatpush.msra.mxu1 %v2581_v61  ;;  %v2572_v27 = vld [vmem:[#allocation16 + $0x180] sm:$0xff]  ;;  %v2573_v19 = vld [vmem:[#allocation16 + $0x188] sm:$0xff]  ;;  %v2575_v30 = vld [vmem:[#allocation16 + $0x198] sm:$0xff]  ;;  %s4023_s28 = sshll.u32 (%p2514_p1), %s6435_s24, 4  ;;  %s4024_s28 = int_to_ptr.hbm [resolvable:$true] %s4023_s28 }
 0x5e5   : > { %2649 = vmatpush.msra.mxu3 %v2583_v59  ;;  %v2568_v9 = vld [vmem:[#allocation16 + $0x160] sm:$0xff]  ;;  %v2569_v58 = vld [vmem:[#allocation16 + $0x168] sm:$0xff]  ;;  %v2571_v32 = vld [vmem:[#allocation16 + $0x178] sm:$0xff] }
 0x5e6   : > { %2590 = vmatpush.msra.mxu0 %v2576_v22  ;;  %2610 = vmatpush.msra.mxu1 %v2577_v4  ;;  %v2564_v29 = vld [vmem:[#allocation16 + $0x140] sm:$0xff]  ;;  %v2565_v1 = vld [vmem:[#allocation16 + $0x148] sm:$0xff]  ;;  %v2586_v2 = vld [vmem:[#allocation16 + $0x1f0] sm:$0xff]  ;;  %v4858_v4 = vmov 0  }
 0x5e7   : > { %2650 = vmatpush.msra.mxu3 %v2579_v7  ;;  %v2567_v25 = vld [vmem:[#allocation16 + $0x158] sm:$0xff]  ;;  %v2582_v31 = vld [vmem:[#allocation16 + $0x1d0] sm:$0xff]  ;;  %v2560_v14 = vld [vmem:[#allocation16 + $0x120] sm:$0xff]  ;;  %2628 = vmatpush.msra.mxu2 %v2586_v2  ;;  %v2735_v7 = vsel %vm2523_vm11, 1, %v4858_v4 }
 0x5e8   : > { %2591 = vmatpush.msra.mxu0 %v2572_v27  ;;  %2611 = vmatpush.msra.mxu1 %v2573_v19  ;;  %v2561_v52 = vld [vmem:[#allocation16 + $0x128] sm:$0xff]  ;;  %v2563_v33 = vld [vmem:[#allocation16 + $0x138] sm:$0xff]  ;;  %v2578_v13 = vld [vmem:[#allocation16 + $0x1b0] sm:$0xff] }
 0x5e9   : > { %2651 = vmatpush.msra.mxu3 %v2575_v30  ;;  %v2556_v40 = vld [vmem:[#allocation16 + $0x100] sm:$0xff]  ;;  %v2557_v56 = vld [vmem:[#allocation16 + $0x108] sm:$0xff]  ;;  %2629 = vmatpush.msra.mxu2 %v2582_v31  ;;  %v2559_v45 = vld [vmem:[#allocation16 + $0x118] sm:$0xff] }
 0x5ea   : > { %2592 = vmatpush.msra.mxu0 %v2568_v9  ;;  %2612 = vmatpush.msra.mxu1 %v2569_v58  ;;  %v2574_v39 = vld [vmem:[#allocation16 + $0x190] sm:$0xff]  ;;  %v2552_v60 = vld [vmem:[#allocation16 + $0xe0] sm:$0xff]  ;;  %v2553_v38 = vld [vmem:[#allocation16 + $0xe8] sm:$0xff] }
 0x5eb   : > { %2652 = vmatpush.msra.mxu3 %v2571_v32  ;;  %2630 = vmatpush.msra.mxu2 %v2578_v13  ;;  %v2555_v42 = vld [vmem:[#allocation16 + $0xf8] sm:$0xff]  ;;  %v2570_v44 = vld [vmem:[#allocation16 + $0x170] sm:$0xff]  ;;  %v2548_v41 = vld [vmem:[#allocation16 + $0xc0] sm:$0xff] }
 0x5ec   : > { %2593 = vmatpush.msra.mxu0 %v2564_v29  ;;  %2613 = vmatpush.msra.mxu1 %v2565_v1  ;;  %v2549_v28 = vld [vmem:[#allocation16 + $0xc8] sm:$0xff]  ;;  %v2551_v37 = vld [vmem:[#allocation16 + $0xd8] sm:$0xff]  ;;  %v2566_v49 = vld [vmem:[#allocation16 + $0x150] sm:$0xff] }
 0x5ed   : > { %2653 = vmatpush.msra.mxu3 %v2567_v25  ;;  %2631 = vmatpush.msra.mxu2 %v2574_v39  ;;  %v2544_v43 = vld [vmem:[#allocation16 + $0xa0] sm:$0xff]  ;;  %v2545_v53 = vld [vmem:[#allocation16 + $0xa8] sm:$0xff]  ;;  %v2547_v36 = vld [vmem:[#allocation16 + $0xb8] sm:$0xff] }
 0x5ee   : > { %2594 = vmatpush.msra.mxu0 %v2560_v14  ;;  %2614 = vmatpush.msra.mxu1 %v2561_v52  ;;  %v2562_v48 = vld [vmem:[#allocation16 + $0x130] sm:$0xff]  ;;  %v2540_v55 = vld [vmem:[#allocation16 + $0x80] sm:$0xff]  ;;  %v2541_v10 = vld [vmem:[#allocation16 + $0x88] sm:$0xff] }
 0x5ef   : > { %2654 = vmatpush.msra.mxu3 %v2563_v33  ;;  %2632 = vmatpush.msra.mxu2 %v2570_v44  ;;  %v2543_v6 = vld [vmem:[#allocation16 + $0x98] sm:$0xff]  ;;  %v2558_v57 = vld [vmem:[#allocation16 + $0x110] sm:$0xff]  ;;  %v2536_v20 = vld [vmem:[#allocation16 + $0x60] sm:$0xff] }
 0x5f0   : > { %2595 = vmatpush.msra.mxu0 %v2556_v40  ;;  %2615 = vmatpush.msra.mxu1 %v2557_v56  ;;  %v2537_v46 = vld [vmem:[#allocation16 + $0x68] sm:$0xff]  ;;  %v2539_v11 = vld [vmem:[#allocation16 + $0x78] sm:$0xff]  ;;  %v2554_v21 = vld [vmem:[#allocation16 + $0xf0] sm:$0xff] }
 0x5f1   : > { %2655 = vmatpush.msra.mxu3 %v2559_v45  ;;  %2633 = vmatpush.msra.mxu2 %v2566_v49  ;;  %v2532_v12 = vld [vmem:[#allocation16 + $0x40] sm:$0xff]  ;;  %v2533_v18 = vld [vmem:[#allocation16 + $0x48] sm:$0xff]  ;;  %v2535_v51 = vld [vmem:[#allocation16 + $0x58] sm:$0xff] }
 0x5f2   : > { %2596 = vmatpush.msra.mxu0 %v2552_v60  ;;  %2616 = vmatpush.msra.mxu1 %v2553_v38  ;;  %v2550_v62 = vld [vmem:[#allocation16 + $0xd0] sm:$0xff]  ;;  %v2528_v26 = vld [vmem:[#allocation16 + $0x20] sm:$0xff]  ;;  %v2529_v35 = vld [vmem:[#allocation16 + $0x28] sm:$0xff] }
 0x5f3   : > { %2656 = vmatpush.msra.mxu3 %v2555_v42  ;;  %2634 = vmatpush.msra.mxu2 %v2562_v48  ;;  %v2531_v5 = vld [vmem:[#allocation16 + $0x38] sm:$0xff]  ;;  %v2546_v17 = vld [vmem:[#allocation16 + $0xb0] sm:$0xff]  ;;  %v2524_v63 = vld [vmem:[#allocation16] sm:$0xff] }
 0x5f4   : > { %2597 = vmatpush.msra.mxu0 %v2548_v41  ;;  %2617 = vmatpush.msra.mxu1 %v2549_v28  ;;  %v2525_v61 = vld [vmem:[#allocation16 + $0x8] sm:$0xff]  ;;  %v2527_v59 = vld [vmem:[#allocation16 + $0x18] sm:$0xff]  ;;  %v2542_v22 = vld [vmem:[#allocation16 + $0x90] sm:$0xff] }
 0x5f5   : > { %2657 = vmatpush.msra.mxu3 %v2551_v37  ;;  %2635 = vmatpush.msra.mxu2 %v2558_v57  ;;  %v2868_v27 = vld [vmem:[#allocation16 + $0x3e0] sm:$0xff]  ;;  %v2538_v19 = vld [vmem:[#allocation16 + $0x70] sm:$0xff]  ;;  %v2869_v30 = vld [vmem:[#allocation16 + $0x3e8] sm:$0xff] }
 0x5f6   : > { %2598 = vmatpush.msra.mxu0 %v2544_v43  ;;  %2618 = vmatpush.msra.mxu1 %v2545_v53  ;;  %v2871_v9 = vld [vmem:[#allocation16 + $0x3f8] sm:$0xff]  ;;  %v2864_v58 = vld [vmem:[#allocation16 + $0x3c0] sm:$0xff]  ;;  %v2534_v32 = vld [vmem:[#allocation16 + $0x50] sm:$0xff] }
 0x5f7   : > { %2658 = vmatpush.msra.mxu3 %v2547_v36  ;;  %2636 = vmatpush.msra.mxu2 %v2554_v21  ;;  %v2865_v29 = vld [vmem:[#allocation16 + $0x3c8] sm:$0xff]  ;;  %v2867_v1 = vld [vmem:[#allocation16 + $0x3d8] sm:$0xff]  ;;  %v2860_v2 = vld [vmem:[#allocation16 + $0x3a0] sm:$0xff] }
 0x5f8   : > { %2599 = vmatpush.msra.mxu0 %v2540_v55  ;;  %2619 = vmatpush.msra.mxu1 %v2541_v10  ;;  %v2530_v25 = vld [vmem:[#allocation16 + $0x30] sm:$0xff]  ;;  %v2861_v31 = vld [vmem:[#allocation16 + $0x3a8] sm:$0xff]  ;;  %v2863_v14 = vld [vmem:[#allocation16 + $0x3b8] sm:$0xff] }
 0x5f9   : > { %2659 = vmatpush.msra.mxu3 %v2543_v6  ;;  %2637 = vmatpush.msra.mxu2 %v2550_v62  ;;  %v2856_v52 = vld [vmem:[#allocation16 + $0x380] sm:$0xff]  ;;  %v2526_v33 = vld [vmem:[#allocation16 + $0x10] sm:$0xff]  ;;  %v2857_v13 = vld [vmem:[#allocation16 + $0x388] sm:$0xff] }
 0x5fa   : > { %2600 = vmatpush.msra.mxu0 %v2536_v20  ;;  %2620 = vmatpush.msra.mxu1 %v2537_v46  ;;  %v2859_v40 = vld [vmem:[#allocation16 + $0x398] sm:$0xff]  ;;  %v2870_v56 = vld [vmem:[#allocation16 + $0x3f0] sm:$0xff]  ;;  %v2852_v45 = vld [vmem:[#allocation16 + $0x360] sm:$0xff] }
 0x5fb   : > { %2660 = vmatpush.msra.mxu3 %v2539_v11  ;;  %2638 = vmatpush.msra.mxu2 %v2546_v17  ;;  %v2853_v39 = vld [vmem:[#allocation16 + $0x368] sm:$0xff]  ;;  %v2855_v60 = vld [vmem:[#allocation16 + $0x378] sm:$0xff]  ;;  %v2866_v38 = vld [vmem:[#allocation16 + $0x3d0] sm:$0xff] }
 0x5fc   : > { %2601 = vmatpush.msra.mxu0 %v2532_v12  ;;  %2621 = vmatpush.msra.mxu1 %v2533_v18  ;;  %v2848_v42 = vld [vmem:[#allocation16 + $0x340] sm:$0xff]  ;;  %v2849_v44 = vld [vmem:[#allocation16 + $0x348] sm:$0xff]  ;;  %v2851_v41 = vld [vmem:[#allocation16 + $0x358] sm:$0xff] }
 0x5fd   : > { %2661 = vmatpush.msra.mxu3 %v2535_v51  ;;  %2639 = vmatpush.msra.mxu2 %v2542_v22  ;;  %v2862_v28 = vld [vmem:[#allocation16 + $0x3b0] sm:$0xff]  ;;  %v2844_v37 = vld [vmem:[#allocation16 + $0x320] sm:$0xff]  ;;  %v2845_v49 = vld [vmem:[#allocation16 + $0x328] sm:$0xff] }
 0x5fe   : > { %2602 = vmatpush.msra.mxu0 %v2528_v26  ;;  %2622 = vmatpush.msra.mxu1 %v2529_v35  ;;  %v2847_v43 = vld [vmem:[#allocation16 + $0x338] sm:$0xff]  ;;  %v2858_v53 = vld [vmem:[#allocation16 + $0x390] sm:$0xff]  ;;  %v2840_v36 = vld [vmem:[#allocation16 + $0x300] sm:$0xff] }
 0x5ff   : > { %2662 = vmatpush.msra.mxu3 %v2531_v5  ;;  %4392 = vset.pattern.permute.xlu0 %v4858_v4  ;;  %v2841_v48 = vld [vmem:[#allocation16 + $0x308] sm:$0xff]  ;;  %v2843_v55 = vld [vmem:[#allocation16 + $0x318] sm:$0xff]  ;;  %v2854_v10 = vld [vmem:[#allocation16 + $0x370] sm:$0xff] }
 0x600   : > { %2603 = vmatpush.msra.mxu0 %v2524_v63  ;;  %2623 = vmatpush.msra.mxu1 %v2525_v61  ;;  %v2836_v6 = vld [vmem:[#allocation16 + $0x2e0] sm:$0xff]  ;;  %v2837_v57 = vld [vmem:[#allocation16 + $0x2e8] sm:$0xff]  ;;  %v2839_v20 = vld [vmem:[#allocation16 + $0x2f8] sm:$0xff] }
 0x601   : > { %2663 = vmatpush.msra.mxu3 %v2527_v59  ;;  %2604 = vmatmul.f32.vlgmr.msra.gmra.mxu0 %v4836_v47  ;;  %v2850_v46 = vld [vmem:[#allocation16 + $0x350] sm:$0xff]  ;;  %v2832_v18 = vld [vmem:[#allocation16 + $0x2c0] sm:$0xff]  ;;  %v2833_v51 = vld [vmem:[#allocation16 + $0x2c8] sm:$0xff] }
 0x602   : > { %2624 = vmatmul.f32.vlgmr.msra.gmra.mxu1 %v4836_v47  ;;  %2664 = vmatmul.f32.vlgmr.msra.gmra.mxu3 %v4836_v47  ;;  %v2846_v11 = vld [vmem:[#allocation16 + $0x330] sm:$0xff]  ;;  %v2835_v26 = vld [vmem:[#allocation16 + $0x2d8] sm:$0xff]  ;;  %v2828_v35 = vld [vmem:[#allocation16 + $0x2a0] sm:$0xff] }
 0x603   : > { %2737 = vperm.xlu0 %4392, %v2735_v7   ;;  %2872 = vmatpush.msrb.mxu0 %v2868_v27  ;;  %v2842_v21 = vld [vmem:[#allocation16 + $0x310] sm:$0xff]  ;;  %v2829_v50 = vld [vmem:[#allocation16 + $0x2a8] sm:$0xff]  ;;  %v2831_v17 = vld [vmem:[#allocation16 + $0x2b8] sm:$0xff] }
 0x604   : > { %2640 = vmatpush.msra.mxu2 %v2538_v19  ;;  %2892 = vmatpush.msrb.mxu1 %v2869_v30  ;;  %v2838_v12 = vld [vmem:[#allocation16 + $0x2f0] sm:$0xff]  ;;  %v2824_v63 = vld [vmem:[#allocation16 + $0x280] sm:$0xff]  ;;  %v2825_v61 = vld [vmem:[#allocation16 + $0x288] sm:$0xff] }
 0x605   : > { %2932 = vmatpush.msrb.mxu3 %v2871_v9  ;;  %2873 = vmatpush.msrb.mxu0 %v2864_v58  ;;  %v2834_v62 = vld [vmem:[#allocation16 + $0x2d0] sm:$0xff]  ;;  %v2827_v22 = vld [vmem:[#allocation16 + $0x298] sm:$0xff]  ;;  %v2820_v4 = vld [vmem:[#allocation16 + $0x260] sm:$0xff] }
 0x606   : > { %2641 = vmatpush.msra.mxu2 %v2534_v32  ;;  %2893 = vmatpush.msrb.mxu1 %v2865_v29  ;;  %v2830_v5 = vld [vmem:[#allocation16 + $0x2b0] sm:$0xff]  ;;  %v2821_v7 = vld [vmem:[#allocation16 + $0x268] sm:$0xff]  ;;  %v2823_v19 = vld [vmem:[#allocation16 + $0x278] sm:$0xff] }
 0x607   : > { %2933 = vmatpush.msrb.mxu3 %v2867_v1  ;;  %2874 = vmatpush.msrb.mxu0 %v2860_v2  ;;  %v2826_v59 = vld [vmem:[#allocation16 + $0x290] sm:$0xff]  ;;  %v2816_v30 = vld [vmem:[#allocation16 + $0x240] sm:$0xff]  ;;  %v2817_v9 = vld [vmem:[#allocation16 + $0x248] sm:$0xff] }
 0x608   : > { %2642 = vmatpush.msra.mxu2 %v2530_v25  ;;  %2894 = vmatpush.msrb.mxu1 %v2861_v31  ;;  %v2822_v27 = vld [vmem:[#allocation16 + $0x270] sm:$0xff]  ;;  %v2819_v32 = vld [vmem:[#allocation16 + $0x258] sm:$0xff]  ;;  %v2812_v29 = vld [vmem:[#allocation16 + $0x220] sm:$0xff] }
 0x609   : > { %2934 = vmatpush.msrb.mxu3 %v2863_v14  ;;  %2875 = vmatpush.msrb.mxu0 %v2856_v52  ;;  %v2818_v58 = vld [vmem:[#allocation16 + $0x250] sm:$0xff]  ;;  %v2813_v1 = vld [vmem:[#allocation16 + $0x228] sm:$0xff]  ;;  %v2815_v25 = vld [vmem:[#allocation16 + $0x238] sm:$0xff] }
 0x60a   : > { %2643 = vmatpush.msra.mxu2 %v2526_v33  ;;  %2895 = vmatpush.msrb.mxu1 %v2857_v13  ;;  %v2814_v2 = vld [vmem:[#allocation16 + $0x230] sm:$0xff]  ;;  %v2808_v31 = vld [vmem:[#allocation16 + $0x200] sm:$0xff]  ;;  %v2809_v14 = vld [vmem:[#allocation16 + $0x208] sm:$0xff] }
 0x60b   : > { %2644 = vmatmul.f32.vlgmr.msra.gmra.mxu2 %v4836_v47  ;;  %2935 = vmatpush.msrb.mxu3 %v2859_v40  ;;  %v2810_v52 = vld [vmem:[#allocation16 + $0x210] sm:$0xff]  ;;  %v2811_v33 = vld [vmem:[#allocation16 + $0x218] sm:$0xff]  ;;  %v2803_v13 = vld [vmem:[#allocation15 + $0x3e0] sm:$0xff] }
 0x60c   : > { %2912 = vmatpush.msrb.mxu2 %v2870_v56  ;;  %2876 = vmatpush.msrb.mxu0 %v2852_v45  ;;  %v2804_v40 = vld [vmem:[#allocation15 + $0x3e8] sm:$0xff]  ;;  %v2805_v56 = vld [vmem:[#allocation15 + $0x3f0] sm:$0xff]  ;;  %v2806_v45 = vld [vmem:[#allocation15 + $0x3f8] sm:$0xff] }
 0x60d   : > { %2896 = vmatpush.msrb.mxu1 %v2853_v39  ;;  %2936 = vmatpush.msrb.mxu3 %v2855_v60  ;;  %v2799_v39 = vld [vmem:[#allocation15 + $0x3c0] sm:$0xff]  ;;  %v2800_v60 = vld [vmem:[#allocation15 + $0x3c8] sm:$0xff]  ;;  %v3129_v0 = vld [vmem:[#allocation18 + $0x38] sm:$0xff] (%p2514_p1) }
 0x60e   : > { %2913 = vmatpush.msrb.mxu2 %v2866_v38  ;;  %2877 = vmatpush.msrb.mxu0 %v2848_v42  ;;  %v2801_v38 = vld [vmem:[#allocation15 + $0x3d0] sm:$0xff]  ;;  %v2802_v42 = vld [vmem:[#allocation15 + $0x3d8] sm:$0xff] }
 0x60f   : > { %2897 = vmatpush.msrb.mxu1 %v2849_v44  ;;  %2937 = vmatpush.msrb.mxu3 %v2851_v41  ;;  %v2795_v44 = vld [vmem:[#allocation15 + $0x3a0] sm:$0xff]  ;;  %v2796_v41 = vld [vmem:[#allocation15 + $0x3a8] sm:$0xff] }
 0x610   : > { %2914 = vmatpush.msrb.mxu2 %v2862_v28  ;;  %2878 = vmatpush.msrb.mxu0 %v2844_v37  ;;  %v2797_v28 = vld [vmem:[#allocation15 + $0x3b0] sm:$0xff]  ;;  %v2798_v37 = vld [vmem:[#allocation15 + $0x3b8] sm:$0xff] }
 0x611   : > { %2898 = vmatpush.msrb.mxu1 %v2845_v49  ;;  %2938 = vmatpush.msrb.mxu3 %v2847_v43  ;;  %v2791_v49 = vld [vmem:[#allocation15 + $0x380] sm:$0xff]  ;;  %v2792_v43 = vld [vmem:[#allocation15 + $0x388] sm:$0xff] }
 0x612   : > { %2915 = vmatpush.msrb.mxu2 %v2858_v53  ;;  %2879 = vmatpush.msrb.mxu0 %v2840_v36  ;;  %v2793_v53 = vld [vmem:[#allocation15 + $0x390] sm:$0xff]  ;;  %v2794_v36 = vld [vmem:[#allocation15 + $0x398] sm:$0xff] }
 0x613   : > { %2899 = vmatpush.msrb.mxu1 %v2841_v48  ;;  %2939 = vmatpush.msrb.mxu3 %v2843_v55  ;;  %v2787_v48 = vld [vmem:[#allocation15 + $0x360] sm:$0xff]  ;;  %v2788_v55 = vld [vmem:[#allocation15 + $0x368] sm:$0xff] }
 0x614   : > { %2916 = vmatpush.msrb.mxu2 %v2854_v10  ;;  %2880 = vmatpush.msrb.mxu0 %v2836_v6  ;;  %v2789_v10 = vld [vmem:[#allocation15 + $0x370] sm:$0xff]  ;;  %v2790_v6 = vld [vmem:[#allocation15 + $0x378] sm:$0xff] }
 0x615   : > { %2900 = vmatpush.msrb.mxu1 %v2837_v57  ;;  %2940 = vmatpush.msrb.mxu3 %v2839_v20  ;;  %v2783_v57 = vld [vmem:[#allocation15 + $0x340] sm:$0xff]  ;;  %v2784_v20 = vld [vmem:[#allocation15 + $0x348] sm:$0xff] }
 0x616   : > { %2917 = vmatpush.msrb.mxu2 %v2850_v46  ;;  %2881 = vmatpush.msrb.mxu0 %v2832_v18  ;;  %v2785_v46 = vld [vmem:[#allocation15 + $0x350] sm:$0xff] }
 0x617   : > { %2901 = vmatpush.msrb.mxu1 %v2833_v51  ;;  %2941 = vmatpush.msrb.mxu3 %v2835_v26  ;;  %v2781_v18 = vld [vmem:[#allocation15 + $0x330] sm:$0xff]  ;;  %v2782_v51 = vld [vmem:[#allocation15 + $0x338] sm:$0xff]  ;;  %v2776_v26 = vld [vmem:[#allocation15 + $0x308] sm:$0xff] }
 0x618   : > { %2918 = vmatpush.msrb.mxu2 %v2846_v11  ;;  %2882 = vmatpush.msrb.mxu0 %v2828_v35  ;;  %v2786_v11 = vld [vmem:[#allocation15 + $0x358] sm:$0xff]  ;;  %v2777_v35 = vld [vmem:[#allocation15 + $0x310] sm:$0xff] }
 0x619   : > { %2902 = vmatpush.msrb.mxu1 %v2829_v50  ;;  %2942 = vmatpush.msrb.mxu3 %v2831_v17  ;;  %v2778_v50 = vld [vmem:[#allocation15 + $0x318] sm:$0xff]  ;;  %v2772_v17 = vld [vmem:[#allocation15 + $0x2e8] sm:$0xff] }
 0x61a   : > { %2919 = vmatpush.msrb.mxu2 %v2842_v21  ;;  %2883 = vmatpush.msrb.mxu0 %v2824_v63  ;;  %v2779_v21 = vld [vmem:[#allocation15 + $0x320] sm:$0xff]  ;;  %v2773_v63 = vld [vmem:[#allocation15 + $0x2f0] sm:$0xff] }
 0x61b   : > { %2903 = vmatpush.msrb.mxu1 %v2825_v61  ;;  %2943 = vmatpush.msrb.mxu3 %v2827_v22  ;;  %v2774_v61 = vld [vmem:[#allocation15 + $0x2f8] sm:$0xff]  ;;  %v2768_v22 = vld [vmem:[#allocation15 + $0x2c8] sm:$0xff] }
 0x61c   : > { %2920 = vmatpush.msrb.mxu2 %v2838_v12  ;;  %2884 = vmatpush.msrb.mxu0 %v2820_v4  ;;  %v2780_v12 = vld [vmem:[#allocation15 + $0x328] sm:$0xff] }
 0x61d   : > { %2904 = vmatpush.msrb.mxu1 %v2821_v7  ;;  %2944 = vmatpush.msrb.mxu3 %v2823_v19  ;;  %v2769_v7 = vld [vmem:[#allocation15 + $0x2d0] sm:$0xff] }
 0x61e   : > { %2921 = vmatpush.msrb.mxu2 %v2834_v62  ;;  %2885 = vmatpush.msrb.mxu0 %v2816_v30  ;;  %v2775_v62 = vld [vmem:[#allocation15 + $0x300] sm:$0xff] }
 0x61f   : > { %2905 = vmatpush.msrb.mxu1 %v2817_v9  ;;  %2945 = vmatpush.msrb.mxu3 %v2819_v32  ;;  %v2764_v32 = vld [vmem:[#allocation15 + $0x2a8] sm:$0xff] }
 0x620   : > { %2922 = vmatpush.msrb.mxu2 %v2830_v5  ;;  %2886 = vmatpush.msrb.mxu0 %v2812_v29  ;;  %v2771_v5 = vld [vmem:[#allocation15 + $0x2e0] sm:$0xff]  ;;  %v2765_v29 = vld [vmem:[#allocation15 + $0x2b0] sm:$0xff] }
 0x621   : > { %2906 = vmatpush.msrb.mxu1 %v2813_v1  ;;  %2946 = vmatpush.msrb.mxu3 %v2815_v25 }
 0x622   : > { %2923 = vmatpush.msrb.mxu2 %v2826_v59  ;;  %2887 = vmatpush.msrb.mxu0 %v2808_v31  ;;  %v2767_v59 = vld [vmem:[#allocation15 + $0x2c0] sm:$0xff] }
 0x623   : > { %2907 = vmatpush.msrb.mxu1 %v2809_v14  ;;  %2947 = vmatpush.msrb.mxu3 %v2811_v33  ;;  %v2759_v31 = vld [vmem:[#allocation15 + $0x280] sm:$0xff]  ;;  %v2760_v14 = vld [vmem:[#allocation15 + $0x288] sm:$0xff]  ;;  %v2762_v33 = vld [vmem:[#allocation15 + $0x298] sm:$0xff] }
 0x624   : > { %2924 = vmatpush.msrb.mxu2 %v2822_v27  ;;  %2952 = vmatpush.msra.mxu0 %v2803_v13  ;;  %v2770_v27 = vld [vmem:[#allocation15 + $0x2d8] sm:$0xff] }
 0x625   : > { %2972 = vmatpush.msra.mxu1 %v2804_v40  ;;  %3012 = vmatpush.msra.mxu3 %v2806_v45  ;;  %v2755_v40 = vld [vmem:[#allocation15 + $0x260] sm:$0xff] }
 0x626   : > { %2925 = vmatpush.msrb.mxu2 %v2818_v58  ;;  %2953 = vmatpush.msra.mxu0 %v2799_v39  ;;  %v2763_v58 = vld [vmem:[#allocation15 + $0x2a0] sm:$0xff]  ;;  %v2757_v39 = vld [vmem:[#allocation15 + $0x270] sm:$0xff] }
 0x627   : > { %2973 = vmatpush.msra.mxu1 %v2800_v60  ;;  %3013 = vmatpush.msra.mxu3 %v2802_v42  ;;  %v2758_v60 = vld [vmem:[#allocation15 + $0x278] sm:$0xff]  ;;  %v2752_v42 = vld [vmem:[#allocation15 + $0x248] sm:$0xff] }
 0x628   : > { %2926 = vmatpush.msrb.mxu2 %v2814_v2  ;;  %2954 = vmatpush.msra.mxu0 %v2795_v44  ;;  %v2766_v2 = vld [vmem:[#allocation15 + $0x2b8] sm:$0xff] }
 0x629   : > { %2974 = vmatpush.msra.mxu1 %v2796_v41  ;;  %3014 = vmatpush.msra.mxu3 %v2798_v37  ;;  %v2753_v41 = vld [vmem:[#allocation15 + $0x250] sm:$0xff] }
 0x62a   : > { %2927 = vmatpush.msrb.mxu2 %v2810_v52  ;;  %2955 = vmatpush.msra.mxu0 %v2791_v49  ;;  %v2761_v52 = vld [vmem:[#allocation15 + $0x290] sm:$0xff]  ;;  %v2747_v49 = vld [vmem:[#allocation15 + $0x220] sm:$0xff] }
 0x62b   : > { %2975 = vmatpush.msra.mxu1 %v2792_v43  ;;  %3015 = vmatpush.msra.mxu3 %v2794_v36  ;;  %v2748_v43 = vld [vmem:[#allocation15 + $0x228] sm:$0xff] }
 0x62c   : > { %2992 = vmatpush.msra.mxu2 %v2805_v56  ;;  %2956 = vmatpush.msra.mxu0 %v2787_v48  ;;  %v2756_v56 = vld [vmem:[#allocation15 + $0x268] sm:$0xff]  ;;  %v2749_v48 = vld [vmem:[#allocation15 + $0x230] sm:$0xff] }
 0x62d   : > { %2976 = vmatpush.msra.mxu1 %v2788_v55  ;;  %3016 = vmatpush.msra.mxu3 %v2790_v6  ;;  %v2750_v55 = vld [vmem:[#allocation15 + $0x238] sm:$0xff]  ;;  %v2743_v6 = vld [vmem:[#allocation15 + $0x200] sm:$0xff] }
 0x62e   : > { %2993 = vmatpush.msra.mxu2 %v2801_v38  ;;  %2957 = vmatpush.msra.mxu0 %v2783_v57  ;;  %v2751_v38 = vld [vmem:[#allocation15 + $0x240] sm:$0xff]  ;;  %v2744_v57 = vld [vmem:[#allocation15 + $0x208] sm:$0xff] }
 0x62f   : > { %2977 = vmatpush.msra.mxu1 %v2784_v20  ;;  %3017 = vmatpush.msra.mxu3 %v2786_v11  ;;  %v2745_v20 = vld [vmem:[#allocation15 + $0x210] sm:$0xff] }
 0x630   : > { %2994 = vmatpush.msra.mxu2 %v2797_v28  ;;  %2958 = vmatpush.msra.mxu0 %v2779_v21  ;;  %v2754_v28 = vld [vmem:[#allocation15 + $0x258] sm:$0xff] }
 0x631   : > { %2978 = vmatpush.msra.mxu1 %v2780_v12  ;;  %3018 = vmatpush.msra.mxu3 %v2782_v51 }
 0x632   : > { %2995 = vmatpush.msra.mxu2 %v2793_v53  ;;  %2959 = vmatpush.msra.mxu0 %v2775_v62 }
 0x633   : > { %2979 = vmatpush.msra.mxu1 %v2776_v26  ;;  %3019 = vmatpush.msra.mxu3 %v2778_v50 }
 0x634   : > { %2996 = vmatpush.msra.mxu2 %v2789_v10  ;;  %2960 = vmatpush.msra.mxu0 %v2771_v5 }
 0x635   : > { %2980 = vmatpush.msra.mxu1 %v2772_v17  ;;  %3020 = vmatpush.msra.mxu3 %v2774_v61 }
 0x636   : > { %2997 = vmatpush.msra.mxu2 %v2785_v46  ;;  %2961 = vmatpush.msra.mxu0 %v2767_v59  ;;  %v2746_v46 = vld [vmem:[#allocation15 + $0x218] sm:$0xff] }
 0x637   : > { %2981 = vmatpush.msra.mxu1 %v2768_v22  ;;  %3021 = vmatpush.msra.mxu3 %v2770_v27 }
 0x638   : > { %2998 = vmatpush.msra.mxu2 %v2781_v18  ;;  %2962 = vmatpush.msra.mxu0 %v2763_v58 }
 0x639   : > { %2982 = vmatpush.msra.mxu1 %v2764_v32  ;;  %3022 = vmatpush.msra.mxu3 %v2766_v2 }
 0x63a   : > { %2999 = vmatpush.msra.mxu2 %v2777_v35  ;;  %2963 = vmatpush.msra.mxu0 %v2759_v31 }
 0x63b   : > { %2983 = vmatpush.msra.mxu1 %v2760_v14  ;;  %3023 = vmatpush.msra.mxu3 %v2762_v33 }
 0x63c   : > { %3000 = vmatpush.msra.mxu2 %v2773_v63  ;;  %2888 = vmatmul.f32.vlgmr.msrb.gmra.mxu0 %v4828_v54 }
 0x63d   : > { %2908 = vmatmul.f32.vlgmr.msrb.gmra.mxu1 %v4828_v54  ;;  %2928 = vmatmul.f32.vlgmr.msrb.gmra.mxu2 %v4828_v54 }
 0x63e   : > { %3001 = vmatpush.msra.mxu2 %v2769_v7  ;;  %2948 = vmatmul.f32.vlgmr.msrb.gmra.mxu3 %v4828_v54 }
 0x63f   : > { %2964 = vmatpush.msra.mxu0 %v2755_v40  ;;  %2984 = vmatpush.msra.mxu1 %v2756_v56 }
 0x640   : > { %3002 = vmatpush.msra.mxu2 %v2765_v29  ;;  %3024 = vmatpush.msra.mxu3 %v2758_v60 }
 0x641   : > { %2965 = vmatpush.msra.mxu0 %v2751_v38  ;;  %2985 = vmatpush.msra.mxu1 %v2752_v42 }
 0x642   : > { %3003 = vmatpush.msra.mxu2 %v2761_v52  ;;  %3025 = vmatpush.msra.mxu3 %v2754_v28 }
 0x643   : > { %2966 = vmatpush.msra.mxu0 %v2747_v49  ;;  %2986 = vmatpush.msra.mxu1 %v2748_v43  ;;  %v3033_v43 = vperm.slane %v5069_v3, 0 }
 0x644   : > { %3004 = vmatpush.msra.mxu2 %v2757_v39  ;;  %3026 = vmatpush.msra.mxu3 %v2750_v55 }
 0x645   : > { %2967 = vmatpush.msra.mxu0 %v2743_v6  ;;  %2987 = vmatpush.msra.mxu1 %v2744_v57 }
 0x646   : > { %3005 = vmatpush.msra.mxu2 %v2753_v41  ;;  %3027 = vmatpush.msra.mxu3 %v2746_v46 }
 0x648   : > { %3006 = vmatpush.msra.mxu2 %v2749_v48 }
 0x64a   : > { %3007 = vmatpush.msra.mxu2 %v2745_v20 }
 0x67e   : > { %v2605_v4 = vpop.f32.mrf.mxu0 }
 0x67f   : > { %v2668_v19 = vadd.f32 %v2605_v4, %v5818_v8  ;;  %v2625_v30 = vpop.f32.mrf.mxu1  ;;  %v3125_v8 = vld [vmem:[#allocation18 + $0x18] sm:$0xff] (%p2514_p1) }
 0x680   : > { %v2669_v9 = vadd.f32 %v2625_v30, %v5820_v34  ;;  %v3124_v34 = vld [vmem:[#allocation18 + $0x10] sm:$0xff] (%p2514_p1) }
 0x681   : > { %v4121_v1 = vmul.f32 -1.442695, %v2668_v19 }
 0x682   : > { %v4122_v25 = vmul.f32 -1.442695, %v2669_v9 }
 0x683   : > { %4393 = vpow2.f32 %v4121_v1 }
 0x684   : > { %4395 = vpow2.f32 %v4122_v25  ;;  %v5861_v25 = vpop.permute.xlu0 %2737 }
 0x685   : > { %v2665_v13 = vpop.f32.mrf.mxu3  ;;  %vm2739_vm5 = vcmp.eq.s32.totalorder %v5861_v25, 1  ;;  %v3137_v25 = vld [vmem:[#allocation18 + $0x78] sm:$0xff] (%p2514_p1) }
 0x686   : > { %v2671_v45 = vadd.f32 %v2665_v13, %v5816_v15  ;;  %v3126_v15 = vld [vmem:[#allocation18 + $0x20] sm:$0xff] (%p2514_p1) }
 0x688   : > { %v4123_v44 = vmul.f32 -1.442695, %v2671_v45 }
 0x689   : > { %v4394_v37 = vpop.eup %4393 }
 0x68a   : > { %v4396_v53 = vpop.eup %4395  ;;  %v2675_v36 = vadd.f32 1.0, %v4394_v37  ;;  %4397 = vpow2.f32 %v4123_v44 }
 0x68b   : > { %v2694_v10 = vadd.f32 1.0, %v4396_v53  ;;  %v3034_v53 = vperm.slane %v5069_v3, 1 }
 0x68c   : > { %4399 = vrcp.f32 %v2675_v36  ;;  %v2687_v17 = vand.u32 2147483648, %v2675_v36  ;;  %v2685_v61 = vand.u32 2147483647, %v2675_v36  ;;  %vm2681_vm15 = vweird.f32 %v2675_v36 }
 0x68d   : > { %4401 = vrcp.f32 %v2694_v10  ;;  %v2706_v59 = vand.u32 2147483648, %v2694_v10  ;;  %v2704_v4 = vand.u32 2147483647, %v2694_v10  ;;  %vm2700_vm1 = vweird.f32 %v2694_v10 }
 0x68e   : > { %v2645_v11 = vpop.f32.mrf.mxu2  ;;  %v2688_v9 = vor.u32 1.1754944e-38, %v2687_v17  ;;  %vm2686_vm2 = vcmp.eq.f32.partialorder %v2685_v61, 8.507059e+37  ;;  %v3035_v61 = vperm.slane %v5069_v3, 2 }
 0x68f   : > { %v2670_v12 = vadd.f32 %v2645_v11, %v5814_v24  ;;  %v2707_v29 = vor.u32 1.1754944e-38, %v2706_v59  ;;  %vm2705_vm4 = vcmp.eq.f32.partialorder %v2704_v4, 8.507059e+37  ;;  %v3127_v24 = vld [vmem:[#allocation18 + $0x28] sm:$0xff] (%p2514_p1) }
 0x690   : > { %v4398_v21 = vpop.eup %4397 }
 0x691   : > { %v2714_v18 = vadd.f32 1.0, %v4398_v21  ;;  %v3036_v21 = vperm.slane %v5069_v3, 3  ;;  %v3128_v3 = vld [vmem:[#allocation18 + $0x30] sm:$0xff] (%p2514_p1) }
 0x692   : > { %v4400_v51 = vpop.eup %4399 }
 0x693   : > { %v4402_v62 = vpop.eup %4401  ;;  %v2677_v26 = vmul.f32 %v4400_v51, %v2675_v36  ;;  %4403 = vrcp.f32 %v2714_v18  ;;  %vm2682_vm13 = vweird.f32 %v4400_v51  ;;  %v2726_v45 = vand.u32 2147483648, %v2714_v18 }
 0x694   : > { %v2696_v35 = vmul.f32 %v4402_v62, %v2694_v10  ;;  %4405 = vtanh.f32 %v2670_v12  ;;  %vm2701_vm14 = vweird.f32 %v4402_v62  ;;  %vm2683_vm0 = vmor %vm2681_vm15, %vm2682_vm13  ;;  %vm2720_vm7 = vweird.f32 %v2714_v18 }
 0x695   : > { %v2678_v50 = vsub.f32 1.0, %v2677_v26  ;;  %vm2702_vm3 = vmor %vm2700_vm1, %vm2701_vm14  ;;  %v2724_v39 = vand.u32 2147483647, %v2714_v18  ;;  %v2727_v38 = vor.u32 1.1754944e-38, %v2726_v45 }
 0x696   : > { %v2697_v5 = vsub.f32 1.0, %v2696_v35 }
 0x697   : > { %v2679_v63 = vmul.f32 %v4400_v51, %v2678_v50  ;;  %vm2725_vm9 = vcmp.eq.f32.partialorder %v2724_v39, 8.507059e+37 }
 0x698   : > { %v2698_v22 = vmul.f32 %v4402_v62, %v2697_v5 }
 0x699   : > { %v4404_v7 = vpop.eup %4403  ;;  %v2680_v27 = vadd.f32 %v4400_v51, %v2679_v63 }
 0x69a   : > { %v4406_v19 = vpop.eup %4405  ;;  %v2716_v30 = vmul.f32 %v4404_v7, %v2714_v18  ;;  %v2699_v58 = vadd.f32 %v4402_v62, %v2698_v22  ;;  %vm2721_vm6 = vweird.f32 %v4404_v7 }
 0x69b   : > { %v2684_v32 = vsel %vm2683_vm0, %v4400_v51, %v2680_v27  ;;  %vm2722_vm8 = vmor %vm2720_vm7, %vm2721_vm6 }
 0x69c   : > { %v2717_v1 = vsub.f32 1.0, %v2716_v30  ;;  %v2689_v2 = vsel %vm2686_vm2, %v2688_v9, %v2684_v32  ;;  %v2703_v31 = vsel %vm2702_vm3, %v4402_v62, %v2699_v58 }
 0x69d   : > { %v2731_v14 = vmul.f32 %v4406_v19, %v2689_v2  ;;  %v2708_v52 = vsel %vm2705_vm4, %v2707_v29, %v2703_v31 }
 0x69e   : > { %v2730_v33 = vmul.f32 %v4832_v16, %v2708_v52  ;;  %v2718_v13 = vmul.f32 %v4404_v7, %v2717_v1 }
 0x6a0   : > { %v2732_v40 = vadd.f32 %v2731_v14, %v2730_v33  ;;  %v2719_v56 = vadd.f32 %v4404_v7, %v2718_v13 }
 0x6a2   : > { %4407 = vtanh.f32 %v2732_v40  ;;  %v5868_v16 = vsel %vm2739_vm5, %v2732_v40, %v4832_v16   ;;  %v2723_v60 = vsel %vm2722_vm8, %v4404_v7, %v2719_v56 }
 0x6a3   : > { %v2728_v44 = vsel %vm2725_vm9, %v2727_v38, %v2723_v60 }
 0x6a8   : > { %v4408_v42 = vpop.eup %4407 }
 0x6a9   : > { %v2734_v41 = vmul.f32 %v4408_v42, %v2728_v44 }
 0x6ab   : > { %v5873_v47 = vsel %vm2739_vm5, %v2734_v41, %v4836_v47  }
 0x6ac   : > { %2968 = vmatmul.f32.vlgmr.msra.gmra.mxu0 %v5873_v47  ;;  %2988 = vmatmul.f32.vlgmr.msra.gmra.mxu1 %v5873_v47 }
 0x6ad   : > { %3008 = vmatmul.f32.vlgmr.msra.gmra.mxu2 %v5873_v47  ;;  %3028 = vmatmul.f32.vlgmr.msra.gmra.mxu3 %v5873_v47  ;;  %v3131_v47 = vld [vmem:[#allocation18 + $0x48] sm:$0xff] (%p2514_p1) }
 0x6ae   :  { %3142 = vmatpush.msra.mxu0 (%p2514_p1), %v3137_v25  ;;  %4176 = vmatpush.msra.mxu3 (%p2514_p1), %v3137_v25  ;;  %v3537_v25 = vld [vmem:[#allocation19 + $0x10] sm:$0xff] (%p2514_p1) }
 0x6b9   : > { %v2889_v28 = vpop.f32.mrf.mxu0 }
 0x6ba   : > { %v2909_v37 = vpop.f32.mrf.mxu1 }
 0x6c0   : > { %v2929_v20 = vpop.f32.mrf.mxu2 }
 0x6c1   : > { %v2949_v49 = vpop.f32.mrf.mxu3 }
 0x729   : > { %v2969_v36 = vpop.f32.mrf.mxu0  ;;  %v2989_v48 = vpop.f32.mrf.mxu1 }
 0x72a   : > { %v2970_v55 = vadd.f32 %v2969_v36, %v2889_v28  ;;  %v2990_v10 = vadd.f32 %v2989_v48, %v2909_v37 }
 0x72c   : > { %v3041_v6 = vadd.f32 %v3033_v43, %v2970_v55  ;;  %v3042_v57 = vadd.f32 %v3034_v53, %v2990_v10 }
 0x72e   : > { %v4124_v46 = vmul.f32 -1.442695, %v3041_v6  ;;  %v4125_v11 = vmul.f32 -1.442695, %v3042_v57 }
 0x730   : > { %4409 = vpow2.f32 %v4124_v46  ;;  %v3029_v12 = vpop.f32.mrf.mxu3  ;;  %v3009_v17 = vpop.f32.mrf.mxu2 }
 0x731   : > { %4411 = vpow2.f32 %v4125_v11  ;;  %v3030_v18 = vadd.f32 %v3029_v12, %v2949_v49  ;;  %v3010_v63 = vadd.f32 %v3009_v17, %v2929_v20  ;;  %v3136_v11 = vld [vmem:[#allocation18 + $0x70] sm:$0xff] (%p2514_p1)  ;;  %v3134_v12 = vld [vmem:[#allocation18 + $0x60] sm:$0xff] (%p2514_p1) }
 0x732   :  { %3143 = vmatpush.msra.mxu0 (%p2514_p1), %v3136_v11  ;;  %4177 = vmatpush.msra.mxu3 (%p2514_p1), %v3136_v11 }
 0x733   : > { %v3044_v51 = vadd.f32 %v3036_v21, %v3030_v18  ;;  %v3043_v7 = vadd.f32 %v3035_v61, %v3010_v63  ;;  %v3135_v21 = vld [vmem:[#allocation18 + $0x68] sm:$0xff] (%p2514_p1)  ;;  %v3133_v18 = vld [vmem:[#allocation18 + $0x58] sm:$0xff] (%p2514_p1) }
 0x734   :  { %3144 = vmatpush.msra.mxu0 (%p2514_p1), %v3135_v21  ;;  %4178 = vmatpush.msra.mxu3 (%p2514_p1), %v3135_v21 }
 0x735   : > { %v4126_v62 = vmul.f32 -1.442695, %v3044_v51  ;;  %v3132_v51 = vld [vmem:[#allocation18 + $0x50] sm:$0xff] (%p2514_p1) }
 0x736   : > { %v4410_v26 = vpop.eup %4409  ;;  %3145 = vmatpush.msra.mxu0 (%p2514_p1), %v3134_v12  ;;  %4179 = vmatpush.msra.mxu3 (%p2514_p1), %v3134_v12 }
 0x737   : > { %v4412_v35 = vpop.eup %4411  ;;  %v3048_v50 = vadd.f32 1.0, %v4410_v26  ;;  %4413 = vpow2.f32 %v4126_v62  ;;  %v3130_v62 = vld [vmem:[#allocation18 + $0x40] sm:$0xff] (%p2514_p1) }
 0x738   : > { %v3067_v5 = vadd.f32 1.0, %v4412_v35  ;;  %3146 = vmatpush.msra.mxu0 (%p2514_p1), %v3133_v18  ;;  %4180 = vmatpush.msra.mxu3 (%p2514_p1), %v3133_v18 }
 0x739   : > { %4415 = vrcp.f32 %v3048_v50  ;;  %v3060_v32 = vand.u32 2147483648, %v3048_v50  ;;  %v3058_v2 = vand.u32 2147483647, %v3048_v50  ;;  %vm3054_vm11 = vweird.f32 %v3048_v50 }
 0x73a   : > { %4417 = vrcp.f32 %v3067_v5  ;;  %v3079_v29 = vand.u32 2147483648, %v3067_v5  ;;  %v3077_v14 = vand.u32 2147483647, %v3067_v5  ;;  %vm3073_vm13 = vweird.f32 %v3067_v5  ;;  %3147 = vmatpush.msra.mxu0 (%p2514_p1), %v3132_v51  ;;  %4181 = vmatpush.msra.mxu3 (%p2514_p1), %v3132_v51  ;;  %v3536_v51 = vld [vmem:[#allocation19 + $0x8] sm:$0xff] (%p2514_p1) }
 0x73b   : > { %v3061_v13 = vor.u32 1.1754944e-38, %v3060_v32  ;;  %vm3059_vm0 = vcmp.eq.f32.partialorder %v3058_v2, 8.507059e+37 }
 0x73c   : > { %v3080_v45 = vor.u32 1.1754944e-38, %v3079_v29  ;;  %vm3078_vm1 = vcmp.eq.f32.partialorder %v3077_v14, 8.507059e+37  ;;  %3148 = vmatpush.msra.mxu0 (%p2514_p1), %v3131_v47  ;;  %4182 = vmatpush.msra.mxu3 (%p2514_p1), %v3131_v47  ;;  %v3544_v29 = vld [vmem:[#allocation19 + $0x48] sm:$0xff] (%p2514_p1) }
 0x73d   : > { %v4414_v59 = vpop.eup %4413 }
 0x73e   : > { %v3087_v22 = vadd.f32 1.0, %v4414_v59  ;;  %3149 = vmatpush.msra.mxu0 (%p2514_p1), %v3130_v62  ;;  %4183 = vmatpush.msra.mxu3 (%p2514_p1), %v3130_v62  ;;  %v3550_v59 = vld [vmem:[#allocation19 + $0x78] sm:$0xff] (%p2514_p1) }
 0x73f   : > { %v4416_v4 = vpop.eup %4415  ;;  %3555 = vmatpush.msra.mxu1 (%p2514_p1), %v3550_v59 }
 0x740   : > { %v4418_v27 = vpop.eup %4417  ;;  %v3050_v19 = vmul.f32 %v4416_v4, %v3048_v50  ;;  %4419 = vrcp.f32 %v3087_v22  ;;  %vm3055_vm10 = vweird.f32 %v4416_v4  ;;  %v3099_v36 = vand.u32 2147483648, %v3087_v22  ;;  %3150 = vmatpush.msra.mxu0 (%p2514_p1), %v3129_v0  ;;  %4184 = vmatpush.msra.mxu3 (%p2514_p1), %v3129_v0 }
 0x741   : > { %v3069_v30 = vmul.f32 %v4418_v27, %v3067_v5  ;;  %4421 = vtanh.f32 %v3043_v7  ;;  %vm3074_vm12 = vweird.f32 %v4418_v27  ;;  %vm3056_vm14 = vmor %vm3054_vm11, %vm3055_vm10  ;;  %vm3093_vm3 = vweird.f32 %v3087_v22  ;;  %v5909_v7 = vld [vmem:[%s6430_s19] ss:$0 sm:$0xff] (%p2514_p1) }
 0x742   : > { %v3051_v9 = vsub.f32 1.0, %v3050_v19  ;;  %vm3075_vm15 = vmor %vm3073_vm13, %vm3074_vm12  ;;  %v3097_v48 = vand.u32 2147483647, %v3087_v22  ;;  %v3100_v10 = vor.u32 1.1754944e-38, %v3099_v36  ;;  %3151 = vmatpush.msra.mxu0 (%p2514_p1), %v3128_v3  ;;  %4185 = vmatpush.msra.mxu3 (%p2514_p1), %v3128_v3 }
 0x743   : > { %v3070_v58 = vsub.f32 1.0, %v3069_v30  ;;  %v3546_v30 = vld [vmem:[#allocation19 + $0x58] sm:$0xff] (%p2514_p1) }
 0x744   : > { %v3052_v1 = vmul.f32 %v4416_v4, %v3051_v9  ;;  %vm3098_vm6 = vcmp.eq.f32.partialorder %v3097_v48, 8.507059e+37  ;;  %3152 = vmatpush.msra.mxu0 (%p2514_p1), %v3127_v24  ;;  %4186 = vmatpush.msra.mxu3 (%p2514_p1), %v3127_v24 }
 0x745   : > { %v3071_v31 = vmul.f32 %v4418_v27, %v3070_v58  ;;  %v3545_v58 = vld [vmem:[#allocation19 + $0x50] sm:$0xff] (%p2514_p1) }
 0x746   : > { %v4420_v52 = vpop.eup %4419  ;;  %v3053_v33 = vadd.f32 %v4416_v4, %v3052_v1  ;;  %3153 = vmatpush.msra.mxu0 (%p2514_p1), %v3126_v15  ;;  %4187 = vmatpush.msra.mxu3 (%p2514_p1), %v3126_v15  ;;  %v3535_v15 = vld [vmem:[#allocation19] sm:$0xff] (%p2514_p1) }
 0x747   : > { %v3072_v40 = vadd.f32 %v4418_v27, %v3071_v31  ;;  %v3089_v56 = vmul.f32 %v4420_v52, %v3087_v22  ;;  %v4422_v60 = vpop.eup %4421  ;;  %vm3094_vm2 = vweird.f32 %v4420_v52  ;;  %v3549_v22 = vld [vmem:[#allocation19 + $0x70] sm:$0xff] (%p2514_p1)  ;;  %v3543_v31 = vld [vmem:[#allocation19 + $0x40] sm:$0xff] (%p2514_p1) }
 0x748   : > { %v3057_v39 = vsel %vm3056_vm14, %v4416_v4, %v3053_v33  ;;  %vm3095_vm4 = vmor %vm3093_vm3, %vm3094_vm2  ;;  %3154 = vmatpush.msra.mxu0 (%p2514_p1), %v3125_v8  ;;  %4188 = vmatpush.msra.mxu3 (%p2514_p1), %v3125_v8  ;;  %v3548_v4 = vld [vmem:[#allocation19 + $0x68] sm:$0xff] (%p2514_p1) }
 0x749   : > { %v3062_v38 = vsel %vm3059_vm0, %v3061_v13, %v3057_v39  ;;  %v3076_v42 = vsel %vm3075_vm15, %v4418_v27, %v3072_v40  ;;  %v3090_v44 = vsub.f32 1.0, %v3089_v56  ;;  %3556 = vmatpush.msra.mxu1 (%p2514_p1), %v3549_v22  ;;  %v3547_v27 = vld [vmem:[#allocation19 + $0x60] sm:$0xff] (%p2514_p1)  ;;  %v3542_v13 = vld [vmem:[#allocation19 + $0x38] sm:$0xff] (%p2514_p1) }
 0x74a   : > { %v3081_v41 = vsel %vm3078_vm1, %v3080_v45, %v3076_v42  ;;  %v3104_v28 = vmul.f32 %v4422_v60, %v3062_v38  ;;  %3155 = vmatpush.msra.mxu0 (%p2514_p1), %v3124_v34  ;;  %4189 = vmatpush.msra.mxu3 (%p2514_p1), %v3124_v34  ;;  %v3541_v45 = vld [vmem:[#allocation19 + $0x30] sm:$0xff] (%p2514_p1)  ;;  %v3540_v42 = vld [vmem:[#allocation19 + $0x28] sm:$0xff] (%p2514_p1) }
 0x74b   : > { %v3103_v37 = vmul.f32 %v4824_v23, %v3081_v41  ;;  %v3091_v49 = vmul.f32 %v4420_v52, %v3090_v44  ;;  %3557 = vmatpush.msra.mxu1 (%p2514_p1), %v3548_v4 }
 0x74d   : > { %v3105_v43 = vadd.f32 %v3104_v28, %v3103_v37  ;;  %v3092_v53 = vadd.f32 %v4420_v52, %v3091_v49  ;;  %3558 = vmatpush.msra.mxu1 (%p2514_p1), %v3547_v27  ;;  %v3539_v49 = vld [vmem:[#allocation19 + $0x20] sm:$0xff] (%p2514_p1) }
 0x74f   : > { %4423 = vtanh.f32 %v3105_v43  ;;  %v3109_v23 = vsel %vm2739_vm5, %v3105_v43, %v4824_v23   ;;  %v3096_v55 = vsel %vm3095_vm4, %v4420_v52, %v3092_v53  ;;  %3559 = vmatpush.msra.mxu1 (%p2514_p1), %v3546_v30 }
 0x750   : > { %v3101_v57 = vsel %vm3098_vm6, %v3100_v10, %v3096_v55  ;;  %v3123_v23 = vld [vmem:[#allocation18 + $0x8] sm:$0xff] (%p2514_p1)  ;;  %v3538_v55 = vld [vmem:[#allocation19 + $0x18] sm:$0xff] (%p2514_p1) }
 0x751   :  { %3156 = vmatpush.msra.mxu0 (%p2514_p1), %v3123_v23  ;;  %4190 = vmatpush.msra.mxu3 (%p2514_p1), %v3123_v23 }
 0x752   :  { %3560 = vmatpush.msra.mxu1 (%p2514_p1), %v3545_v58 }
 0x754   :  { %3561 = vmatpush.msra.mxu1 (%p2514_p1), %v3544_v29 }
 0x755   : > { %v4424_v6 = vpop.eup %4423  ;;  %2516 = sbr.rel (!%p2514_p1) target bundleno = 1505 (0x5e1), region = 193 }
 0x756   : > { %v3107_v20 = vmul.f32 %v4424_v6, %v3101_v57  ;;  %3562 = vmatpush.msra.mxu1 (%p2514_p1), %v3543_v31 }
 0x758   : > { %v3108_v54 = vsel %vm2739_vm5, %v3107_v20, %v4828_v54   ;;  %v3110_v46 = vsel %vm2739_vm5, %v3107_v20, 0.0  ;;  %3563 = vmatpush.msra.mxu1 (%p2514_p1), %v3542_v13 }
 0x759   : > { %3113 = vst [vmem:[%s3112_s27] sm:$0xff] %v3110_v46  ;;  %v3122_v54 = vld [vmem:[#allocation18] sm:$0xff] (%p2514_p1) }
 0x75a   :  { %3157 = vmatpush.msra.mxu0 %v3122_v54  ;;  %4191 = vmatpush.msra.mxu3 %v3122_v54 }
 0x75b   :  { %3564 = vmatpush.msra.mxu1 %v3541_v45 }
 0x75c   :  { %4192 = vmatpush.msrb.mxu3 %v3550_v59 }
 0x75d   :  { %3565 = vmatpush.msra.mxu1 %v3540_v42 }
 0x75e   :  { %4193 = vmatpush.msrb.mxu3 %v3549_v22 }
 0x75f   :  { %3566 = vmatpush.msra.mxu1 %v3539_v49 }
 0x760   :  { %v3114_v16 = vld [vmem:[#allocation3] sm:$0xff]  ;;  %v3120_v26 = vld [vmem:[#allocation3 + $0x30] sm:$0xff]  ;;  %v3115_v35 = vld [vmem:[#allocation3 + $0x8] sm:$0xff]  ;;  %4194 = vmatpush.msrb.mxu3 %v3548_v4 }
 0x761   :  { %3158 = vmatmul.f32.vlgmr.msra.gmra.mxu0 %v3114_v16  ;;  %3176 = vmatmul.f32.vlgmr.msra.gmra.mxu3 %v3120_v26  ;;  %v3121_v50 = vld [vmem:[#allocation3 + $0x38] sm:$0xff]  ;;  %v3116_v5 = vld [vmem:[#allocation3 + $0x10] sm:$0xff]  ;;  %v3118_v63 = vld [vmem:[#allocation3 + $0x20] sm:$0xff] }
 0x762   :  { %v3117_v17 = vld [vmem:[#allocation3 + $0x18] sm:$0xff]  ;;  %v3119_v61 = vld [vmem:[#allocation3 + $0x28] sm:$0xff]  ;;  %4195 = vmatpush.msrb.mxu3 %v3547_v27  ;;  %3567 = vmatpush.msra.mxu1 %v3538_v55 }
 0x764   :  { %4196 = vmatpush.msrb.mxu3 %v3546_v30  ;;  %3568 = vmatpush.msra.mxu1 %v3537_v25 }
 0x766   :  { %4197 = vmatpush.msrb.mxu3 %v3545_v58  ;;  %3569 = vmatpush.msra.mxu1 %v3536_v51 }
 0x768   :  { %4198 = vmatpush.msrb.mxu3 %v3544_v29  ;;  %3570 = vmatpush.msra.mxu1 %v3535_v15 }
 0x769   :  { %3161 = vmatmul.f32.gmra.mxu0 %v3115_v35  ;;  %3179 = vmatmul.f32.gmra.mxu3 %v3121_v50 }
 0x76a   :  { %4199 = vmatpush.msrb.mxu3 %v3543_v31 }
 0x76c   :  { %4200 = vmatpush.msrb.mxu3 %v3542_v13 }
 0x76e   :  { %4201 = vmatpush.msrb.mxu3 %v3541_v45 }
 0x770   :  { %4202 = vmatpush.msrb.mxu3 %v3540_v42 }
 0x771   :  { %3164 = vmatmul.f32.gmra.mxu0 %v3116_v5 }
 0x772   :  { %4203 = vmatpush.msrb.mxu3 %v3539_v49 }
 0x774   :  { %4204 = vmatpush.msrb.mxu3 %v3538_v55 }
 0x776   :  { %4205 = vmatpush.msrb.mxu3 %v3537_v25 }
 0x778   :  { %4206 = vmatpush.msrb.mxu3 %v3536_v51 }
 0x779   :  { %3167 = vmatmul.f32.gmra.mxu0 %v3117_v17 }
 0x77a   :  { %4207 = vmatpush.msrb.mxu3 %v3535_v15 }
 0x781   :  { %3170 = vmatmul.f32.gmra.mxu0 %v3118_v63 }
 0x789   :  { %3173 = vmatmul.f32.gmra.mxu0 %v3119_v61 }
 0x7de   :  { %v3159_v19 = vpop.f32.mrf.mxu0 }
 0x7df   :  { %v5912_v9 = vadd.f32 %v5909_v7, %v3159_v19 }
 0x7e1   :  { %v5915_v32 = vmul.f32 0.70710677, %v5912_v9 }
 0x7e3   :  { %v3199_v1 = vmul.f32 %v5915_v32, %v5915_v32 }
 0x7e4   :  { %v3177_v2 = vpop.f32.mrf.mxu3 }
 0x7e5   :  { %v5919_v14 = vmin.f32 %v3199_v1, 16.0  ;;  %v5922_v52 = vadd.f32 %v5909_v7, %v3177_v2 }
 0x7e6   :  { %v3162_v33 = vpop.f32.mrf.mxu0 }
 0x7e7   :  { %v3201_v40 = vmul.f32 2.1237322e-06, %v5919_v14  ;;  %v5926_v56 = vadd.f32 %v5909_v7, %v3162_v33  ;;  %v3212_v39 = vmul.f32 3.8918573e-05, %v5919_v14  ;;  %v5961_v8 = vmul.f32 0.70710677, %v5922_v52 }
 0x7e9   :  { %v3202_v60 = vadd.f32 0.00028619796, %v3201_v40  ;;  %v5930_v38 = vmul.f32 0.70710677, %v5926_v56  ;;  %v3213_v44 = vadd.f32 0.001143296, %v3212_v39  ;;  %v3439_v19 = vmul.f32 %v5961_v8, %v5961_v8 }
 0x7eb   :  { %v3203_v41 = vmul.f32 %v3202_v60, %v5919_v14  ;;  %v3239_v28 = vmul.f32 %v5930_v38, %v5930_v38  ;;  %v3214_v43 = vmul.f32 %v3213_v44, %v5919_v14  ;;  %v5989_v44 = vmin.f32 %v3439_v19, 16.0 }
 0x7ec   :  { %v3180_v37 = vpop.f32.mrf.mxu3  ;;  %v6021_v19 = vmul.f32 0.5, %v5912_v9 }
 0x7ed   :  { %v5936_v53 = vmin.f32 %v3239_v28, 16.0  ;;  %v5939_v36 = vadd.f32 %v5909_v7, %v3180_v37  ;;  %v3215_v10 = vadd.f32 0.014752088, %v3214_v43  ;;  %v3204_v6 = vadd.f32 0.0036580483, %v3203_v41 }
 0x7ee   :  { %v3165_v48 = vpop.f32.mrf.mxu0  ;;  %v3441_v25 = vmul.f32 2.1237322e-06, %v5989_v44 }
 0x7ef   :  { %v3241_v57 = vmul.f32 2.1237322e-06, %v5936_v53  ;;  %v5943_v20 = vmul.f32 0.70710677, %v5939_v36  ;;  %v5946_v46 = vadd.f32 %v5909_v7, %v3165_v48  ;;  %v3216_v11 = vmul.f32 %v3215_v10, %v5919_v14 }
 0x7f0   :  { %v3205_v47 = vmul.f32 %v3204_v6, %v5919_v14  ;;  %v3252_v4 = vmul.f32 3.8918573e-05, %v5936_v53 }
 0x7f1   :  { %v3242_v21 = vadd.f32 0.00028619796, %v3241_v57  ;;  %v3479_v12 = vmul.f32 %v5943_v20, %v5943_v20  ;;  %v5952_v18 = vmul.f32 0.70710677, %v5946_v46  ;;  %v3217_v0 = vadd.f32 0.112945676, %v3216_v11 }
 0x7f2   :  { %v3206_v16 = vadd.f32 0.05243302, %v3205_v47  ;;  %v3253_v60 = vadd.f32 0.001143296, %v3252_v4  ;;  %v3452_v11 = vmul.f32 3.8918573e-05, %v5989_v44 }
 0x7f3   :  { %v3243_v62 = vmul.f32 %v3242_v21, %v5936_v53  ;;  %v5956_v3 = vmin.f32 %v3479_v12, 16.0  ;;  %v3279_v24 = vmul.f32 %v5952_v18, %v5952_v18  ;;  %v3218_v50 = vmul.f32 %v3217_v0, %v5919_v14 }
 0x7f4   :  { %v3207_v27 = vmul.f32 %v3206_v16, %v5919_v14  ;;  %v3254_v57 = vmul.f32 %v3253_v60, %v5936_v53 }
 0x7f5   :  { %v3481_v34 = vmul.f32 2.1237322e-06, %v5956_v3  ;;  %v3492_v23 = vmul.f32 3.8918573e-05, %v5956_v3  ;;  %v3244_v26 = vadd.f32 0.0036580483, %v3243_v62 }
 0x7f6   :  { %v3168_v54 = vpop.f32.mrf.mxu0  ;;  %v5969_v63 = vmin.f32 %v3279_v24, 16.0  ;;  %v3219_v58 = vadd.f32 0.4994258, %v3218_v50  ;;  %v3208_v42 = vadd.f32 0.18741608, %v3207_v27 }
 0x7f7   :  { %v5966_v35 = vadd.f32 %v5909_v7, %v3168_v54  ;;  %v3482_v5 = vadd.f32 0.00028619796, %v3481_v34  ;;  %v3493_v17 = vadd.f32 0.001143296, %v3492_v23  ;;  %v3245_v30 = vmul.f32 %v3244_v26, %v5936_v53 }
 0x7f8   :  { %v3281_v2 = vmul.f32 2.1237322e-06, %v5969_v63  ;;  %v3220_v33 = vmul.f32 %v3219_v58, %v5919_v14  ;;  %v3209_v21 = vmul.f32 %v3208_v42, %v5919_v14  ;;  %v3255_v23 = vadd.f32 0.014752088, %v3254_v57 }
 0x7f9   :  { %v3483_v61 = vmul.f32 %v3482_v5, %v5956_v3  ;;  %v3494_v59 = vmul.f32 %v3493_v17, %v5956_v3  ;;  %v5974_v22 = vmul.f32 0.70710677, %v5966_v35  ;;  %v3246_v37 = vadd.f32 0.05243302, %v3245_v30 }
 0x7fa   :  { %v5994_v28 = vadd.f32 1.0, %v3220_v33  ;;  %v3282_v43 = vadd.f32 0.00028619796, %v3281_v2  ;;  %v3442_v54 = vadd.f32 0.00028619796, %v3441_v25  ;;  %v6024_v30 = vmul.f32 0.5, %v5939_v36 }
 0x7fb   :  { %v3484_v29 = vadd.f32 0.0036580483, %v3483_v61  ;;  %v3495_v1 = vadd.f32 0.014752088, %v3494_v59  ;;  %v3319_v31 = vmul.f32 %v5974_v22, %v5974_v22  ;;  %v3247_v12 = vmul.f32 %v3246_v37, %v5936_v53 }
 0x7fc   :  { %4428 = vrcp.f32 %v5994_v28  ;;  %v3283_v62 = vmul.f32 %v3282_v43, %v5969_v63  ;;  %v3453_v14 = vadd.f32 0.001143296, %v3452_v11  ;;  %v3210_v26 = vadd.f32 1.1283791, %v3209_v21 }
 0x7fd   :  { %v3485_v13 = vmul.f32 %v3484_v29, %v5956_v3  ;;  %v3496_v40 = vmul.f32 %v3495_v1, %v5956_v3  ;;  %v5987_v45 = vmin.f32 %v3319_v31, 16.0  ;;  %v3248_v50 = vadd.f32 0.18741608, %v3247_v12 }
 0x7fe   :  { %v3171_v39 = vpop.f32.mrf.mxu0  ;;  %v3284_v59 = vadd.f32 0.0036580483, %v3283_v62  ;;  %v6029_v58 = vmul.f32 %v3442_v54, %v5989_v44  ;;  %v3231_v1 = vand.u32 2147483647, %v5994_v28  ;;  %v3233_v2 = vand.u32 2147483648, %v5994_v28 }
 0x7ff   :  { %v5992_v41 = vadd.f32 %v5909_v7, %v3171_v39  ;;  %v3497_v49 = vadd.f32 0.112945676, %v3496_v40  ;;  %v3486_v48 = vadd.f32 0.05243302, %v3485_v13  ;;  %v3321_v55 = vmul.f32 2.1237322e-06, %v5987_v45 }
 0x800   :  { %v3211_v9 = vmul.f32 %v3210_v26, %v5915_v32  ;;  %v3249_v31 = vmul.f32 %v3248_v50, %v5936_v53  ;;  %v6040_v33 = vmul.f32 %v3453_v14, %v5989_v44  ;;  %v3285_v40 = vmul.f32 %v3284_v59, %v5969_v63 }
 0x801   :  { %v5998_v10 = vmul.f32 0.70710677, %v5992_v41  ;;  %v3498_v6 = vmul.f32 %v3497_v49, %v5956_v3  ;;  %v3487_v47 = vmul.f32 %v3486_v48, %v5956_v3  ;;  %v3322_v0 = vadd.f32 0.00028619796, %v3321_v55 }
 0x802   :  { %v4429_v17 = vpop.eup %4428  ;;  %vm3227_vm5 = vweird.f32 %v5994_v28  ;;  %v3292_v32 = vmul.f32 3.8918573e-05, %v5969_v63  ;;  %vm6049_vm8 = vcmp.eq.f32.partialorder %v3231_v1, 8.507059e+37  ;;  %v3332_v25 = vmul.f32 3.8918573e-05, %v5987_v45 }
 0x803   :  { %v3499_v51 = vadd.f32 0.4994258, %v3498_v6  ;;  %v3359_v24 = vmul.f32 %v5998_v10, %v5998_v10  ;;  %v3488_v61 = vadd.f32 0.18741608, %v3487_v47  ;;  %v3323_v4 = vmul.f32 %v3322_v0, %v5987_v45 }
 0x804   :  { %v3223_v36 = vmul.f32 %v4429_v17, %v5994_v28  ;;  %vm3228_vm7 = vweird.f32 %v4429_v17  ;;  %v3293_v57 = vadd.f32 0.001143296, %v3292_v32  ;;  %v3333_v26 = vadd.f32 0.001143296, %v3332_v25 }
 0x805   :  { %v3500_v15 = vmul.f32 %v3499_v51, %v5956_v3  ;;  %v6018_v27 = vmin.f32 %v3359_v24, 16.0  ;;  %v3489_v13 = vmul.f32 %v3488_v61, %v5956_v3  ;;  %v3324_v39 = vadd.f32 0.0036580483, %v3323_v4  ;;  %vm3229_vm12 = vmor %vm3227_vm5, %vm3228_vm7 }
 0x806   :  { %v3174_v34 = vpop.f32.mrf.mxu0  ;;  %v3224_v42 = vsub.f32 1.0, %v3223_v36  ;;  %v3234_v3 = vor.u32 1.1754944e-38, %v3233_v2  ;;  %v3294_v0 = vmul.f32 %v3293_v57, %v5969_v63  ;;  %v3250_v2 = vadd.f32 1.1283791, %v3249_v31 }
 0x807   :  { %v6013_v16 = vadd.f32 %v5909_v7, %v3174_v34  ;;  %v6015_v5 = vadd.f32 1.0, %v3500_v15  ;;  %v3256_v7 = vmul.f32 %v3255_v23, %v5936_v53  ;;  %v3361_v60 = vmul.f32 2.1237322e-06, %v6018_v27 }
 0x808   :  { %v3225_v55 = vmul.f32 %v4429_v17, %v3224_v42  ;;  %v3490_v11 = vadd.f32 1.1283791, %v3489_v13  ;;  %v3295_v14 = vadd.f32 0.014752088, %v3294_v0  ;;  %v3372_v4 = vmul.f32 3.8918573e-05, %v6018_v27 }
 0x809   :  { %4430 = vrcp.f32 %v6015_v5  ;;  %v6032_v29 = vmul.f32 0.70710677, %v6013_v16  ;;  %v3257_v37 = vadd.f32 0.112945676, %v3256_v7  ;;  %vm3507_vm9 = vweird.f32 %v6015_v5 }
 0x80a   :  { %v3362_v12 = vadd.f32 0.00028619796, %v3361_v60  ;;  %v3513_v51 = vand.u32 2147483648, %v6015_v5  ;;  %v3226_v47 = vadd.f32 %v4429_v17, %v3225_v55  ;;  %v3511_v15 = vand.u32 2147483647, %v6015_v5 }
 0x80b   :  { %v3399_v49 = vmul.f32 %v6032_v29, %v6032_v29  ;;  %v3258_v6 = vmul.f32 %v3257_v37, %v5936_v53  ;;  %v3286_v60 = vadd.f32 0.05243302, %v3285_v40  ;;  %v3491_v37 = vmul.f32 %v3490_v11, %v5943_v20 }
 0x80c   :  { %v3230_v23 = vsel %vm3229_vm12, %v4429_v17, %v3226_v47  ;;  %v3363_v61 = vmul.f32 %v3362_v12, %v6018_v27  ;;  %v3514_v28 = vor.u32 1.1754944e-38, %v3513_v51  ;;  %vm3512_vm13 = vcmp.eq.f32.partialorder %v3511_v15, 8.507059e+37 }
 0x80d   :  { %v3259_v62 = vadd.f32 0.4994258, %v3258_v6  ;;  %v6060_v34 = vmin.f32 %v3399_v49, 16.0  ;;  %v3235_v59 = vsel %vm6049_vm8, %v3234_v3, %v3230_v23  ;;  %v3325_v32 = vmul.f32 %v3324_v39, %v5987_v45 }
 0x80e   :  { %v3236_v17 = vmul.f32 %v3235_v59, %v3211_v9  ;;  %v3373_v49 = vadd.f32 0.001143296, %v3372_v4  ;;  %v3364_v31 = vadd.f32 0.0036580483, %v3363_v61  ;;  %v6087_v6 = vadd.f32 0.0036580483, %v6029_v58 }
 0x80f   :  { %v4431_v48 = vpop.eup %4430  ;;  %v3260_v54 = vmul.f32 %v3259_v62, %v5936_v53  ;;  %v3296_v53 = vmul.f32 %v3295_v14, %v5969_v63  ;;  %v3401_v13 = vmul.f32 2.1237322e-06, %v6060_v34  ;;  %v3251_v40 = vmul.f32 %v3250_v2, %v5930_v38 }
 0x810   :  { %v3503_v21 = vmul.f32 %v4431_v48, %v6015_v5  ;;  %vm3508_vm10 = vweird.f32 %v4431_v48  ;;  %v4128_v42 = vclamps-f32 %v3236_v17, 1.0  ;;  %v3334_v5 = vmul.f32 %v3333_v26, %v5987_v45 }
 0x811   :  { %vm6072_vm11 = vmor %vm3507_vm9, %vm3508_vm10  ;;  %v6076_v1 = vadd.f32 1.0, %v3260_v54  ;;  %v3297_v55 = vadd.f32 0.112945676, %v3296_v53  ;;  %v3402_v25 = vadd.f32 0.00028619796, %v3401_v13  ;;  %v3374_v12 = vmul.f32 %v3373_v49, %v6018_v27 }
 0x812   :  { %v3504_v24 = vsub.f32 1.0, %v3503_v21  ;;  %v3519_v3 = vadd.f32 1.0, %v4128_v42  ;;  %v3287_v21 = vmul.f32 %v3286_v60, %v5969_v63  ;;  %v3335_v11 = vadd.f32 0.014752088, %v3334_v5 }
 0x813   :  { %4432 = vrcp.f32 %v6076_v1  ;;  %v3412_v51 = vmul.f32 3.8918573e-05, %v6060_v34  ;;  %v3455_v47 = vadd.f32 0.014752088, %v6040_v33  ;;  %v3326_v62 = vadd.f32 0.05243302, %v3325_v32 }
 0x814   :  { %v3505_v50 = vmul.f32 %v4431_v48, %v3504_v24  ;;  %v3527_v20 = vmul.f32 %v3519_v3, %v6021_v19  ;;  %v3365_v38 = vmul.f32 %v3364_v31, %v6018_v27  ;;  %v3336_v24 = vmul.f32 %v3335_v11, %v5987_v45 }
 0x815   :  { %v3403_v19 = vmul.f32 %v3402_v25, %v6060_v34  ;;  %v3375_v54 = vadd.f32 0.014752088, %v3374_v12  ;;  %v3271_v14 = vand.u32 2147483647, %v6076_v1  ;;  %v3413_v33 = vadd.f32 0.001143296, %v3412_v51 }
 0x816   :  { %v3506_v36 = vadd.f32 %v4431_v48, %v3505_v50  ;;  %3571 = vmatmul.f32.vlgmr.msra.gmra.mxu1 %v3527_v20  ;;  %v3337_v50 = vadd.f32 0.112945676, %v3336_v24  ;;  %v3456_v7 = vmul.f32 %v3455_v47, %v5989_v44  ;;  %v3288_v42 = vadd.f32 0.18741608, %v3287_v21 }
 0x817   :  { %v3376_v4 = vmul.f32 %v3375_v54, %v6018_v27  ;;  %v3414_v2 = vmul.f32 %v3413_v33, %v6060_v34  ;;  %v3366_v5 = vadd.f32 0.05243302, %v3365_v38  ;;  %vm3267_vm15 = vweird.f32 %v6076_v1 }
 0x818   :  { %v3510_v9 = vsel %vm6072_vm11, %v4431_v48, %v3506_v36  ;;  %v3298_v48 = vmul.f32 %v3297_v55, %v5969_v63  ;;  %v3338_v53 = vmul.f32 %v3337_v50, %v5987_v45  ;;  %v3457_v60 = vadd.f32 0.112945676, %v3456_v7 }
 0x819   :  { %v3515_v43 = vsel %vm3512_vm13, %v3514_v28, %v3510_v9  ;;  %v4433_v58 = vpop.eup %4432  ;;  %v3273_v28 = vand.u32 2147483648, %v6076_v1  ;;  %v3377_v13 = vadd.f32 0.112945676, %v3376_v4  ;;  %v3404_v49 = vadd.f32 0.0036580483, %v3403_v19 }
 0x81a   :  { %v3516_v57 = vmul.f32 %v3515_v43, %v3491_v37  ;;  %v3299_v0 = vadd.f32 0.4994258, %v3298_v48  ;;  %v3263_v15 = vmul.f32 %v4433_v58, %v6076_v1  ;;  %vm3268_vm14 = vweird.f32 %v4433_v58 }
 0x81b   :  { %v3339_v9 = vadd.f32 0.4994258, %v3338_v53  ;;  %v3378_v32 = vmul.f32 %v3377_v13, %v6018_v27  ;;  %vm3269_vm0 = vmor %vm3267_vm15, %vm3268_vm14  ;;  %v3274_v43 = vor.u32 1.1754944e-38, %v3273_v28  ;;  %v3415_v31 = vadd.f32 0.014752088, %v3414_v2 }
 0x81c   :  { %v4135_v39 = vclamps-f32 %v3516_v57, 1.0  ;;  %v3300_v26 = vmul.f32 %v3299_v0, %v5969_v63  ;;  %v3264_v61 = vsub.f32 1.0, %v3263_v15  ;;  %v3458_v3 = vmul.f32 %v3457_v60, %v5989_v44 }
 0x81d   :  { %vm3272_vm1 = vcmp.eq.f32.partialorder %v3271_v14, 8.507059e+37  ;;  %v3340_v57 = vmul.f32 %v3339_v9, %v5987_v45  ;;  %v3379_v25 = vadd.f32 0.4994258, %v3378_v32  ;;  %v3367_v21 = vmul.f32 %v3366_v5, %v6018_v27 }
 0x81e   :  { %v3526_v23 = vadd.f32 1.0, %v4135_v39  ;;  %v6106_v17 = vadd.f32 1.0, %v3300_v26  ;;  %v3265_v36 = vmul.f32 %v4433_v58, %v3264_v61  ;;  %v3416_v48 = vmul.f32 %v3415_v31, %v6060_v34 }
 0x81f   :  { %v3459_v1 = vadd.f32 0.4994258, %v3458_v3  ;;  %v6118_v39 = vadd.f32 1.0, %v3340_v57  ;;  %v3380_v12 = vmul.f32 %v3379_v25, %v6018_v27  ;;  %v3289_v47 = vmul.f32 %v3288_v42, %v5969_v63 }
 0x820   :  { %v3534_v59 = vmul.f32 %v3526_v23, %v6024_v30  ;;  %v3327_v30 = vmul.f32 %v3326_v62, %v5987_v45  ;;  %4434 = vrcp.f32 %v6106_v17  ;;  %v3266_v37 = vadd.f32 %v4433_v58, %v3265_v36 }
 0x821   :  { %v3417_v62 = vadd.f32 0.112945676, %v3416_v48  ;;  %v3460_v38 = vmul.f32 %v3459_v1, %v5989_v44  ;;  %v3184_v0 = vmul.f32 0.5, %v5926_v56  ;;  %4436 = vrcp.f32 %v6118_v39 }
 0x822   :  { %3592 = vmatmul.f32.vlgmr.msrb.gmra.mxu3 %v3534_v59  ;;  %v3270_v55 = vsel %vm3269_vm0, %v4433_v58, %v3266_v37  ;;  %v3405_v58 = vmul.f32 %v3404_v49, %v6060_v34  ;;  %v3328_v15 = vadd.f32 0.18741608, %v3327_v30  ;;  %v3368_v23 = vadd.f32 0.18741608, %v3367_v21 }
 0x823   :  { %v3275_v20 = vsel %vm3272_vm1, %v3274_v43, %v3270_v55  ;;  %v6129_v54 = vadd.f32 1.0, %v3380_v12  ;;  %v3418_v26 = vmul.f32 %v3417_v62, %v6060_v34  ;;  %v6132_v50 = vadd.f32 1.0, %v3460_v38 }
 0x824   :  { %v3276_v11 = vmul.f32 %v3275_v20, %v3251_v40  ;;  %v3445_v40 = vmul.f32 %v6087_v6, %v5989_v44  ;;  %v3290_v33 = vadd.f32 1.1283791, %v3289_v47  ;;  %v3406_v56 = vadd.f32 0.05243302, %v3405_v58 }
 0x825   :  { %v3313_v61 = vand.u32 2147483648, %v6106_v17  ;;  %4438 = vrcp.f32 %v6129_v54  ;;  %v3311_v6 = vand.u32 2147483647, %v6106_v17  ;;  %v3185_v7 = vmul.f32 0.5, %v5946_v46 }
 0x826   :  { %v4435_v51 = vpop.eup %4434  ;;  %v4129_v24 = vclamps-f32 %v3276_v11, 1.0  ;;  %v3419_v28 = vadd.f32 0.4994258, %v3418_v26  ;;  %4440 = vrcp.f32 %v6132_v50  ;;  %v3329_v2 = vmul.f32 %v3328_v15, %v5987_v45 }
 0x827   :  { %v3303_v19 = vmul.f32 %v4435_v51, %v6106_v17  ;;  %vm3308_vm2 = vweird.f32 %v4435_v51  ;;  %v4437_v53 = vpop.eup %4436  ;;  %v3369_v36 = vmul.f32 %v3368_v23, %v6018_v27  ;;  %vm3307_vm3 = vweird.f32 %v6106_v17 }
 0x828   :  { %v3520_v63 = vadd.f32 1.0, %v4129_v24  ;;  %v3446_v60 = vadd.f32 0.05243302, %v3445_v40  ;;  %vm3309_vm4 = vmor %vm3307_vm3, %vm3308_vm2  ;;  %v3314_v42 = vor.u32 1.1754944e-38, %v3313_v61  ;;  %v3343_v30 = vmul.f32 %v4437_v53, %v6118_v39 }
 0x829   :  { %v3304_v14 = vsub.f32 1.0, %v3303_v19  ;;  %v3420_v5 = vmul.f32 %v3419_v28, %v6060_v34  ;;  %v3291_v46 = vmul.f32 %v3290_v33, %v5952_v18  ;;  %v3407_v37 = vmul.f32 %v3406_v56, %v6060_v34 }
 0x82a   :  { %v3528_v59 = vmul.f32 %v3520_v63, %v3184_v0  ;;  %vm3312_vm6 = vcmp.eq.f32.partialorder %v3311_v6, 8.507059e+37  ;;  %v3344_v27 = vsub.f32 1.0, %v3343_v30  ;;  %v3353_v49 = vand.u32 2147483648, %v6118_v39 }
 0x82b   :  { %v3305_v4 = vmul.f32 %v4435_v51, %v3304_v14  ;;  %v4439_v45 = vpop.eup %4438  ;;  %v6147_v43 = vadd.f32 1.0, %v3420_v5  ;;  %v3330_v17 = vadd.f32 1.1283791, %v3329_v2  ;;  %v3370_v31 = vadd.f32 1.1283791, %v3369_v36 }
 0x82c   :  { %3574 = vmatmul.f32.gmra.mxu1 %v3528_v59  ;;  %v3383_v55 = vmul.f32 %v4439_v45, %v6129_v54  ;;  %v6150_v57 = vpop.eup %4440  ;;  %v3345_v25 = vmul.f32 %v4437_v53, %v3344_v27  ;;  %vm3348_vm5 = vweird.f32 %v4437_v53  ;;  %v3351_v18 = vand.u32 2147483647, %v6118_v39 }
 0x82d   :  { %v3306_v13 = vadd.f32 %v4435_v51, %v3305_v4  ;;  %4442 = vrcp.f32 %v6147_v43  ;;  %v3408_v21 = vadd.f32 0.18741608, %v3407_v37  ;;  %vm3347_vm7 = vweird.f32 %v6118_v39 }
 0x82e   :  { %v3384_v48 = vsub.f32 1.0, %v3383_v55  ;;  %v3346_v1 = vadd.f32 %v4437_v53, %v3345_v25  ;;  %v3354_v11 = vor.u32 1.1754944e-38, %v3353_v49  ;;  %v3391_v12 = vand.u32 2147483647, %v6129_v54  ;;  %vm3349_vm8 = vmor %vm3347_vm7, %vm3348_vm5 }
 0x82f   :  { %v3310_v9 = vsel %vm3309_vm4, %v4435_v51, %v3306_v13  ;;  %v3393_v51 = vand.u32 2147483648, %v6129_v54  ;;  %vm3388_vm9 = vweird.f32 %v4439_v45  ;;  %v3463_v62 = vmul.f32 %v6150_v57, %v6132_v50 }
 0x830   :  { %v3315_v32 = vsel %vm3312_vm6, %v3314_v42, %v3310_v9  ;;  %v3385_v58 = vmul.f32 %v4439_v45, %v3384_v48  ;;  %v3447_v38 = vmul.f32 %v3446_v60, %v5989_v44  ;;  %v3331_v0 = vmul.f32 %v3330_v17, %v5974_v22 }
 0x831   :  { %v3316_v3 = vmul.f32 %v3315_v32, %v3291_v46  ;;  %v3350_v24 = vsel %vm3349_vm8, %v4437_v53, %v3346_v1  ;;  %vm3352_vm10 = vcmp.eq.f32.partialorder %v3351_v18, 8.507059e+37  ;;  %vm3387_vm12 = vweird.f32 %v6129_v54 }
 0x832   :  { %v3355_v19 = vsel %vm3352_vm10, %v3354_v11, %v3350_v24  ;;  %v3386_v40 = vadd.f32 %v4439_v45, %v3385_v58  ;;  %v3371_v23 = vmul.f32 %v3370_v31, %v5998_v10  ;;  %v3409_v63 = vmul.f32 %v3408_v21, %v6060_v34  ;;  %vm3389_vm11 = vmor %vm3387_vm12, %vm3388_vm9 }
 0x833   :  { %v4130_v20 = vclamps-f32 %v3316_v3, 1.0  ;;  %v4443_v15 = vpop.eup %4442  ;;  %v3356_v14 = vmul.f32 %v3355_v19, %v3331_v0  ;;  %v3394_v26 = vor.u32 1.1754944e-38, %v3393_v51  ;;  %vm3392_vm13 = vcmp.eq.f32.partialorder %v3391_v12, 8.507059e+37 }
 0x834   :  { %v3390_v33 = vsel %vm3389_vm11, %v4439_v45, %v3386_v40  ;;  %v3423_v22 = vmul.f32 %v4443_v15, %v6147_v43  ;;  %v3464_v56 = vsub.f32 1.0, %v3463_v62  ;;  %v3448_v61 = vadd.f32 0.18741608, %v3447_v38 }
 0x835   :  { %v3521_v47 = vadd.f32 1.0, %v4130_v20  ;;  %v4131_v59 = vclamps-f32 %v3356_v14, 1.0  ;;  %v3395_v4 = vsel %vm3392_vm13, %v3394_v26, %v3390_v33  ;;  %v3186_v6 = vmul.f32 0.5, %v5966_v35 }
 0x836   :  { %v3396_v54 = vmul.f32 %v3395_v4, %v3371_v23  ;;  %v3410_v28 = vadd.f32 1.1283791, %v3409_v63  ;;  %v3431_v34 = vand.u32 2147483647, %v6147_v43  ;;  %v3433_v53 = vand.u32 2147483648, %v6147_v43 }
 0x837   :  { %v3529_v39 = vmul.f32 %v3521_v47, %v3185_v7  ;;  %v3424_v7 = vsub.f32 1.0, %v3423_v22  ;;  %v3522_v10 = vadd.f32 1.0, %v4131_v59  ;;  %vm3428_vm14 = vweird.f32 %v4443_v15  ;;  %v3963_v59 = vld [vmem:[#allocation21 + $0x78] sm:$0xff] }
 0x838   :  { %v4132_v2 = vclamps-f32 %v3396_v54, 1.0  ;;  %v3465_v13 = vmul.f32 %v6150_v57, %v3464_v56  ;;  %v3449_v60 = vmul.f32 %v3448_v61, %v5989_v44  ;;  %vm3427_vm15 = vweird.f32 %v6147_v43  ;;  %3968 = vmatpush.msra.mxu2 %v3963_v59  ;;  %v3962_v54 = vld [vmem:[#allocation21 + $0x70] sm:$0xff] }
 0x839   :  { %3577 = vmatmul.f32.gmra.mxu1 %v3529_v39  ;;  %v3425_v36 = vmul.f32 %v4443_v15, %v3424_v7  ;;  %v3530_v42 = vmul.f32 %v3522_v10, %v3186_v6  ;;  %vm3467_vm0 = vweird.f32 %v6132_v50  ;;  %vm3468_vm1 = vweird.f32 %v6150_v57  ;;  %vm3429_vm2 = vmor %vm3427_vm15, %vm3428_vm14 }
 0x83a   :  { %v3411_v35 = vmul.f32 %v3410_v28, %v6032_v29  ;;  %v3434_v5 = vor.u32 1.1754944e-38, %v3433_v53  ;;  %v3471_v46 = vand.u32 2147483647, %v6132_v50  ;;  %v3473_v37 = vand.u32 2147483648, %v6132_v50  ;;  %vm3469_vm4 = vmor %vm3467_vm0, %vm3468_vm1  ;;  %3969 = vmatpush.msra.mxu2 %v3962_v54 }
 0x83b   :  { %v3426_v30 = vadd.f32 %v4443_v15, %v3425_v36  ;;  %v3523_v9 = vadd.f32 1.0, %v4132_v2  ;;  %vm3432_vm3 = vcmp.eq.f32.partialorder %v3431_v34, 8.507059e+37  ;;  %v3466_v44 = vadd.f32 %v6150_v57, %v3465_v13  ;;  %v3961_v2 = vld [vmem:[#allocation21 + $0x68] sm:$0xff] }
 0x83c   :  { %v3187_v27 = vmul.f32 0.5, %v5992_v41  ;;  %v3450_v43 = vadd.f32 1.1283791, %v3449_v60  ;;  %v3474_v17 = vor.u32 1.1754944e-38, %v3473_v37  ;;  %vm3472_vm6 = vcmp.eq.f32.partialorder %v3471_v46, 8.507059e+37  ;;  %3970 = vmatpush.msra.mxu2 %v3961_v2 }
 0x83d   :  { %v3430_v45 = vsel %vm3429_vm2, %v4443_v15, %v3426_v30  ;;  %v3470_v3 = vsel %vm3469_vm4, %v6150_v57, %v3466_v44  ;;  %v3188_v18 = vmul.f32 0.5, %v6013_v16  ;;  %v3189_v1 = vmul.f32 0.5, %v5922_v52  ;;  %v6185_v57 = vld [vmem:[%s6432_s21] ss:$0 sm:$0xff]  ;;  %v3959_v44 = vld [vmem:[#allocation21 + $0x58] sm:$0xff] }
 0x83e   :  { %v3435_v32 = vsel %vm3432_vm3, %v3434_v5, %v3430_v45  ;;  %v3531_v29 = vmul.f32 %v3523_v9, %v3187_v27  ;;  %v3475_v55 = vsel %vm3472_vm6, %v3474_v17, %v3470_v3  ;;  %v3451_v50 = vmul.f32 %v3450_v43, %v5961_v8  ;;  %v3958_v17 = vld [vmem:[#allocation21 + $0x50] sm:$0xff] }
 0x83f   :  { %v3436_v49 = vmul.f32 %v3435_v32, %v3411_v35  ;;  %v3960_v35 = vld [vmem:[#allocation21 + $0x60] sm:$0xff] }
 0x840   :  { %v3476_v21 = vmul.f32 %v3475_v55, %v3451_v50  ;;  %3971 = vmatpush.msra.mxu2 %v3960_v35 }
 0x841   :  { %3580 = vmatmul.f32.gmra.mxu1 %v3530_v42  ;;  %v4133_v31 = vclamps-f32 %v3436_v49, 1.0 }
 0x842   :  { %v4134_v48 = vclamps-f32 %v3476_v21, 1.0  ;;  %3972 = vmatpush.msra.mxu2 %v3959_v44  ;;  %v3951_v44 = vld [vmem:[#allocation21 + $0x18] sm:$0xff] }
 0x843   :  { %v3524_v25 = vadd.f32 1.0, %v4133_v31 }
 0x844   :  { %v3525_v41 = vadd.f32 1.0, %v4134_v48  ;;  %3973 = vmatpush.msra.mxu2 %v3958_v17  ;;  %v3950_v17 = vld [vmem:[#allocation21 + $0x10] sm:$0xff] }
 0x845   :  { %v3532_v20 = vmul.f32 %v3524_v25, %v3188_v18  ;;  %v3957_v25 = vld [vmem:[#allocation21 + $0x48] sm:$0xff] }
 0x846   :  { %v3533_v11 = vmul.f32 %v3525_v41, %v3189_v1  ;;  %3974 = vmatpush.msra.mxu2 %v3957_v25  ;;  %v3956_v1 = vld [vmem:[#allocation21 + $0x40] sm:$0xff] }
 0x848   :  { %3975 = vmatpush.msra.mxu2 %v3956_v1 }
 0x849   :  { %3583 = vmatmul.f32.gmra.mxu1 %v3531_v29 }
 0x851   :  { %3586 = vmatmul.f32.gmra.mxu1 %v3532_v20 }
 0x859   :  { %3589 = vmatmul.f32.gmra.mxu1 %v3533_v11 }
 0x893   :  { %v3572_v12 = vpop.f32.mrf.mxu1 }
 0x894   :  { %v6188_v8 = vadd.f32 %v6185_v57, %v3572_v12 }
 0x896   :  { %v6191_v16 = vmul.f32 0.70710677, %v6188_v8  ;;  %v3596_v25 = vmul.f32 0.5, %v6188_v8 }
 0x898   :  { %v3612_v51 = vmul.f32 %v6191_v16, %v6191_v16 }
 0x89a   :  { %v3613_v47 = vmin.f32 %v3612_v51, 16.0 }
 0x89c   :  { %v3614_v58 = vmul.f32 2.1237322e-06, %v3613_v47  ;;  %v3625_v62 = vmul.f32 3.8918573e-05, %v3613_v47 }
 0x89e   :  { %v3615_v52 = vadd.f32 0.00028619796, %v3614_v58  ;;  %v3626_v0 = vadd.f32 0.001143296, %v3625_v62  ;;  %v3955_v62 = vld [vmem:[#allocation21 + $0x38] sm:$0xff] }
 0x89f   :  { %3976 = vmatpush.msra.mxu2 %v3955_v62 }
 0x8a0   :  { %v3616_v38 = vmul.f32 %v3615_v52, %v3613_v47  ;;  %v3627_v24 = vmul.f32 %v3626_v0, %v3613_v47 }
 0x8a2   :  { %v3617_v39 = vadd.f32 0.0036580483, %v3616_v38  ;;  %v3628_v15 = vadd.f32 0.014752088, %v3627_v24 }
 0x8a4   :  { %v3629_v63 = vmul.f32 %v3628_v15, %v3613_v47  ;;  %v3618_v14 = vmul.f32 %v3617_v39, %v3613_v47  ;;  %v3954_v15 = vld [vmem:[#allocation21 + $0x30] sm:$0xff] }
 0x8a5   :  { %v3593_v6 = vpop.f32.mrf.mxu3  ;;  %3977 = vmatpush.msra.mxu2 %v3954_v15 }
 0x8a6   :  { %v3630_v33 = vadd.f32 0.112945676, %v3629_v63  ;;  %v3619_v61 = vadd.f32 0.05243302, %v3618_v14  ;;  %v6212_v30 = vadd.f32 %v6185_v57, %v3593_v6 }
 0x8a8   :  { %v3631_v56 = vmul.f32 %v3630_v33, %v3613_v47  ;;  %v3620_v34 = vmul.f32 %v3619_v61, %v3613_v47  ;;  %v6225_v49 = vmul.f32 0.70710677, %v6212_v30 }
 0x8a9   :  { %v3575_v19 = vpop.f32.mrf.mxu1 }
 0x8aa   :  { %v6196_v40 = vadd.f32 %v6185_v57, %v3575_v19  ;;  %v3632_v7 = vadd.f32 0.4994258, %v3631_v56  ;;  %v3621_v45 = vadd.f32 0.18741608, %v3620_v34  ;;  %v3892_v21 = vmul.f32 %v6225_v49, %v6225_v49 }
 0x8ac   :  { %v6199_v23 = vmul.f32 0.70710677, %v6196_v40  ;;  %v3633_v36 = vmul.f32 %v3632_v7, %v3613_v47  ;;  %v3622_v55 = vmul.f32 %v3621_v45, %v3613_v47  ;;  %v6244_v24 = vmin.f32 %v3892_v21, 16.0  ;;  %v3953_v7 = vld [vmem:[#allocation21 + $0x28] sm:$0xff] }
 0x8ad   :  { %3978 = vmatpush.msra.mxu2 %v3953_v7 }
 0x8ae   :  { %v3652_v26 = vmul.f32 %v6199_v23, %v6199_v23  ;;  %v6214_v5 = vadd.f32 1.0, %v3633_v36  ;;  %v3623_v58 = vadd.f32 1.1283791, %v3622_v55  ;;  %v3952_v36 = vld [vmem:[#allocation21 + $0x20] sm:$0xff] }
 0x8af   :  { %3979 = vmatpush.msra.mxu2 %v3952_v36 }
 0x8b0   :  { %v6203_v22 = vmin.f32 %v3652_v26, 16.0  ;;  %4444 = vrcp.f32 %v6214_v5  ;;  %v3644_v63 = vand.u32 2147483647, %v6214_v5  ;;  %v3646_v14 = vand.u32 2147483648, %v6214_v5 }
 0x8b1   :  { %v3624_v59 = vmul.f32 %v3623_v58, %v6191_v16  ;;  %vm3640_vm7 = vweird.f32 %v6214_v5  ;;  %3980 = vmatpush.msra.mxu2 %v3951_v44  ;;  %v3948_v58 = vld [vmem:[#allocation21] sm:$0xff] }
 0x8b2   :  { %v3654_v4 = vmul.f32 2.1237322e-06, %v6203_v22  ;;  %v3665_v28 = vmul.f32 3.8918573e-05, %v6203_v22  ;;  %vm3645_vm9 = vcmp.eq.f32.partialorder %v3644_v63, 8.507059e+37  ;;  %v3647_v16 = vor.u32 1.1754944e-38, %v3646_v14 }
 0x8b3   :  { %3981 = vmatpush.msra.mxu2 %v3950_v17 }
 0x8b4   :  { %v3655_v10 = vadd.f32 0.00028619796, %v3654_v4  ;;  %v3666_v13 = vadd.f32 0.001143296, %v3665_v28 }
 0x8b6   :  { %v3578_v53 = vpop.f32.mrf.mxu1  ;;  %v3656_v60 = vmul.f32 %v3655_v10, %v6203_v22  ;;  %v3667_v46 = vmul.f32 %v3666_v13, %v6203_v22  ;;  %v4445_v41 = vpop.eup %4444 }
 0x8b7   :  { %v6209_v42 = vadd.f32 %v6185_v57, %v3578_v53  ;;  %v3636_v51 = vmul.f32 %v4445_v41, %v6214_v5  ;;  %vm3641_vm5 = vweird.f32 %v4445_v41  ;;  %v3905_v53 = vmul.f32 3.8918573e-05, %v6244_v24 }
 0x8b8   :  { %v3657_v37 = vadd.f32 0.0036580483, %v3656_v60  ;;  %v3668_v43 = vadd.f32 0.014752088, %v3667_v46  ;;  %vm3642_vm8 = vmor %vm3640_vm7, %vm3641_vm5 }
 0x8b9   :  { %v6218_v9 = vmul.f32 0.70710677, %v6209_v42  ;;  %v3637_v39 = vsub.f32 1.0, %v3636_v51 }
 0x8ba   :  { %v3658_v32 = vmul.f32 %v3657_v37, %v6203_v22  ;;  %v3669_v3 = vmul.f32 %v3668_v43, %v6203_v22 }
 0x8bb   :  { %v3692_v27 = vmul.f32 %v6218_v9, %v6218_v9  ;;  %v3638_v56 = vmul.f32 %v4445_v41, %v3637_v39 }
 0x8bc   :  { %v3659_v29 = vadd.f32 0.05243302, %v3658_v32  ;;  %v3670_v48 = vadd.f32 0.112945676, %v3669_v3 }
 0x8bd   :  { %v6227_v31 = vmin.f32 %v3692_v27, 16.0  ;;  %v3639_v34 = vadd.f32 %v4445_v41, %v3638_v56 }
 0x8be   :  { %v3581_v50 = vpop.f32.mrf.mxu1  ;;  %v3660_v11 = vmul.f32 %v3659_v29, %v6203_v22  ;;  %v3671_v38 = vmul.f32 %v3670_v48, %v6203_v22 }
 0x8bf   :  { %v3694_v18 = vmul.f32 2.1237322e-06, %v6227_v31  ;;  %v6234_v20 = vadd.f32 %v6185_v57, %v3581_v50  ;;  %v3705_v47 = vmul.f32 3.8918573e-05, %v6227_v31  ;;  %v3643_v46 = vsel %vm3642_vm8, %v4445_v41, %v3639_v34  ;;  %v3949_v41 = vld [vmem:[#allocation21 + $0x8] sm:$0xff] }
 0x8c0   :  { %v3672_v26 = vadd.f32 0.4994258, %v3671_v38  ;;  %v3661_v33 = vadd.f32 0.18741608, %v3660_v11  ;;  %v3648_v32 = vsel %vm3645_vm9, %v3647_v16, %v3643_v46  ;;  %v3906_v50 = vadd.f32 0.001143296, %v3905_v53  ;;  %3982 = vmatpush.msra.mxu2 %v3949_v41 }
 0x8c1   :  { %v3695_v12 = vadd.f32 0.00028619796, %v3694_v18  ;;  %v6240_v52 = vmul.f32 0.70710677, %v6234_v20  ;;  %v3706_v61 = vadd.f32 0.001143296, %v3705_v47  ;;  %v3649_v43 = vmul.f32 %v3648_v32, %v3624_v59 }
 0x8c2   :  { %v3673_v28 = vmul.f32 %v3672_v26, %v6203_v22  ;;  %v3662_v60 = vmul.f32 %v3661_v33, %v6203_v22  ;;  %3983 = vmatpush.msra.mxu2 %v3948_v58  ;;  %v3907_v14 = vmul.f32 %v3906_v50, %v6244_v24 }
 0x8c3   :  { %v3696_v0 = vmul.f32 %v3695_v12, %v6227_v31  ;;  %v3732_v19 = vmul.f32 %v6240_v52, %v6240_v52  ;;  %v3707_v5 = vmul.f32 %v3706_v61, %v6227_v31  ;;  %v4136_v3 = vclamps-f32 %v3649_v43, 1.0 }
 0x8c4   :  { %v6261_v13 = vadd.f32 1.0, %v3673_v28  ;;  %v3663_v18 = vadd.f32 1.1283791, %v3662_v60 }
 0x8c5   :  { %v3697_v4 = vadd.f32 0.0036580483, %v3696_v0  ;;  %v6251_v6 = vmin.f32 %v3732_v19, 16.0  ;;  %v3708_v55 = vadd.f32 0.014752088, %v3707_v5  ;;  %v3932_v51 = vadd.f32 1.0, %v4136_v3 }
 0x8c6   :  { %v3584_v54 = vpop.f32.mrf.mxu1  ;;  %4446 = vrcp.f32 %v6261_v13  ;;  %v3894_v19 = vmul.f32 2.1237322e-06, %v6244_v24  ;;  %v3664_v26 = vmul.f32 %v3663_v18, %v6199_v23  ;;  %v3686_v34 = vand.u32 2147483648, %v6261_v13 }
 0x8c7   :  { %v6255_v10 = vadd.f32 %v6185_v57, %v3584_v54  ;;  %v3734_v2 = vmul.f32 2.1237322e-06, %v6251_v6  ;;  %v3698_v37 = vmul.f32 %v3697_v4, %v6227_v31  ;;  %v3709_v62 = vmul.f32 %v3708_v55, %v6227_v31 }
 0x8c8   :  { %v3745_v38 = vmul.f32 3.8918573e-05, %v6251_v6  ;;  %v3940_v39 = vmul.f32 %v3932_v51, %v3596_v25  ;;  %v3684_v60 = vand.u32 2147483647, %v6261_v13  ;;  %vm3680_vm12 = vweird.f32 %v6261_v13 }
 0x8c9   :  { %v6265_v35 = vmul.f32 0.70710677, %v6255_v10  ;;  %v3735_v45 = vadd.f32 0.00028619796, %v3734_v2  ;;  %v3699_v21 = vadd.f32 0.05243302, %v3698_v37 }
 0x8ca   :  { %3984 = vmatmul.f32.vlgmr.msra.gmra.mxu2 %v3940_v39  ;;  %v3710_v56 = vadd.f32 0.112945676, %v3709_v62  ;;  %v3746_v61 = vadd.f32 0.001143296, %v3745_v38  ;;  %v3687_v17 = vor.u32 1.1754944e-38, %v3686_v34  ;;  %vm3685_vm13 = vcmp.eq.f32.partialorder %v3684_v60, 8.507059e+37 }
 0x8cb   :  { %v3772_v27 = vmul.f32 %v6265_v35, %v6265_v35  ;;  %v3736_v22 = vmul.f32 %v3735_v45, %v6251_v6  ;;  %v3700_v59 = vmul.f32 %v3699_v21, %v6227_v31 }
 0x8cc   :  { %v4447_v47 = vpop.eup %4446  ;;  %v3711_v53 = vmul.f32 %v3710_v56, %v6227_v31  ;;  %v3747_v23 = vmul.f32 %v3746_v61, %v6251_v6 }
 0x8cd   :  { %v6273_v29 = vmin.f32 %v3772_v27, 16.0  ;;  %v3737_v1 = vadd.f32 0.0036580483, %v3736_v22  ;;  %v3676_v63 = vmul.f32 %v4447_v47, %v6261_v13  ;;  %vm3681_vm10 = vweird.f32 %v4447_v47 }
 0x8ce   :  { %v3587_v48 = vpop.f32.mrf.mxu1  ;;  %v3712_v5 = vadd.f32 0.4994258, %v3711_v53  ;;  %v3748_v37 = vadd.f32 0.014752088, %v3747_v23  ;;  %v3701_v44 = vadd.f32 0.18741608, %v3700_v59  ;;  %vm3682_vm11 = vmor %vm3680_vm12, %vm3681_vm10 }
 0x8cf   :  { %v3774_v11 = vmul.f32 2.1237322e-06, %v6273_v29  ;;  %v6278_v12 = vadd.f32 %v6185_v57, %v3587_v48  ;;  %v3785_v8 = vmul.f32 3.8918573e-05, %v6273_v29  ;;  %v3738_v4 = vmul.f32 %v3737_v1, %v6251_v6 }
 0x8d0   :  { %v3677_v54 = vsub.f32 1.0, %v3676_v63  ;;  %v3713_v3 = vmul.f32 %v3712_v5, %v6227_v31  ;;  %v3749_v50 = vmul.f32 %v3748_v37, %v6251_v6  ;;  %v3702_v51 = vmul.f32 %v3701_v44, %v6227_v31 }
 0x8d1   :  { %v3775_v0 = vadd.f32 0.00028619796, %v3774_v11  ;;  %v6285_v15 = vmul.f32 0.70710677, %v6278_v12  ;;  %v3786_v7 = vadd.f32 0.001143296, %v3785_v8 }
 0x8d2   :  { %v3678_v16 = vmul.f32 %v4447_v47, %v3677_v54  ;;  %v3739_v32 = vadd.f32 0.05243302, %v3738_v4  ;;  %v6314_v13 = vadd.f32 1.0, %v3713_v3  ;;  %v3750_v1 = vadd.f32 0.112945676, %v3749_v50 }
 0x8d3   :  { %v3776_v33 = vmul.f32 %v3775_v0, %v6273_v29  ;;  %v3812_v28 = vmul.f32 %v6285_v15, %v6285_v15  ;;  %v3787_v45 = vmul.f32 %v3786_v7, %v6273_v29  ;;  %v3908_v11 = vadd.f32 0.014752088, %v3907_v14 }
 0x8d4   :  { %v3679_v27 = vadd.f32 %v4447_v47, %v3678_v16  ;;  %v3740_v48 = vmul.f32 %v3739_v32, %v6251_v6  ;;  %4448 = vrcp.f32 %v6314_v13  ;;  %v3895_v8 = vadd.f32 0.00028619796, %v3894_v19 }
 0x8d5   :  { %v3777_v2 = vadd.f32 0.0036580483, %v3776_v33  ;;  %v6304_v43 = vmin.f32 %v3812_v28, 16.0  ;;  %v3788_v21 = vadd.f32 0.014752088, %v3787_v45  ;;  %v3751_v39 = vmul.f32 %v3750_v1, %v6251_v6 }
 0x8d6   :  { %v3590_v36 = vpop.f32.mrf.mxu1  ;;  %v3683_v55 = vsel %vm3682_vm11, %v4447_v47, %v3679_v27  ;;  %v3741_v14 = vadd.f32 0.18741608, %v3740_v48  ;;  %v3909_v31 = vmul.f32 %v3908_v11, %v6244_v24  ;;  %v3703_v56 = vadd.f32 1.1283791, %v3702_v51 }
 0x8d7   :  { %v6300_v46 = vadd.f32 %v6185_v57, %v3590_v36  ;;  %v3778_v57 = vmul.f32 %v3777_v2, %v6273_v29  ;;  %v3688_v18 = vsel %vm3685_vm13, %v3687_v17, %v3683_v55  ;;  %v3814_v58 = vmul.f32 2.1237322e-06, %v6304_v43 }
 0x8d8   :  { %v3689_v41 = vmul.f32 %v3688_v18, %v3664_v26  ;;  %v3789_v63 = vmul.f32 %v3788_v21, %v6273_v29  ;;  %v3597_v26 = vmul.f32 0.5, %v6196_v40  ;;  %v3752_v59 = vadd.f32 0.4994258, %v3751_v39 }
 0x8d9   :  { %v6307_v22 = vmul.f32 0.70710677, %v6300_v46  ;;  %v3779_v62 = vadd.f32 0.05243302, %v3778_v57  ;;  %v3815_v61 = vadd.f32 0.00028619796, %v3814_v58  ;;  %v3896_v34 = vmul.f32 %v3895_v8, %v6244_v24 }
 0x8da   :  { %v4137_v38 = vclamps-f32 %v3689_v41, 1.0  ;;  %v3790_v7 = vadd.f32 0.112945676, %v3789_v63  ;;  %v3825_v19 = vmul.f32 3.8918573e-05, %v6304_v43  ;;  %v4449_v28 = vpop.eup %4448  ;;  %v3753_v23 = vmul.f32 %v3752_v59, %v6251_v6 }
 0x8db   :  { %v3852_v25 = vmul.f32 %v6307_v22, %v6307_v22  ;;  %v3780_v4 = vmul.f32 %v3779_v62, %v6273_v29  ;;  %v3742_v40 = vmul.f32 %v3741_v14, %v6251_v6  ;;  %v3716_v2 = vmul.f32 %v4449_v28, %v6314_v13 }
 0x8dc   :  { %v3933_v33 = vadd.f32 1.0, %v4137_v38  ;;  %v3791_v36 = vmul.f32 %v3790_v7, %v6273_v29  ;;  %v3910_v16 = vadd.f32 0.112945676, %v3909_v31  ;;  %v3816_v60 = vmul.f32 %v3815_v61, %v6304_v43 }
 0x8dd   :  { %v6319_v47 = vmin.f32 %v3852_v25, 16.0  ;;  %v6335_v5 = vadd.f32 1.0, %v3753_v23  ;;  %v3826_v37 = vadd.f32 0.001143296, %v3825_v19  ;;  %v3704_v44 = vmul.f32 %v3703_v56, %v6218_v9 }
 0x8de   :  { %v3941_v54 = vmul.f32 %v3933_v33, %v3597_v26  ;;  %v3781_v32 = vadd.f32 0.18741608, %v3780_v4  ;;  %v3717_v27 = vsub.f32 1.0, %v3716_v2  ;;  %v3792_v17 = vadd.f32 0.4994258, %v3791_v36 }
 0x8df   :  { %v3854_v0 = vmul.f32 2.1237322e-06, %v6319_v47  ;;  %v3865_v45 = vmul.f32 3.8918573e-05, %v6319_v47  ;;  %v3724_v3 = vand.u32 2147483647, %v6314_v13  ;;  %4450 = vrcp.f32 %v6335_v5 }
 0x8e0   :  { %3987 = vmatmul.f32.gmra.mxu2 %v3941_v54  ;;  %v3726_v57 = vand.u32 2147483648, %v6314_v13  ;;  %v3718_v55 = vmul.f32 %v4449_v28, %v3717_v27  ;;  %vm3721_vm14 = vweird.f32 %v4449_v28  ;;  %v3793_v50 = vmul.f32 %v3792_v17, %v6273_v29 }
 0x8e1   :  { %v3855_v53 = vadd.f32 0.00028619796, %v3854_v0  ;;  %v3911_v25 = vmul.f32 %v3910_v16, %v6244_v24  ;;  %v3743_v18 = vadd.f32 1.1283791, %v3742_v40  ;;  %v3817_v21 = vadd.f32 0.0036580483, %v3816_v60 }
 0x8e2   :  { %v3827_v9 = vmul.f32 %v3826_v37, %v6304_v43  ;;  %v3866_v48 = vadd.f32 0.001143296, %v3865_v45  ;;  %v3782_v41 = vmul.f32 %v3781_v32, %v6273_v29  ;;  %v3719_v1 = vadd.f32 %v4449_v28, %v3718_v55 }
 0x8e3   :  { %v3856_v6 = vmul.f32 %v3855_v53, %v6319_v47  ;;  %vm3720_vm15 = vweird.f32 %v6314_v13  ;;  %v6348_v11 = vadd.f32 1.0, %v3793_v50  ;;  %v3727_v58 = vor.u32 1.1754944e-38, %v3726_v57 }
 0x8e4   :  { %vm3722_vm0 = vmor %vm3720_vm15, %vm3721_vm14  ;;  %v3828_v62 = vadd.f32 0.014752088, %v3827_v9  ;;  %v3867_v38 = vmul.f32 %v3866_v48, %v6319_v47  ;;  %vm3725_vm1 = vcmp.eq.f32.partialorder %v3724_v3, 8.507059e+37  ;;  %v3912_v0 = vadd.f32 0.4994258, %v3911_v25 }
 0x8e5   :  { %v3857_v51 = vadd.f32 0.0036580483, %v3856_v6  ;;  %v3723_v8 = vsel %vm3722_vm0, %v4449_v28, %v3719_v1  ;;  %4452 = vrcp.f32 %v6348_v11  ;;  %v4451_v39 = vpop.eup %4450  ;;  %v3598_v63 = vmul.f32 0.5, %v6209_v42 }
 0x8e6   :  { %v3897_v29 = vadd.f32 0.0036580483, %v3896_v34  ;;  %v3818_v26 = vmul.f32 %v3817_v21, %v6304_v43  ;;  %v3728_v13 = vsel %vm3725_vm1, %v3727_v58, %v3723_v8  ;;  %v3744_v14 = vmul.f32 %v3743_v18, %v6240_v52 }
 0x8e7   :  { %v3729_v33 = vmul.f32 %v3728_v13, %v3704_v44  ;;  %v3756_v31 = vmul.f32 %v4451_v39, %v6335_v5  ;;  %v3829_v56 = vmul.f32 %v3828_v62, %v6304_v43  ;;  %v3783_v61 = vadd.f32 1.1283791, %v3782_v41 }
 0x8e8   :  { %v3858_v59 = vmul.f32 %v3857_v51, %v6319_v47  ;;  %v3764_v4 = vand.u32 2147483647, %v6335_v5  ;;  %v3868_v54 = vadd.f32 0.014752088, %v3867_v38  ;;  %v3913_v28 = vmul.f32 %v3912_v0, %v6244_v24 }
 0x8e9   :  { %v4138_v7 = vclamps-f32 %v3729_v33, 1.0  ;;  %v3757_v19 = vsub.f32 1.0, %v3756_v31  ;;  %v3830_v42 = vadd.f32 0.112945676, %v3829_v56  ;;  %v3819_v34 = vadd.f32 0.05243302, %v3818_v26 }
 0x8ea   :  { %vm3761_vm2 = vweird.f32 %v4451_v39  ;;  %v3766_v52 = vand.u32 2147483648, %v6335_v5  ;;  %v3869_v53 = vmul.f32 %v3868_v54, %v6319_v47  ;;  %v6363_v16 = vadd.f32 1.0, %v3913_v28 }
 0x8eb   :  { %v4453_v23 = vpop.eup %4452  ;;  %v3934_v40 = vadd.f32 1.0, %v4138_v7  ;;  %v3758_v2 = vmul.f32 %v4451_v39, %v3757_v19  ;;  %v3831_v36 = vmul.f32 %v3830_v42, %v6304_v43  ;;  %v3859_v60 = vadd.f32 0.05243302, %v3858_v59 }
 0x8ec   :  { %vm3760_vm3 = vweird.f32 %v6335_v5  ;;  %v3796_v37 = vmul.f32 %v4453_v23, %v6348_v11  ;;  %v3870_v45 = vadd.f32 0.112945676, %v3869_v53  ;;  %vm3765_vm4 = vcmp.eq.f32.partialorder %v3764_v4, 8.507059e+37 }
 0x8ed   :  { %v3942_v44 = vmul.f32 %v3934_v40, %v3598_v63  ;;  %v3759_v32 = vadd.f32 %v4451_v39, %v3758_v2  ;;  %v3832_v27 = vadd.f32 0.4994258, %v3831_v36  ;;  %vm3762_vm6 = vmor %vm3760_vm3, %vm3761_vm2  ;;  %v3767_v17 = vor.u32 1.1754944e-38, %v3766_v52 }
 0x8ee   :  { %v3797_v6 = vsub.f32 1.0, %v3796_v37  ;;  %v3804_v3 = vand.u32 2147483647, %v6348_v11  ;;  %v3871_v57 = vmul.f32 %v3870_v45, %v6319_v47  ;;  %v3806_v50 = vand.u32 2147483648, %v6348_v11 }
 0x8ef   :  { %3990 = vmatmul.f32.gmra.mxu2 %v3942_v44  ;;  %v3763_v55 = vsel %vm3762_vm6, %v4451_v39, %v3759_v32  ;;  %v3833_v5 = vmul.f32 %v3832_v27, %v6304_v43  ;;  %4454 = vrcp.f32 %v6363_v16  ;;  %vm3801_vm5 = vweird.f32 %v4453_v23 }
 0x8f0   :  { %v3768_v25 = vsel %vm3765_vm4, %v3767_v17, %v3763_v55  ;;  %v3798_v18 = vmul.f32 %v4453_v23, %v3797_v6  ;;  %v3872_v21 = vadd.f32 0.4994258, %v3871_v57  ;;  %v3898_v9 = vmul.f32 %v3897_v29, %v6244_v24 }
 0x8f1   :  { %v3769_v48 = vmul.f32 %v3768_v25, %v3744_v14  ;;  %v3834_v41 = vadd.f32 1.0, %v3833_v5  ;;  %v3820_v1 = vmul.f32 %v3819_v34, %v6304_v43  ;;  %vm3800_vm7 = vweird.f32 %v6348_v11 }
 0x8f2   :  { %v3799_v51 = vadd.f32 %v4453_v23, %v3798_v18  ;;  %v3873_v58 = vmul.f32 %v3872_v21, %v6319_v47  ;;  %v3860_v62 = vmul.f32 %v3859_v60, %v6319_v47  ;;  %vm3802_vm8 = vmor %vm3800_vm7, %vm3801_vm5  ;;  %v3807_v8 = vor.u32 1.1754944e-38, %v3806_v50 }
 0x8f3   :  { %v4139_v38 = vclamps-f32 %v3769_v48, 1.0  ;;  %4456 = vrcp.f32 %v3834_v41  ;;  %v3784_v0 = vmul.f32 %v3783_v61, %v6265_v35  ;;  %vm3805_vm9 = vcmp.eq.f32.partialorder %v3804_v3, 8.507059e+37 }
 0x8f4   :  { %v3803_v39 = vsel %vm3802_vm8, %v4453_v23, %v3799_v51  ;;  %v3874_v63 = vadd.f32 1.0, %v3873_v58  ;;  %v3599_v26 = vmul.f32 0.5, %v6234_v20  ;;  %v3821_v11 = vadd.f32 0.18741608, %v3820_v1 }
 0x8f5   :  { %v6379_v29 = vpop.eup %4454  ;;  %v3935_v13 = vadd.f32 1.0, %v4139_v38  ;;  %v3808_v14 = vsel %vm3805_vm9, %v3807_v8, %v3803_v39  ;;  %v3899_v31 = vadd.f32 0.05243302, %v3898_v9  ;;  %v3861_v56 = vadd.f32 0.18741608, %v3860_v62 }
 0x8f6   :  { %v3809_v33 = vmul.f32 %v3808_v14, %v3784_v0  ;;  %4458 = vrcp.f32 %v3874_v63  ;;  %v3916_v54 = vmul.f32 %v6379_v29, %v6363_v16  ;;  %v3822_v61 = vmul.f32 %v3821_v11, %v6304_v43 }
 0x8f7   :  { %v3943_v59 = vmul.f32 %v3935_v13, %v3599_v26  ;;  %v3900_v20 = vmul.f32 %v3899_v31, %v6244_v24  ;;  %v3600_v42 = vmul.f32 0.5, %v6255_v10  ;;  %v3862_v28 = vmul.f32 %v3861_v56, %v6319_v47 }
 0x8f8   :  { %v4140_v4 = vclamps-f32 %v3809_v33, 1.0  ;;  %v3917_v53 = vsub.f32 1.0, %v3916_v54  ;;  %v3846_v40 = vand.u32 2147483648, %v3834_v41  ;;  %v3823_v36 = vadd.f32 1.1283791, %v3822_v61 }
 0x8f9   :  { %v4457_v35 = vpop.eup %4456  ;;  %3993 = vmatmul.f32.gmra.mxu2 %v3943_v59  ;;  %v3844_v37 = vand.u32 2147483647, %v3834_v41  ;;  %v3901_v45 = vadd.f32 0.18741608, %v3900_v20  ;;  %v3863_v43 = vadd.f32 1.1283791, %v3862_v28  ;;  %vm3840_vm12 = vweird.f32 %v3834_v41 }
 0x8fa   :  { %v3936_v7 = vadd.f32 1.0, %v4140_v4  ;;  %v3836_v19 = vmul.f32 %v4457_v35, %v3834_v41  ;;  %vm3841_vm10 = vweird.f32 %v4457_v35  ;;  %v3886_v27 = vand.u32 2147483648, %v3874_v63 }
 0x8fb   :  { %v3918_v10 = vmul.f32 %v6379_v29, %v3917_v53  ;;  %vm3842_vm11 = vmor %vm3840_vm12, %vm3841_vm10  ;;  %v3847_v47 = vor.u32 1.1754944e-38, %v3846_v40  ;;  %v3884_v6 = vand.u32 2147483647, %v3874_v63  ;;  %v3824_v3 = vmul.f32 %v3823_v36, %v6285_v15 }
 0x8fc   :  { %v4459_v34 = vpop.eup %4458  ;;  %v3837_v52 = vsub.f32 1.0, %v3836_v19  ;;  %v3944_v23 = vmul.f32 %v3936_v7, %v3600_v42  ;;  %vm3845_vm14 = vcmp.eq.f32.partialorder %v3844_v37, 8.507059e+37  ;;  %v3902_v55 = vmul.f32 %v3901_v45, %v6244_v24 }
 0x8fd   :  { %v3876_v2 = vmul.f32 %v4459_v34, %v3874_v63  ;;  %vm3881_vm13 = vweird.f32 %v4459_v34  ;;  %vm3880_vm15 = vweird.f32 %v3874_v63  ;;  %v3887_v18 = vor.u32 1.1754944e-38, %v3886_v27 }
 0x8fe   :  { %v3838_v60 = vmul.f32 %v4457_v35, %v3837_v52  ;;  %vm3882_vm0 = vmor %vm3880_vm15, %vm3881_vm13  ;;  %v3919_v21 = vadd.f32 %v6379_v29, %v3918_v10  ;;  %vm3921_vm1 = vweird.f32 %v6379_v29  ;;  %v3864_v9 = vmul.f32 %v3863_v43, %v6307_v22 }
 0x8ff   :  { %v3877_v44 = vsub.f32 1.0, %v3876_v2  ;;  %vm3885_vm2 = vcmp.eq.f32.partialorder %v3884_v6, 8.507059e+37  ;;  %v3926_v15 = vand.u32 2147483648, %v6363_v16  ;;  %vm3920_vm3 = vweird.f32 %v6363_v16 }
 0x900   :  { %v3839_v32 = vadd.f32 %v4457_v35, %v3838_v60  ;;  %v3924_v24 = vand.u32 2147483647, %v6363_v16  ;;  %vm3922_vm4 = vmor %vm3920_vm3, %vm3921_vm1  ;;  %v3903_v58 = vadd.f32 1.1283791, %v3902_v55  ;;  %v3601_v62 = vmul.f32 0.5, %v6278_v12 }
 0x901   :  { %3996 = vmatmul.f32.gmra.mxu2 %v3944_v23  ;;  %v3878_v17 = vmul.f32 %v4459_v34, %v3877_v44  ;;  %v3923_v8 = vsel %vm3922_vm4, %v6379_v29, %v3919_v21  ;;  %v3927_v22 = vor.u32 1.1754944e-38, %v3926_v15  ;;  %v3602_v14 = vmul.f32 0.5, %v6300_v46  ;;  %v4427_v29 = vld [vmem:[%s6434_s23] ss:$0 sm:$0xff]  ;;  %s4859_s23 = smov [#allocation22]  }
 0x902   :  { %v3843_v57 = vsel %vm3842_vm11, %v4457_v35, %v3839_v32  ;;  %vm3925_vm6 = vcmp.eq.f32.partialorder %v3924_v24, 8.507059e+37  ;;  %v3904_v26 = vmul.f32 %v3903_v58, %v6225_v49  ;;  %v3603_v12 = vmul.f32 0.5, %v6212_v30  ;;  %s4021_s5 = sshll.u32 %s4859_s23, 4  ;;  %s4022_s5 = int_to_ptr.vmem [resolvable:$true] %s4021_s5 }
 0x903   :  { %v3848_v50 = vsel %vm3845_vm14, %v3847_v47, %v3843_v57  ;;  %v3879_v5 = vadd.f32 %v4459_v34, %v3878_v17  ;;  %v3928_v63 = vsel %vm3925_vm6, %v3927_v22, %v3923_v8 }
 0x904   :  { %v3849_v25 = vmul.f32 %v3848_v50, %v3824_v3  ;;  %v3929_v16 = vmul.f32 %v3928_v63, %v3904_v26 }
 0x905   :  { %v3883_v48 = vsel %vm3882_vm0, %v4459_v34, %v3879_v5 }
 0x906   :  { %v4141_v41 = vclamps-f32 %v3849_v25, 1.0  ;;  %v3888_v1 = vsel %vm3885_vm2, %v3887_v18, %v3883_v48  ;;  %v4143_v33 = vclamps-f32 %v3929_v16, 1.0 }
 0x907   :  { %v3889_v51 = vmul.f32 %v3888_v1, %v3864_v9 }
 0x908   :  { %v3937_v38 = vadd.f32 1.0, %v4141_v41  ;;  %v3939_v31 = vadd.f32 1.0, %v4143_v33 }
 0x909   :  { %v4142_v0 = vclamps-f32 %v3889_v51, 1.0 }
 0x90a   :  { %v3945_v39 = vmul.f32 %v3937_v38, %v3601_v62  ;;  %v3947_v56 = vmul.f32 %v3939_v31, %v3603_v12 }
 0x90b   :  { %v3938_v13 = vadd.f32 1.0, %v4142_v0 }
 0x90c   :  { %3999 = vmatmul.f32.gmra.mxu2 %v3945_v39 }
 0x90d   :  { %v3946_v11 = vmul.f32 %v3938_v13, %v3602_v14 }
 0x914   :  { %4002 = vmatmul.f32.gmra.mxu2 %v3946_v11 }
 0x91c   :  { %4005 = vmatmul.f32.gmra.mxu2 %v3947_v56 }
 0x94d   :  { %v3985_v59 = vpop.f32.mrf.mxu2 }
 0x94e   :  { %v3986_v4 = vadd.f32 %v4427_v29, %v3985_v59 }
 0x950   :  { %4009 = vst [vmem:[#allocation22] sm:$0xff] %v3986_v4 }
 0x963   :  { %v3988_v49 = vpop.f32.mrf.mxu2 }
 0x964   :  { %v3989_v54 = vadd.f32 %v4427_v29, %v3988_v49 }
 0x966   :  { %4010 = vst [vmem:[#allocation22 + $0x8] sm:$0xff] %v3989_v54 }
 0x972   :  { %v3991_v46 = vpop.f32.mrf.mxu2 }
 0x973   :  { %v3992_v35 = vadd.f32 %v4427_v29, %v3991_v46 }
 0x975   :  { %4011 = vst [vmem:[#allocation22 + $0x10] sm:$0xff] %v3992_v35 }
 0x97c   :  { %v3994_v61 = vpop.f32.mrf.mxu2 }
 0x97d   :  { %v3995_v7 = vadd.f32 %v4427_v29, %v3994_v61 }
 0x97f   :  { %4012 = vst [vmem:[#allocation22 + $0x18] sm:$0xff] %v3995_v7 }
 0x984   :  { %v3997_v19 = vpop.f32.mrf.mxu2 }
 0x985   :  { %v3998_v30 = vadd.f32 %v4427_v29, %v3997_v19 }
 0x987   :  { %4013 = vst [vmem:[#allocation22 + $0x20] sm:$0xff] %v3998_v30 }
 0x98f   :  { %v4000_v20 = vpop.f32.mrf.mxu2 }
 0x990   :  { %v4001_v42 = vadd.f32 %v4427_v29, %v4000_v20 }
 0x992   :  { %4014 = vst [vmem:[#allocation22 + $0x28] sm:$0xff] %v4001_v42 }
 0x997   :  { %v4003_v28 = vpop.f32.mrf.mxu2 }
 0x998   :  { %v4004_v34 = vadd.f32 %v4427_v29, %v4003_v28 }
 0x99a   :  { %4015 = vst [vmem:[#allocation22 + $0x30] sm:$0xff] %v4004_v34 }
 0x99f   :  { %v4006_v52 = vpop.f32.mrf.mxu2 }
 0x9a0   :  { %v4007_v53 = vadd.f32 %v4427_v29, %v4006_v52 }
 0x9a2   :  { %4016 = vst [vmem:[#allocation22 + $0x38] sm:$0xff] %v4007_v53 }
 0x9a3   :  { %4029 = dma.vmem_to_hbm [thread:$0]  %s4022_s5, 1024, %s4024_s28, [#allocation6], %s4843_s29, %s4843_s29, %s4844_s0  }
 0x9a4   :  { %4800 = dma.done.wait [#allocation6], 1024  }
 0x9a5   :  { %4801 = vsyncadd [#allocation6], 4294966272 }
 0x9a6   :  { %4034 = vsyncpa [#allocation5], 1 }
 0x9a7   :  { %4035 = vsyncpa [#allocation8], 1 }
 0x9a8   :  { %4036 = vsyncpa [#allocation11], 1 }
 0x9a9   :  { %4037 = vsyncpa [#allocation14], 1 }
 0x9aa   :  { %4038 = vsyncpa [#allocation17], 1 }
 0x9ab   :  { %4039 = vsyncpa [#allocation20], 1 }
 0x9ac   :  { %4040 = vsyncpa [#allocation6], 1 }

</bundles_post_ra>
